<compile_context>
chip_gen: v7x
topology: tpu7x:2x2x1
jax: 0.10.0
libtpu: 0.0.40
codegen_flags: <defaults>
</compile_context>

<pallas_src>
import jax
import jax.numpy as jnp
from jax.experimental import pallas as pl
from jax.experimental.pallas import tpu as pltpu


# ----------------------------- fused Pallas kernel ------------------------------

def _prediction_kernel(x_ref, w1_ref, b1_ref, w2_ref, b2_ref, wf_ref, bf_ref,
                       out_ref, h1, p1, h2, p2):
    """One grid step = one (28, 56) double-digit image -> int32 (argmax1 + argmax2).

    x_ref  : (28, 56)     f32  input image (two digits side by side)
    w1_ref : (5, 28, 256) f32  conv1 weights, repacked (see pack_params)
    b1_ref : (1, 256)     f32
    w2_ref : (5, 96, 256) f32  conv2 weights, repacked
    b2_ref : (1, 256)     f32
    wf_ref : (256, 10)    f32  fc weights (HWC flatten order)
    bf_ref : (1, 10)      f32
    out_ref: (1, 1)       int32
    h1, p1, h2, p2 : VMEM scratch activations (conv1 / pool1 / conv2 / pool2)
    """

    def cnn_argmax(col_off):
        # ---- conv1: 5x5, 1 -> 8 channels, valid, + bias + ReLU ----
        # lane layout of h1: (ow % 2) * 128 + (ow // 2) * 8 + c
        acc = jnp.zeros((24, 256), jnp.float32)
        for di in range(5):
            a = x_ref[pl.ds(di, 24), pl.ds(col_off, 28)]            # (24, 28)
            acc = acc + jnp.dot(a, w1_ref[di],
                                preferred_element_type=jnp.float32)
        h1[...] = jnp.maximum(acc + b1_ref[...], 0.0)

        # ---- 2x2 maxpool -> logical (12, 12, 8), stored as (12, 96) ----
        for i in range(12):
            t0 = jnp.maximum(h1[pl.ds(2 * i, 1), pl.ds(0, 96)],
                             h1[pl.ds(2 * i, 1), pl.ds(128, 96)])
            t1 = jnp.maximum(h1[pl.ds(2 * i + 1, 1), pl.ds(0, 96)],
                             h1[pl.ds(2 * i + 1, 1), pl.ds(128, 96)])
            p1[pl.ds(i, 1), :] = jnp.maximum(t0, t1)

        # ---- conv2: 5x5, 8 -> 16 channels, valid, + bias + ReLU ----
        # lane layout of h2: (ow % 2) * 128 + (ow // 2) * 16 + d
        acc2 = jnp.zeros((8, 256), jnp.float32)
        for di in range(5):
            a2 = p1[pl.ds(di, 8), :]                                 # (8, 96)
            acc2 = acc2 + jnp.dot(a2, w2_ref[di],
                                  preferred_element_type=jnp.float32)
        h2[...] = jnp.maximum(acc2 + b2_ref[...], 0.0)

        # ---- 2x2 maxpool -> logical (4, 4, 16), stored as (4, 64) ----
        for i in range(4):
            t0 = jnp.maximum(h2[pl.ds(2 * i, 1), pl.ds(0, 64)],
                             h2[pl.ds(2 * i, 1), pl.ds(128, 64)])
            t1 = jnp.maximum(h2[pl.ds(2 * i + 1, 1), pl.ds(0, 64)],
                             h2[pl.ds(2 * i + 1, 1), pl.ds(128, 64)])
            p2[pl.ds(i, 1), :] = jnp.maximum(t0, t1)

        # ---- fc 256 -> 10 (HWC flatten order) + argmax (first max, like torch) ----
        flat = jnp.concatenate([p2[pl.ds(0, 1), :], p2[pl.ds(1, 1), :],
                                p2[pl.ds(2, 1), :], p2[pl.ds(3, 1), :]],
                               axis=1)                               # (1, 256)
        logits = jnp.dot(flat, wf_ref[...],
                         preferred_element_type=jnp.float32) + bf_ref[...]
        m = jnp.max(logits, axis=1, keepdims=True)
        idx = jax.lax.broadcasted_iota(jnp.int32, logits.shape, 1)
        cand = jnp.where(logits == m, idx, jnp.int32(logits.shape[1]))
        return jnp.min(cand, axis=1, keepdims=True)                  # (1, 1) int32

    # Left digit at columns 0:28, right digit at 28:56.
    out_ref[...] = cnn_argmax(0) + cnn_argmax(28)


# --------------------------------- parameters -----------------------------------

def init_cnn_params(key):
    """Synthetic LeNet-ish classifier weights (stand-in for the wrapped `clf`)."""
    k1, k2, k3, k4, k5, k6 = jax.random.split(key, 6)
    w1 = 0.1 * jax.random.normal(k1, (5, 5, 1, 8), jnp.float32)     # HWIO
    b1 = 0.01 * jax.random.normal(k2, (8,), jnp.float32)
    w2 = 0.1 * jax.random.normal(k3, (5, 5, 8, 16), jnp.float32)    # HWIO
    b2 = 0.01 * jax.random.normal(k4, (16,), jnp.float32)
    # TODO(synk): fc weights use HWC flatten order; real torch weights (CHW flatten)
    # would need a row permutation before loading.
    wf = 0.1 * jax.random.normal(k5, (4 * 4 * 16, 10), jnp.float32)
    bf = 0.01 * jax.random.normal(k6, (10,), jnp.float32)
    return (w1, b1, w2, b2, wf, bf)


def pack_params(params):
    """Repack conv weights into the banded-matmul / lane-padded layout used by the kernel.

    For kernel row di the conv becomes A_di @ W_di with
      A_di[oh, w*Cin + cin]            = x[oh + di, w, cin]
      W_di[w*Cin + cin, col(ow, c)]    = w[di, w - ow, cin, c]  (zero outside the 5-tap band)
      col(ow, c) = (ow % 2) * 128 + (ow // 2) * Cout + c        (parity halves padded to 128)
    so the 2x2 width-pool is an aligned max of the two 128-lane halves.
    """
    w1, b1, w2, b2, wf, bf = params

    # conv1: Cin=1, 24 output positions, 8 output channels.
    w1k = w1[:, :, 0, :]                                              # (5, 5, 8)
    band1 = (jnp.arange(28)[None, :, None] ==
             (jnp.arange(24)[None, None, :] + jnp.arange(5)[:, None, None])
             ).astype(jnp.float32)                                    # (5, 28, 24)
    W1 = jnp.einsum('jwo,ijc->iwoc', band1, w1k)                      # (5, 28, 24, 8)
    W1 = W1.reshape(5, 28, 12, 2, 8).transpose(0, 1, 3, 2, 4)         # (5, 28, 2, 12, 8)
    W1 = jnp.pad(W1.reshape(5, 28, 2, 96), ((0, 0),) * 3 + ((0, 32),))
    W1 = W1.reshape(5, 28, 256)
    b1half = jnp.pad(jnp.tile(b1, 12), (0, 32))                       # (128,)
    b1c = jnp.concatenate([b1half, b1half]).reshape(1, 256)

    # conv2: Cin=8, 8 output positions, 16 output channels.
    band2 = (jnp.arange(12)[None, :, None] ==
             (jnp.arange(8)[None, None, :] + jnp.arange(5)[:, None, None])
             ).astype(jnp.float32)                                    # (5, 12, 8)
    W2 = jnp.einsum('jpo,ijcd->ipcod', band2, w2)                     # (5, 12, 8, 8, 16)
    W2 = W2.reshape(5, 12, 8, 4, 2, 16).transpose(0, 1, 2, 4, 3, 5)   # (5, 12, 8, 2, 4, 16)
    W2 = jnp.pad(W2.reshape(5, 96, 2, 64), ((0, 0),) * 3 + ((0, 64),))
    W2 = W2.reshape(5, 96, 256)
    b2half = jnp.pad(jnp.tile(b2, 4), (0, 64))                        # (128,)
    b2c = jnp.concatenate([b2half, b2half]).reshape(1, 256)

    return (W1, b1c, W2, b2c, wf, bf.reshape(1, 10))


# --------------------------------- forward pass ----------------------------------

@jax.jit
def prediction_forward(x, packed):
    """Mirror of Prediction.forward: reshape to (-1, 1, 28, 56), split into two 28x28
    digits, classify each with the CNN, return argmax1 + argmax2 per sample."""
    W1, b1c, W2, b2c, wf, bf = packed
    imgs = x.reshape(-1, 28, 56).astype(jnp.float32)   # channel dim is 1 -> dropped
    B = imgs.shape[0]
    out = pl.pallas_call(
        _prediction_kernel,
        out_shape=jax.ShapeDtypeStruct((B, 1, 1), jnp.int32),
        grid=(B,),
        in_specs=[
            pl.BlockSpec((None, 28, 56), lambda i: (i, 0, 0)),   # one double image / step
            pl.BlockSpec((5, 28, 256), lambda i: (0, 0, 0)),     # weights stay resident
            pl.BlockSpec((1, 256), lambda i: (0, 0)),
            pl.BlockSpec((5, 96, 256), lambda i: (0, 0, 0)),
            pl.BlockSpec((1, 256), lambda i: (0, 0)),
            pl.BlockSpec((256, 10), lambda i: (0, 0)),
            pl.BlockSpec((1, 10), lambda i: (0, 0)),
        ],
        out_specs=pl.BlockSpec((None, 1, 1), lambda i: (i, 0, 0)),
        scratch_shapes=[
            pltpu.VMEM((24, 256), jnp.float32),   # conv1 activations
            pltpu.VMEM((12, 96), jnp.float32),    # pool1 activations
            pltpu.VMEM((8, 256), jnp.float32),    # conv2 activations
            pltpu.VMEM((4, 64), jnp.float32),     # pool2 activations
        ],
        compiler_params=pltpu.CompilerParams(
            dimension_semantics=("parallel",)),   # shard batch across v7x's 2 TCs
    )(imgs, W1, b1c, W2, b2c, wf, bf)
    # TODO(synk): torch argmax returns int64; we return int32 (values 0..18 either way).
    return out.reshape(B)


# ------------------------- pure-JAX reference (validation) -----------------------

def reference_forward(x, params):
    w1, b1, w2, b2, wf, bf = params

    def cnn(img_nchw):
        h = jnp.transpose(img_nchw, (0, 2, 3, 1))                      # NHWC
        h = jax.lax.conv_general_dilated(
            h, w1, (1, 1), 'VALID',
            dimension_numbers=('NHWC', 'HWIO', 'NHWC')) + b1
        h = jnp.maximum(h, 0.0)
        h = jax.lax.reduce_window(h, -jnp.inf, jax.lax.max,
                                  (1, 2, 2, 1), (1, 2, 2, 1), 'VALID')
        h = jax.lax.conv_general_dilated(
            h, w2, (1, 1), 'VALID',
            dimension_numbers=('NHWC', 'HWIO', 'NHWC')) + b2
        h = jnp.maximum(h, 0.0)
        h = jax.lax.reduce_window(h, -jnp.inf, jax.lax.max,
                                  (1, 2, 2, 1), (1, 2, 2, 1), 'VALID')
        h = h.reshape(h.shape[0], -1)                                  # HWC flatten
        return jnp.argmax(h @ wf + bf, axis=1)

    img = x.reshape(-1, 1, 28, 56)
    return (cnn(img[:, :, :, :28]) + cnn(img[:, :, :, 28:])).astype(jnp.int32)


# --------------------------------------- main -------------------------------------

if __name__ == "__main__":
    key = jax.random.PRNGKey(0)
    kx, kp = jax.random.split(key)
    x = jax.random.normal(kx, (2, 1, 28, 56), jnp.float32)   # batch=2 double-digit images
    raw = init_cnn_params(kp)
    packed = pack_params(raw)

    pred = prediction_forward(x, packed)
    jax.block_until_ready(pred)
    assert pred.shape == (2,) and pred.dtype == jnp.int32

    ref = reference_forward(x, raw)
    assert bool(jnp.all(pred == ref)), (pred, ref)

    print("KERNEL_OK")
</pallas_src>

<mosaic_0001>
module attributes {stable_mosaic.version = 11 : i64} {
  func.func @_prediction_kernel(%arg0: i32, %arg1: memref<1x28x56xf32, #tpu.memory_space<vmem>>, %arg2: memref<5x28x256xf32, #tpu.memory_space<vmem>>, %arg3: memref<1x256xf32, #tpu.memory_space<vmem>>, %arg4: memref<5x96x256xf32, #tpu.memory_space<vmem>>, %arg5: memref<1x256xf32, #tpu.memory_space<vmem>>, %arg6: memref<256x10xf32, #tpu.memory_space<vmem>>, %arg7: memref<1x10xf32, #tpu.memory_space<vmem>>, %arg8: memref<1x1x1xi32, #tpu.memory_space<vmem>>, %arg9: memref<24x256xf32, #tpu.memory_space<vmem>>, %arg10: memref<12x96xf32, #tpu.memory_space<vmem>>, %arg11: memref<8x256xf32, #tpu.memory_space<vmem>>, %arg12: memref<4x64xf32, #tpu.memory_space<vmem>>) attributes {dimension_semantics = [#tpu.dimension_semantics<parallel>], iteration_bounds = array<i64: 2>, scalar_prefetch = 0 : i64, scratch_operands = 4 : i64, tpu.core_type = #tpu.core_type<tc>, window_params = [{transform_indices = @transform_0, window_bounds = array<i64: 1, 28, 56>}, {pipeline_mode = #tpu.pipeline_mode<synchronous>, transform_indices = @transform_1, window_bounds = array<i64: 5, 28, 256>}, {pipeline_mode = #tpu.pipeline_mode<synchronous>, transform_indices = @transform_2, window_bounds = array<i64: 1, 256>}, {pipeline_mode = #tpu.pipeline_mode<synchronous>, transform_indices = @transform_3, window_bounds = array<i64: 5, 96, 256>}, {pipeline_mode = #tpu.pipeline_mode<synchronous>, transform_indices = @transform_4, window_bounds = array<i64: 1, 256>}, {pipeline_mode = #tpu.pipeline_mode<synchronous>, transform_indices = @transform_5, window_bounds = array<i64: 256, 10>}, {pipeline_mode = #tpu.pipeline_mode<synchronous>, transform_indices = @transform_6, window_bounds = array<i64: 1, 10>}, {transform_indices = @transform_7, window_bounds = array<i64: 1, 1, 1>}]} {
    %cst = arith.constant 0.000000e+00 : f32
    %0 = vector.broadcast %cst : f32 to vector<24x256xf32>
    %c0 = arith.constant 0 : index
    %c0_0 = arith.constant 0 : index
    %c0_1 = arith.constant 0 : index
    %1 = vector.load %arg1[%c0, %c0_0, %c0_1] : memref<1x28x56xf32, #tpu.memory_space<vmem>>, vector<1x24x28xf32>
    %2 = vector.shape_cast %1 : vector<1x24x28xf32> to vector<24x28xf32>
    %c0_2 = arith.constant 0 : index
    %c0_3 = arith.constant 0 : index
    %c0_4 = arith.constant 0 : index
    %3 = vector.load %arg2[%c0_2, %c0_3, %c0_4] : memref<5x28x256xf32, #tpu.memory_space<vmem>>, vector<1x28x256xf32>
    %4 = vector.shape_cast %3 : vector<1x28x256xf32> to vector<28x256xf32>
    %cst_5 = arith.constant dense<0.000000e+00> : vector<24x256xf32>
    %5 = tpu.matmul %2, %4, %cst_5 {dimension_numbers = #tpu.dot_dimension_numbers<[1], [0], [0], [1], [0, 0, 1, 1], [], []>} : vector<24x28xf32>, vector<28x256xf32>, vector<24x256xf32> -> vector<24x256xf32>
    %6 = arith.addf %0, %5 : vector<24x256xf32>
    %c0_6 = arith.constant 0 : index
    %c1 = arith.constant 1 : index
    %c0_7 = arith.constant 0 : index
    %7 = vector.load %arg1[%c0_6, %c1, %c0_7] : memref<1x28x56xf32, #tpu.memory_space<vmem>>, vector<1x24x28xf32>
    %8 = vector.shape_cast %7 : vector<1x24x28xf32> to vector<24x28xf32>
    %c1_8 = arith.constant 1 : index
    %c0_9 = arith.constant 0 : index
    %c0_10 = arith.constant 0 : index
    %9 = vector.load %arg2[%c1_8, %c0_9, %c0_10] : memref<5x28x256xf32, #tpu.memory_space<vmem>>, vector<1x28x256xf32>
    %10 = vector.shape_cast %9 : vector<1x28x256xf32> to vector<28x256xf32>
    %cst_11 = arith.constant dense<0.000000e+00> : vector<24x256xf32>
    %11 = tpu.matmul %8, %10, %cst_11 {dimension_numbers = #tpu.dot_dimension_numbers<[1], [0], [0], [1], [0, 0, 1, 1], [], []>} : vector<24x28xf32>, vector<28x256xf32>, vector<24x256xf32> -> vector<24x256xf32>
    %12 = arith.addf %6, %11 : vector<24x256xf32>
    %c0_12 = arith.constant 0 : index
    %c2 = arith.constant 2 : index
    %c0_13 = arith.constant 0 : index
    %13 = vector.load %arg1[%c0_12, %c2, %c0_13] : memref<1x28x56xf32, #tpu.memory_space<vmem>>, vector<1x24x28xf32>
    %14 = vector.shape_cast %13 : vector<1x24x28xf32> to vector<24x28xf32>
    %c2_14 = arith.constant 2 : index
    %c0_15 = arith.constant 0 : index
    %c0_16 = arith.constant 0 : index
    %15 = vector.load %arg2[%c2_14, %c0_15, %c0_16] : memref<5x28x256xf32, #tpu.memory_space<vmem>>, vector<1x28x256xf32>
    %16 = vector.shape_cast %15 : vector<1x28x256xf32> to vector<28x256xf32>
    %cst_17 = arith.constant dense<0.000000e+00> : vector<24x256xf32>
    %17 = tpu.matmul %14, %16, %cst_17 {dimension_numbers = #tpu.dot_dimension_numbers<[1], [0], [0], [1], [0, 0, 1, 1], [], []>} : vector<24x28xf32>, vector<28x256xf32>, vector<24x256xf32> -> vector<24x256xf32>
    %18 = arith.addf %12, %17 : vector<24x256xf32>
    %c0_18 = arith.constant 0 : index
    %c3 = arith.constant 3 : index
    %c0_19 = arith.constant 0 : index
    %19 = vector.load %arg1[%c0_18, %c3, %c0_19] : memref<1x28x56xf32, #tpu.memory_space<vmem>>, vector<1x24x28xf32>
    %20 = vector.shape_cast %19 : vector<1x24x28xf32> to vector<24x28xf32>
    %c3_20 = arith.constant 3 : index
    %c0_21 = arith.constant 0 : index
    %c0_22 = arith.constant 0 : index
    %21 = vector.load %arg2[%c3_20, %c0_21, %c0_22] : memref<5x28x256xf32, #tpu.memory_space<vmem>>, vector<1x28x256xf32>
    %22 = vector.shape_cast %21 : vector<1x28x256xf32> to vector<28x256xf32>
    %cst_23 = arith.constant dense<0.000000e+00> : vector<24x256xf32>
    %23 = tpu.matmul %20, %22, %cst_23 {dimension_numbers = #tpu.dot_dimension_numbers<[1], [0], [0], [1], [0, 0, 1, 1], [], []>} : vector<24x28xf32>, vector<28x256xf32>, vector<24x256xf32> -> vector<24x256xf32>
    %24 = arith.addf %18, %23 : vector<24x256xf32>
    %c0_24 = arith.constant 0 : index
    %c4 = arith.constant 4 : index
    %c0_25 = arith.constant 0 : index
    %25 = vector.load %arg1[%c0_24, %c4, %c0_25] : memref<1x28x56xf32, #tpu.memory_space<vmem>>, vector<1x24x28xf32>
    %26 = vector.shape_cast %25 : vector<1x24x28xf32> to vector<24x28xf32>
    %c4_26 = arith.constant 4 : index
    %c0_27 = arith.constant 0 : index
    %c0_28 = arith.constant 0 : index
    %27 = vector.load %arg2[%c4_26, %c0_27, %c0_28] : memref<5x28x256xf32, #tpu.memory_space<vmem>>, vector<1x28x256xf32>
    %28 = vector.shape_cast %27 : vector<1x28x256xf32> to vector<28x256xf32>
    %cst_29 = arith.constant dense<0.000000e+00> : vector<24x256xf32>
    %29 = tpu.matmul %26, %28, %cst_29 {dimension_numbers = #tpu.dot_dimension_numbers<[1], [0], [0], [1], [0, 0, 1, 1], [], []>} : vector<24x28xf32>, vector<28x256xf32>, vector<24x256xf32> -> vector<24x256xf32>
    %30 = arith.addf %24, %29 : vector<24x256xf32>
    %c0_30 = arith.constant 0 : index
    %c0_31 = arith.constant 0 : index
    %31 = vector.load %arg3[%c0_30, %c0_31] : memref<1x256xf32, #tpu.memory_space<vmem>>, vector<1x256xf32>
    %32 = vector.broadcast %31 : vector<1x256xf32> to vector<24x256xf32>
    %33 = arith.addf %30, %32 : vector<24x256xf32>
    %cst_32 = arith.constant 0.000000e+00 : f32
    %34 = vector.broadcast %cst_32 : f32 to vector<24x256xf32>
    %35 = arith.maximumf %33, %34 : vector<24x256xf32>
    %c0_33 = arith.constant 0 : index
    %c0_34 = arith.constant 0 : index
    %36 = vector.load %arg9[%c0_33, %c0_34] : memref<24x256xf32, #tpu.memory_space<vmem>>, vector<24x256xf32>
    tpu.vector_store %arg9[%c0_33, %c0_34], %35 {strides = array<i32>} : memref<24x256xf32, #tpu.memory_space<vmem>>, vector<24x256xf32>,
    %c0_35 = arith.constant 0 : index
    %c0_36 = arith.constant 0 : index
    %37 = vector.load %arg9[%c0_35, %c0_36] : memref<24x256xf32, #tpu.memory_space<vmem>>, vector<1x96xf32>
    %c0_37 = arith.constant 0 : index
    %c128 = arith.constant 128 : index
    %38 = vector.load %arg9[%c0_37, %c128] : memref<24x256xf32, #tpu.memory_space<vmem>>, vector<1x96xf32>
    %39 = arith.maximumf %37, %38 : vector<1x96xf32>
    %c1_38 = arith.constant 1 : index
    %c0_39 = arith.constant 0 : index
    %40 = vector.load %arg9[%c1_38, %c0_39] : memref<24x256xf32, #tpu.memory_space<vmem>>, vector<1x96xf32>
    %c1_40 = arith.constant 1 : index
    %c128_41 = arith.constant 128 : index
    %41 = vector.load %arg9[%c1_40, %c128_41] : memref<24x256xf32, #tpu.memory_space<vmem>>, vector<1x96xf32>
    %42 = arith.maximumf %40, %41 : vector<1x96xf32>
    %43 = arith.maximumf %39, %42 : vector<1x96xf32>
    %c0_42 = arith.constant 0 : index
    %c0_43 = arith.constant 0 : index
    %44 = vector.load %arg10[%c0_42, %c0_43] : memref<12x96xf32, #tpu.memory_space<vmem>>, vector<1x96xf32>
    tpu.vector_store %arg10[%c0_42, %c0_43], %43 {strides = array<i32>} : memref<12x96xf32, #tpu.memory_space<vmem>>, vector<1x96xf32>,
    %c2_44 = arith.constant 2 : index
    %c0_45 = arith.constant 0 : index
    %45 = vector.load %arg9[%c2_44, %c0_45] : memref<24x256xf32, #tpu.memory_space<vmem>>, vector<1x96xf32>
    %c2_46 = arith.constant 2 : index
    %c128_47 = arith.constant 128 : index
    %46 = vector.load %arg9[%c2_46, %c128_47] : memref<24x256xf32, #tpu.memory_space<vmem>>, vector<1x96xf32>
    %47 = arith.maximumf %45, %46 : vector<1x96xf32>
    %c3_48 = arith.constant 3 : index
    %c0_49 = arith.constant 0 : index
    %48 = vector.load %arg9[%c3_48, %c0_49] : memref<24x256xf32, #tpu.memory_space<vmem>>, vector<1x96xf32>
    %c3_50 = arith.constant 3 : index
    %c128_51 = arith.constant 128 : index
    %49 = vector.load %arg9[%c3_50, %c128_51] : memref<24x256xf32, #tpu.memory_space<vmem>>, vector<1x96xf32>
    %50 = arith.maximumf %48, %49 : vector<1x96xf32>
    %51 = arith.maximumf %47, %50 : vector<1x96xf32>
    %c1_52 = arith.constant 1 : index
    %c0_53 = arith.constant 0 : index
    %52 = vector.load %arg10[%c1_52, %c0_53] : memref<12x96xf32, #tpu.memory_space<vmem>>, vector<1x96xf32>
    tpu.vector_store %arg10[%c1_52, %c0_53], %51 {strides = array<i32>} : memref<12x96xf32, #tpu.memory_space<vmem>>, vector<1x96xf32>,
    %c4_54 = arith.constant 4 : index
    %c0_55 = arith.constant 0 : index
    %53 = vector.load %arg9[%c4_54, %c0_55] : memref<24x256xf32, #tpu.memory_space<vmem>>, vector<1x96xf32>
    %c4_56 = arith.constant 4 : index
    %c128_57 = arith.constant 128 : index
    %54 = vector.load %arg9[%c4_56, %c128_57] : memref<24x256xf32, #tpu.memory_space<vmem>>, vector<1x96xf32>
    %55 = arith.maximumf %53, %54 : vector<1x96xf32>
    %c5 = arith.constant 5 : index
    %c0_58 = arith.constant 0 : index
    %56 = vector.load %arg9[%c5, %c0_58] : memref<24x256xf32, #tpu.memory_space<vmem>>, vector<1x96xf32>
    %c5_59 = arith.constant 5 : index
    %c128_60 = arith.constant 128 : index
    %57 = vector.load %arg9[%c5_59, %c128_60] : memref<24x256xf32, #tpu.memory_space<vmem>>, vector<1x96xf32>
    %58 = arith.maximumf %56, %57 : vector<1x96xf32>
    %59 = arith.maximumf %55, %58 : vector<1x96xf32>
    %c2_61 = arith.constant 2 : index
    %c0_62 = arith.constant 0 : index
    %60 = vector.load %arg10[%c2_61, %c0_62] : memref<12x96xf32, #tpu.memory_space<vmem>>, vector<1x96xf32>
    tpu.vector_store %arg10[%c2_61, %c0_62], %59 {strides = array<i32>} : memref<12x96xf32, #tpu.memory_space<vmem>>, vector<1x96xf32>,
    %c6 = arith.constant 6 : index
    %c0_63 = arith.constant 0 : index
    %61 = vector.load %arg9[%c6, %c0_63] : memref<24x256xf32, #tpu.memory_space<vmem>>, vector<1x96xf32>
    %c6_64 = arith.constant 6 : index
    %c128_65 = arith.constant 128 : index
    %62 = vector.load %arg9[%c6_64, %c128_65] : memref<24x256xf32, #tpu.memory_space<vmem>>, vector<1x96xf32>
    %63 = arith.maximumf %61, %62 : vector<1x96xf32>
    %c7 = arith.constant 7 : index
    %c0_66 = arith.constant 0 : index
    %64 = vector.load %arg9[%c7, %c0_66] : memref<24x256xf32, #tpu.memory_space<vmem>>, vector<1x96xf32>
    %c7_67 = arith.constant 7 : index
    %c128_68 = arith.constant 128 : index
    %65 = vector.load %arg9[%c7_67, %c128_68] : memref<24x256xf32, #tpu.memory_space<vmem>>, vector<1x96xf32>
    %66 = arith.maximumf %64, %65 : vector<1x96xf32>
    %67 = arith.maximumf %63, %66 : vector<1x96xf32>
    %c3_69 = arith.constant 3 : index
    %c0_70 = arith.constant 0 : index
    %68 = vector.load %arg10[%c3_69, %c0_70] : memref<12x96xf32, #tpu.memory_space<vmem>>, vector<1x96xf32>
    tpu.vector_store %arg10[%c3_69, %c0_70], %67 {strides = array<i32>} : memref<12x96xf32, #tpu.memory_space<vmem>>, vector<1x96xf32>,
    %c8 = arith.constant 8 : index
    %c0_71 = arith.constant 0 : index
    %69 = vector.load %arg9[%c8, %c0_71] : memref<24x256xf32, #tpu.memory_space<vmem>>, vector<1x96xf32>
    %c8_72 = arith.constant 8 : index
    %c128_73 = arith.constant 128 : index
    %70 = vector.load %arg9[%c8_72, %c128_73] : memref<24x256xf32, #tpu.memory_space<vmem>>, vector<1x96xf32>
    %71 = arith.maximumf %69, %70 : vector<1x96xf32>
    %c9 = arith.constant 9 : index
    %c0_74 = arith.constant 0 : index
    %72 = vector.load %arg9[%c9, %c0_74] : memref<24x256xf32, #tpu.memory_space<vmem>>, vector<1x96xf32>
    %c9_75 = arith.constant 9 : index
    %c128_76 = arith.constant 128 : index
    %73 = vector.load %arg9[%c9_75, %c128_76] : memref<24x256xf32, #tpu.memory_space<vmem>>, vector<1x96xf32>
    %74 = arith.maximumf %72, %73 : vector<1x96xf32>
    %75 = arith.maximumf %71, %74 : vector<1x96xf32>
    %c4_77 = arith.constant 4 : index
    %c0_78 = arith.constant 0 : index
    %76 = vector.load %arg10[%c4_77, %c0_78] : memref<12x96xf32, #tpu.memory_space<vmem>>, vector<1x96xf32>
    tpu.vector_store %arg10[%c4_77, %c0_78], %75 {strides = array<i32>} : memref<12x96xf32, #tpu.memory_space<vmem>>, vector<1x96xf32>,
    %c10 = arith.constant 10 : index
    %c0_79 = arith.constant 0 : index
    %77 = vector.load %arg9[%c10, %c0_79] : memref<24x256xf32, #tpu.memory_space<vmem>>, vector<1x96xf32>
    %c10_80 = arith.constant 10 : index
    %c128_81 = arith.constant 128 : index
    %78 = vector.load %arg9[%c10_80, %c128_81] : memref<24x256xf32, #tpu.memory_space<vmem>>, vector<1x96xf32>
    %79 = arith.maximumf %77, %78 : vector<1x96xf32>
    %c11 = arith.constant 11 : index
    %c0_82 = arith.constant 0 : index
    %80 = vector.load %arg9[%c11, %c0_82] : memref<24x256xf32, #tpu.memory_space<vmem>>, vector<1x96xf32>
    %c11_83 = arith.constant 11 : index
    %c128_84 = arith.constant 128 : index
    %81 = vector.load %arg9[%c11_83, %c128_84] : memref<24x256xf32, #tpu.memory_space<vmem>>, vector<1x96xf32>
    %82 = arith.maximumf %80, %81 : vector<1x96xf32>
    %83 = arith.maximumf %79, %82 : vector<1x96xf32>
    %c5_85 = arith.constant 5 : index
    %c0_86 = arith.constant 0 : index
    %84 = vector.load %arg10[%c5_85, %c0_86] : memref<12x96xf32, #tpu.memory_space<vmem>>, vector<1x96xf32>
    tpu.vector_store %arg10[%c5_85, %c0_86], %83 {strides = array<i32>} : memref<12x96xf32, #tpu.memory_space<vmem>>, vector<1x96xf32>,
    %c12 = arith.constant 12 : index
    %c0_87 = arith.constant 0 : index
    %85 = vector.load %arg9[%c12, %c0_87] : memref<24x256xf32, #tpu.memory_space<vmem>>, vector<1x96xf32>
    %c12_88 = arith.constant 12 : index
    %c128_89 = arith.constant 128 : index
    %86 = vector.load %arg9[%c12_88, %c128_89] : memref<24x256xf32, #tpu.memory_space<vmem>>, vector<1x96xf32>
    %87 = arith.maximumf %85, %86 : vector<1x96xf32>
    %c13 = arith.constant 13 : index
    %c0_90 = arith.constant 0 : index
    %88 = vector.load %arg9[%c13, %c0_90] : memref<24x256xf32, #tpu.memory_space<vmem>>, vector<1x96xf32>
    %c13_91 = arith.constant 13 : index
    %c128_92 = arith.constant 128 : index
    %89 = vector.load %arg9[%c13_91, %c128_92] : memref<24x256xf32, #tpu.memory_space<vmem>>, vector<1x96xf32>
    %90 = arith.maximumf %88, %89 : vector<1x96xf32>
    %91 = arith.maximumf %87, %90 : vector<1x96xf32>
    %c6_93 = arith.constant 6 : index
    %c0_94 = arith.constant 0 : index
    %92 = vector.load %arg10[%c6_93, %c0_94] : memref<12x96xf32, #tpu.memory_space<vmem>>, vector<1x96xf32>
    tpu.vector_store %arg10[%c6_93, %c0_94], %91 {strides = array<i32>} : memref<12x96xf32, #tpu.memory_space<vmem>>, vector<1x96xf32>,
    %c14 = arith.constant 14 : index
    %c0_95 = arith.constant 0 : index
    %93 = vector.load %arg9[%c14, %c0_95] : memref<24x256xf32, #tpu.memory_space<vmem>>, vector<1x96xf32>
    %c14_96 = arith.constant 14 : index
    %c128_97 = arith.constant 128 : index
    %94 = vector.load %arg9[%c14_96, %c128_97] : memref<24x256xf32, #tpu.memory_space<vmem>>, vector<1x96xf32>
    %95 = arith.maximumf %93, %94 : vector<1x96xf32>
    %c15 = arith.constant 15 : index
    %c0_98 = arith.constant 0 : index
    %96 = vector.load %arg9[%c15, %c0_98] : memref<24x256xf32, #tpu.memory_space<vmem>>, vector<1x96xf32>
    %c15_99 = arith.constant 15 : index
    %c128_100 = arith.constant 128 : index
    %97 = vector.load %arg9[%c15_99, %c128_100] : memref<24x256xf32, #tpu.memory_space<vmem>>, vector<1x96xf32>
    %98 = arith.maximumf %96, %97 : vector<1x96xf32>
    %99 = arith.maximumf %95, %98 : vector<1x96xf32>
    %c7_101 = arith.constant 7 : index
    %c0_102 = arith.constant 0 : index
    %100 = vector.load %arg10[%c7_101, %c0_102] : memref<12x96xf32, #tpu.memory_space<vmem>>, vector<1x96xf32>
    tpu.vector_store %arg10[%c7_101, %c0_102], %99 {strides = array<i32>} : memref<12x96xf32, #tpu.memory_space<vmem>>, vector<1x96xf32>,
    %c16 = arith.constant 16 : index
    %c0_103 = arith.constant 0 : index
    %101 = vector.load %arg9[%c16, %c0_103] : memref<24x256xf32, #tpu.memory_space<vmem>>, vector<1x96xf32>
    %c16_104 = arith.constant 16 : index
    %c128_105 = arith.constant 128 : index
    %102 = vector.load %arg9[%c16_104, %c128_105] : memref<24x256xf32, #tpu.memory_space<vmem>>, vector<1x96xf32>
    %103 = arith.maximumf %101, %102 : vector<1x96xf32>
    %c17 = arith.constant 17 : index
    %c0_106 = arith.constant 0 : index
    %104 = vector.load %arg9[%c17, %c0_106] : memref<24x256xf32, #tpu.memory_space<vmem>>, vector<1x96xf32>
    %c17_107 = arith.constant 17 : index
    %c128_108 = arith.constant 128 : index
    %105 = vector.load %arg9[%c17_107, %c128_108] : memref<24x256xf32, #tpu.memory_space<vmem>>, vector<1x96xf32>
    %106 = arith.maximumf %104, %105 : vector<1x96xf32>
    %107 = arith.maximumf %103, %106 : vector<1x96xf32>
    %c8_109 = arith.constant 8 : index
    %c0_110 = arith.constant 0 : index
    %108 = vector.load %arg10[%c8_109, %c0_110] : memref<12x96xf32, #tpu.memory_space<vmem>>, vector<1x96xf32>
    tpu.vector_store %arg10[%c8_109, %c0_110], %107 {strides = array<i32>} : memref<12x96xf32, #tpu.memory_space<vmem>>, vector<1x96xf32>,
    %c18 = arith.constant 18 : index
    %c0_111 = arith.constant 0 : index
    %109 = vector.load %arg9[%c18, %c0_111] : memref<24x256xf32, #tpu.memory_space<vmem>>, vector<1x96xf32>
    %c18_112 = arith.constant 18 : index
    %c128_113 = arith.constant 128 : index
    %110 = vector.load %arg9[%c18_112, %c128_113] : memref<24x256xf32, #tpu.memory_space<vmem>>, vector<1x96xf32>
    %111 = arith.maximumf %109, %110 : vector<1x96xf32>
    %c19 = arith.constant 19 : index
    %c0_114 = arith.constant 0 : index
    %112 = vector.load %arg9[%c19, %c0_114] : memref<24x256xf32, #tpu.memory_space<vmem>>, vector<1x96xf32>
    %c19_115 = arith.constant 19 : index
    %c128_116 = arith.constant 128 : index
    %113 = vector.load %arg9[%c19_115, %c128_116] : memref<24x256xf32, #tpu.memory_space<vmem>>, vector<1x96xf32>
    %114 = arith.maximumf %112, %113 : vector<1x96xf32>
    %115 = arith.maximumf %111, %114 : vector<1x96xf32>
    %c9_117 = arith.constant 9 : index
    %c0_118 = arith.constant 0 : index
    %116 = vector.load %arg10[%c9_117, %c0_118] : memref<12x96xf32, #tpu.memory_space<vmem>>, vector<1x96xf32>
    tpu.vector_store %arg10[%c9_117, %c0_118], %115 {strides = array<i32>} : memref<12x96xf32, #tpu.memory_space<vmem>>, vector<1x96xf32>,
    %c20 = arith.constant 20 : index
    %c0_119 = arith.constant 0 : index
    %117 = vector.load %arg9[%c20, %c0_119] : memref<24x256xf32, #tpu.memory_space<vmem>>, vector<1x96xf32>
    %c20_120 = arith.constant 20 : index
    %c128_121 = arith.constant 128 : index
    %118 = vector.load %arg9[%c20_120, %c128_121] : memref<24x256xf32, #tpu.memory_space<vmem>>, vector<1x96xf32>
    %119 = arith.maximumf %117, %118 : vector<1x96xf32>
    %c21 = arith.constant 21 : index
    %c0_122 = arith.constant 0 : index
    %120 = vector.load %arg9[%c21, %c0_122] : memref<24x256xf32, #tpu.memory_space<vmem>>, vector<1x96xf32>
    %c21_123 = arith.constant 21 : index
    %c128_124 = arith.constant 128 : index
    %121 = vector.load %arg9[%c21_123, %c128_124] : memref<24x256xf32, #tpu.memory_space<vmem>>, vector<1x96xf32>
    %122 = arith.maximumf %120, %121 : vector<1x96xf32>
    %123 = arith.maximumf %119, %122 : vector<1x96xf32>
    %c10_125 = arith.constant 10 : index
    %c0_126 = arith.constant 0 : index
    %124 = vector.load %arg10[%c10_125, %c0_126] : memref<12x96xf32, #tpu.memory_space<vmem>>, vector<1x96xf32>
    tpu.vector_store %arg10[%c10_125, %c0_126], %123 {strides = array<i32>} : memref<12x96xf32, #tpu.memory_space<vmem>>, vector<1x96xf32>,
    %c22 = arith.constant 22 : index
    %c0_127 = arith.constant 0 : index
    %125 = vector.load %arg9[%c22, %c0_127] : memref<24x256xf32, #tpu.memory_space<vmem>>, vector<1x96xf32>
    %c22_128 = arith.constant 22 : index
    %c128_129 = arith.constant 128 : index
    %126 = vector.load %arg9[%c22_128, %c128_129] : memref<24x256xf32, #tpu.memory_space<vmem>>, vector<1x96xf32>
    %127 = arith.maximumf %125, %126 : vector<1x96xf32>
    %c23 = arith.constant 23 : index
    %c0_130 = arith.constant 0 : index
    %128 = vector.load %arg9[%c23, %c0_130] : memref<24x256xf32, #tpu.memory_space<vmem>>, vector<1x96xf32>
    %c23_131 = arith.constant 23 : index
    %c128_132 = arith.constant 128 : index
    %129 = vector.load %arg9[%c23_131, %c128_132] : memref<24x256xf32, #tpu.memory_space<vmem>>, vector<1x96xf32>
    %130 = arith.maximumf %128, %129 : vector<1x96xf32>
    %131 = arith.maximumf %127, %130 : vector<1x96xf32>
    %c11_133 = arith.constant 11 : index
    %c0_134 = arith.constant 0 : index
    %132 = vector.load %arg10[%c11_133, %c0_134] : memref<12x96xf32, #tpu.memory_space<vmem>>, vector<1x96xf32>
    tpu.vector_store %arg10[%c11_133, %c0_134], %131 {strides = array<i32>} : memref<12x96xf32, #tpu.memory_space<vmem>>, vector<1x96xf32>,
    %cst_135 = arith.constant 0.000000e+00 : f32
    %133 = vector.broadcast %cst_135 : f32 to vector<8x256xf32>
    %c0_136 = arith.constant 0 : index
    %c0_137 = arith.constant 0 : index
    %134 = vector.load %arg10[%c0_136, %c0_137] : memref<12x96xf32, #tpu.memory_space<vmem>>, vector<8x96xf32>
    %c0_138 = arith.constant 0 : index
    %c0_139 = arith.constant 0 : index
    %c0_140 = arith.constant 0 : index
    %135 = vector.load %arg4[%c0_138, %c0_139, %c0_140] : memref<5x96x256xf32, #tpu.memory_space<vmem>>, vector<1x96x256xf32>
    %136 = vector.shape_cast %135 : vector<1x96x256xf32> to vector<96x256xf32>
    %cst_141 = arith.constant dense<0.000000e+00> : vector<8x256xf32>
    %137 = tpu.matmul %134, %136, %cst_141 {dimension_numbers = #tpu.dot_dimension_numbers<[1], [0], [0], [1], [0, 0, 1, 1], [], []>} : vector<8x96xf32>, vector<96x256xf32>, vector<8x256xf32> -> vector<8x256xf32>
    %138 = arith.addf %133, %137 : vector<8x256xf32>
    %c1_142 = arith.constant 1 : index
    %c0_143 = arith.constant 0 : index
    %139 = vector.load %arg10[%c1_142, %c0_143] : memref<12x96xf32, #tpu.memory_space<vmem>>, vector<8x96xf32>
    %c1_144 = arith.constant 1 : index
    %c0_145 = arith.constant 0 : index
    %c0_146 = arith.constant 0 : index
    %140 = vector.load %arg4[%c1_144, %c0_145, %c0_146] : memref<5x96x256xf32, #tpu.memory_space<vmem>>, vector<1x96x256xf32>
    %141 = vector.shape_cast %140 : vector<1x96x256xf32> to vector<96x256xf32>
    %cst_147 = arith.constant dense<0.000000e+00> : vector<8x256xf32>
    %142 = tpu.matmul %139, %141, %cst_147 {dimension_numbers = #tpu.dot_dimension_numbers<[1], [0], [0], [1], [0, 0, 1, 1], [], []>} : vector<8x96xf32>, vector<96x256xf32>, vector<8x256xf32> -> vector<8x256xf32>
    %143 = arith.addf %138, %142 : vector<8x256xf32>
    %c2_148 = arith.constant 2 : index
    %c0_149 = arith.constant 0 : index
    %144 = vector.load %arg10[%c2_148, %c0_149] : memref<12x96xf32, #tpu.memory_space<vmem>>, vector<8x96xf32>
    %c2_150 = arith.constant 2 : index
    %c0_151 = arith.constant 0 : index
    %c0_152 = arith.constant 0 : index
    %145 = vector.load %arg4[%c2_150, %c0_151, %c0_152] : memref<5x96x256xf32, #tpu.memory_space<vmem>>, vector<1x96x256xf32>
    %146 = vector.shape_cast %145 : vector<1x96x256xf32> to vector<96x256xf32>
    %cst_153 = arith.constant dense<0.000000e+00> : vector<8x256xf32>
    %147 = tpu.matmul %144, %146, %cst_153 {dimension_numbers = #tpu.dot_dimension_numbers<[1], [0], [0], [1], [0, 0, 1, 1], [], []>} : vector<8x96xf32>, vector<96x256xf32>, vector<8x256xf32> -> vector<8x256xf32>
    %148 = arith.addf %143, %147 : vector<8x256xf32>
    %c3_154 = arith.constant 3 : index
    %c0_155 = arith.constant 0 : index
    %149 = vector.load %arg10[%c3_154, %c0_155] : memref<12x96xf32, #tpu.memory_space<vmem>>, vector<8x96xf32>
    %c3_156 = arith.constant 3 : index
    %c0_157 = arith.constant 0 : index
    %c0_158 = arith.constant 0 : index
    %150 = vector.load %arg4[%c3_156, %c0_157, %c0_158] : memref<5x96x256xf32, #tpu.memory_space<vmem>>, vector<1x96x256xf32>
    %151 = vector.shape_cast %150 : vector<1x96x256xf32> to vector<96x256xf32>
    %cst_159 = arith.constant dense<0.000000e+00> : vector<8x256xf32>
    %152 = tpu.matmul %149, %151, %cst_159 {dimension_numbers = #tpu.dot_dimension_numbers<[1], [0], [0], [1], [0, 0, 1, 1], [], []>} : vector<8x96xf32>, vector<96x256xf32>, vector<8x256xf32> -> vector<8x256xf32>
    %153 = arith.addf %148, %152 : vector<8x256xf32>
    %c4_160 = arith.constant 4 : index
    %c0_161 = arith.constant 0 : index
    %154 = vector.load %arg10[%c4_160, %c0_161] : memref<12x96xf32, #tpu.memory_space<vmem>>, vector<8x96xf32>
    %c4_162 = arith.constant 4 : index
    %c0_163 = arith.constant 0 : index
    %c0_164 = arith.constant 0 : index
    %155 = vector.load %arg4[%c4_162, %c0_163, %c0_164] : memref<5x96x256xf32, #tpu.memory_space<vmem>>, vector<1x96x256xf32>
    %156 = vector.shape_cast %155 : vector<1x96x256xf32> to vector<96x256xf32>
    %cst_165 = arith.constant dense<0.000000e+00> : vector<8x256xf32>
    %157 = tpu.matmul %154, %156, %cst_165 {dimension_numbers = #tpu.dot_dimension_numbers<[1], [0], [0], [1], [0, 0, 1, 1], [], []>} : vector<8x96xf32>, vector<96x256xf32>, vector<8x256xf32> -> vector<8x256xf32>
    %158 = arith.addf %153, %157 : vector<8x256xf32>
    %c0_166 = arith.constant 0 : index
    %c0_167 = arith.constant 0 : index
    %159 = vector.load %arg5[%c0_166, %c0_167] : memref<1x256xf32, #tpu.memory_space<vmem>>, vector<1x256xf32>
    %160 = vector.broadcast %159 : vector<1x256xf32> to vector<8x256xf32>
    %161 = arith.addf %158, %160 : vector<8x256xf32>
    %cst_168 = arith.constant 0.000000e+00 : f32
    %162 = vector.broadcast %cst_168 : f32 to vector<8x256xf32>
    %163 = arith.maximumf %161, %162 : vector<8x256xf32>
    %c0_169 = arith.constant 0 : index
    %c0_170 = arith.constant 0 : index
    %164 = vector.load %arg11[%c0_169, %c0_170] : memref<8x256xf32, #tpu.memory_space<vmem>>, vector<8x256xf32>
    tpu.vector_store %arg11[%c0_169, %c0_170], %163 {strides = array<i32>} : memref<8x256xf32, #tpu.memory_space<vmem>>, vector<8x256xf32>,
    %c0_171 = arith.constant 0 : index
    %c0_172 = arith.constant 0 : index
    %165 = vector.load %arg11[%c0_171, %c0_172] : memref<8x256xf32, #tpu.memory_space<vmem>>, vector<1x64xf32>
    %c0_173 = arith.constant 0 : index
    %c128_174 = arith.constant 128 : index
    %166 = vector.load %arg11[%c0_173, %c128_174] : memref<8x256xf32, #tpu.memory_space<vmem>>, vector<1x64xf32>
    %167 = arith.maximumf %165, %166 : vector<1x64xf32>
    %c1_175 = arith.constant 1 : index
    %c0_176 = arith.constant 0 : index
    %168 = vector.load %arg11[%c1_175, %c0_176] : memref<8x256xf32, #tpu.memory_space<vmem>>, vector<1x64xf32>
    %c1_177 = arith.constant 1 : index
    %c128_178 = arith.constant 128 : index
    %169 = vector.load %arg11[%c1_177, %c128_178] : memref<8x256xf32, #tpu.memory_space<vmem>>, vector<1x64xf32>
    %170 = arith.maximumf %168, %169 : vector<1x64xf32>
    %171 = arith.maximumf %167, %170 : vector<1x64xf32>
    %c0_179 = arith.constant 0 : index
    %c0_180 = arith.constant 0 : index
    %172 = vector.load %arg12[%c0_179, %c0_180] : memref<4x64xf32, #tpu.memory_space<vmem>>, vector<1x64xf32>
    tpu.vector_store %arg12[%c0_179, %c0_180], %171 {strides = array<i32>} : memref<4x64xf32, #tpu.memory_space<vmem>>, vector<1x64xf32>,
    %c2_181 = arith.constant 2 : index
    %c0_182 = arith.constant 0 : index
    %173 = vector.load %arg11[%c2_181, %c0_182] : memref<8x256xf32, #tpu.memory_space<vmem>>, vector<1x64xf32>
    %c2_183 = arith.constant 2 : index
    %c128_184 = arith.constant 128 : index
    %174 = vector.load %arg11[%c2_183, %c128_184] : memref<8x256xf32, #tpu.memory_space<vmem>>, vector<1x64xf32>
    %175 = arith.maximumf %173, %174 : vector<1x64xf32>
    %c3_185 = arith.constant 3 : index
    %c0_186 = arith.constant 0 : index
    %176 = vector.load %arg11[%c3_185, %c0_186] : memref<8x256xf32, #tpu.memory_space<vmem>>, vector<1x64xf32>
    %c3_187 = arith.constant 3 : index
    %c128_188 = arith.constant 128 : index
    %177 = vector.load %arg11[%c3_187, %c128_188] : memref<8x256xf32, #tpu.memory_space<vmem>>, vector<1x64xf32>
    %178 = arith.maximumf %176, %177 : vector<1x64xf32>
    %179 = arith.maximumf %175, %178 : vector<1x64xf32>
    %c1_189 = arith.constant 1 : index
    %c0_190 = arith.constant 0 : index
    %180 = vector.load %arg12[%c1_189, %c0_190] : memref<4x64xf32, #tpu.memory_space<vmem>>, vector<1x64xf32>
    tpu.vector_store %arg12[%c1_189, %c0_190], %179 {strides = array<i32>} : memref<4x64xf32, #tpu.memory_space<vmem>>, vector<1x64xf32>,
    %c4_191 = arith.constant 4 : index
    %c0_192 = arith.constant 0 : index
    %181 = vector.load %arg11[%c4_191, %c0_192] : memref<8x256xf32, #tpu.memory_space<vmem>>, vector<1x64xf32>
    %c4_193 = arith.constant 4 : index
    %c128_194 = arith.constant 128 : index
    %182 = vector.load %arg11[%c4_193, %c128_194] : memref<8x256xf32, #tpu.memory_space<vmem>>, vector<1x64xf32>
    %183 = arith.maximumf %181, %182 : vector<1x64xf32>
    %c5_195 = arith.constant 5 : index
    %c0_196 = arith.constant 0 : index
    %184 = vector.load %arg11[%c5_195, %c0_196] : memref<8x256xf32, #tpu.memory_space<vmem>>, vector<1x64xf32>
    %c5_197 = arith.constant 5 : index
    %c128_198 = arith.constant 128 : index
    %185 = vector.load %arg11[%c5_197, %c128_198] : memref<8x256xf32, #tpu.memory_space<vmem>>, vector<1x64xf32>
    %186 = arith.maximumf %184, %185 : vector<1x64xf32>
    %187 = arith.maximumf %183, %186 : vector<1x64xf32>
    %c2_199 = arith.constant 2 : index
    %c0_200 = arith.constant 0 : index
    %188 = vector.load %arg12[%c2_199, %c0_200] : memref<4x64xf32, #tpu.memory_space<vmem>>, vector<1x64xf32>
    tpu.vector_store %arg12[%c2_199, %c0_200], %187 {strides = array<i32>} : memref<4x64xf32, #tpu.memory_space<vmem>>, vector<1x64xf32>,
    %c6_201 = arith.constant 6 : index
    %c0_202 = arith.constant 0 : index
    %189 = vector.load %arg11[%c6_201, %c0_202] : memref<8x256xf32, #tpu.memory_space<vmem>>, vector<1x64xf32>
    %c6_203 = arith.constant 6 : index
    %c128_204 = arith.constant 128 : index
    %190 = vector.load %arg11[%c6_203, %c128_204] : memref<8x256xf32, #tpu.memory_space<vmem>>, vector<1x64xf32>
    %191 = arith.maximumf %189, %190 : vector<1x64xf32>
    %c7_205 = arith.constant 7 : index
    %c0_206 = arith.constant 0 : index
    %192 = vector.load %arg11[%c7_205, %c0_206] : memref<8x256xf32, #tpu.memory_space<vmem>>, vector<1x64xf32>
    %c7_207 = arith.constant 7 : index
    %c128_208 = arith.constant 128 : index
    %193 = vector.load %arg11[%c7_207, %c128_208] : memref<8x256xf32, #tpu.memory_space<vmem>>, vector<1x64xf32>
    %194 = arith.maximumf %192, %193 : vector<1x64xf32>
    %195 = arith.maximumf %191, %194 : vector<1x64xf32>
    %c3_209 = arith.constant 3 : index
    %c0_210 = arith.constant 0 : index
    %196 = vector.load %arg12[%c3_209, %c0_210] : memref<4x64xf32, #tpu.memory_space<vmem>>, vector<1x64xf32>
    tpu.vector_store %arg12[%c3_209, %c0_210], %195 {strides = array<i32>} : memref<4x64xf32, #tpu.memory_space<vmem>>, vector<1x64xf32>,
    %c0_211 = arith.constant 0 : index
    %c0_212 = arith.constant 0 : index
    %197 = vector.load %arg12[%c0_211, %c0_212] : memref<4x64xf32, #tpu.memory_space<vmem>>, vector<1x64xf32>
    %c1_213 = arith.constant 1 : index
    %c0_214 = arith.constant 0 : index
    %198 = vector.load %arg12[%c1_213, %c0_214] : memref<4x64xf32, #tpu.memory_space<vmem>>, vector<1x64xf32>
    %c2_215 = arith.constant 2 : index
    %c0_216 = arith.constant 0 : index
    %199 = vector.load %arg12[%c2_215, %c0_216] : memref<4x64xf32, #tpu.memory_space<vmem>>, vector<1x64xf32>
    %c3_217 = arith.constant 3 : index
    %c0_218 = arith.constant 0 : index
    %200 = vector.load %arg12[%c3_217, %c0_218] : memref<4x64xf32, #tpu.memory_space<vmem>>, vector<1x64xf32>
    %201 = tpu.concatenate %197, %198, %199, %200 in 1 : vector<1x64xf32>, vector<1x64xf32>, vector<1x64xf32>, vector<1x64xf32> -> vector<1x256xf32>
    %c0_219 = arith.constant 0 : index
    %c0_220 = arith.constant 0 : index
    %202 = vector.load %arg6[%c0_219, %c0_220] : memref<256x10xf32, #tpu.memory_space<vmem>>, vector<256x10xf32>
    %cst_221 = arith.constant dense<0.000000e+00> : vector<1x10xf32>
    %203 = tpu.matmul %201, %202, %cst_221 {dimension_numbers = #tpu.dot_dimension_numbers<[1], [0], [0], [1], [0, 0, 1, 1], [], []>} : vector<1x256xf32>, vector<256x10xf32>, vector<1x10xf32> -> vector<1x10xf32>
    %c0_222 = arith.constant 0 : index
    %c0_223 = arith.constant 0 : index
    %204 = vector.load %arg7[%c0_222, %c0_223] : memref<1x10xf32, #tpu.memory_space<vmem>>, vector<1x10xf32>
    %205 = arith.addf %203, %204 : vector<1x10xf32>
    %cst_224 = arith.constant dense<0xFF800000> : vector<1xf32>
    %206 = vector.multi_reduction <maximumf>, %205, %cst_224 [1] : vector<1x10xf32> to vector<1xf32>
    %207 = vector.shape_cast %206 : vector<1xf32> to vector<1x1xf32>
    %208 = tpu.iota {dimensions = array<i32: 1>} : vector<1x10xi32>
    %209 = vector.broadcast %207 : vector<1x1xf32> to vector<1x10xf32>
    %210 = arith.cmpf oeq, %205, %209 : vector<1x10xf32>
    %c10_i32 = arith.constant 10 : i32
    %211 = vector.broadcast %c10_i32 : i32 to vector<1x10xi32>
    %212 = arith.select %210, %208, %211 : vector<1x10xi1>, vector<1x10xi32>
    %cst_225 = arith.constant dense<2147483647> : vector<1xi32>
    %213 = vector.multi_reduction <minsi>, %212, %cst_225 [1] : vector<1x10xi32> to vector<1xi32>
    %214 = vector.shape_cast %213 : vector<1xi32> to vector<1x1xi32>
    %cst_226 = arith.constant 0.000000e+00 : f32
    %215 = vector.broadcast %cst_226 : f32 to vector<24x256xf32>
    %c0_227 = arith.constant 0 : index
    %c0_228 = arith.constant 0 : index
    %c28 = arith.constant 28 : index
    %216 = vector.load %arg1[%c0_227, %c0_228, %c28] : memref<1x28x56xf32, #tpu.memory_space<vmem>>, vector<1x24x28xf32>
    %217 = vector.shape_cast %216 : vector<1x24x28xf32> to vector<24x28xf32>
    %c0_229 = arith.constant 0 : index
    %c0_230 = arith.constant 0 : index
    %c0_231 = arith.constant 0 : index
    %218 = vector.load %arg2[%c0_229, %c0_230, %c0_231] : memref<5x28x256xf32, #tpu.memory_space<vmem>>, vector<1x28x256xf32>
    %219 = vector.shape_cast %218 : vector<1x28x256xf32> to vector<28x256xf32>
    %cst_232 = arith.constant dense<0.000000e+00> : vector<24x256xf32>
    %220 = tpu.matmul %217, %219, %cst_232 {dimension_numbers = #tpu.dot_dimension_numbers<[1], [0], [0], [1], [0, 0, 1, 1], [], []>} : vector<24x28xf32>, vector<28x256xf32>, vector<24x256xf32> -> vector<24x256xf32>
    %221 = arith.addf %215, %220 : vector<24x256xf32>
    %c0_233 = arith.constant 0 : index
    %c1_234 = arith.constant 1 : index
    %c28_235 = arith.constant 28 : index
    %222 = vector.load %arg1[%c0_233, %c1_234, %c28_235] : memref<1x28x56xf32, #tpu.memory_space<vmem>>, vector<1x24x28xf32>
    %223 = vector.shape_cast %222 : vector<1x24x28xf32> to vector<24x28xf32>
    %c1_236 = arith.constant 1 : index
    %c0_237 = arith.constant 0 : index
    %c0_238 = arith.constant 0 : index
    %224 = vector.load %arg2[%c1_236, %c0_237, %c0_238] : memref<5x28x256xf32, #tpu.memory_space<vmem>>, vector<1x28x256xf32>
    %225 = vector.shape_cast %224 : vector<1x28x256xf32> to vector<28x256xf32>
    %cst_239 = arith.constant dense<0.000000e+00> : vector<24x256xf32>
    %226 = tpu.matmul %223, %225, %cst_239 {dimension_numbers = #tpu.dot_dimension_numbers<[1], [0], [0], [1], [0, 0, 1, 1], [], []>} : vector<24x28xf32>, vector<28x256xf32>, vector<24x256xf32> -> vector<24x256xf32>
    %227 = arith.addf %221, %226 : vector<24x256xf32>
    %c0_240 = arith.constant 0 : index
    %c2_241 = arith.constant 2 : index
    %c28_242 = arith.constant 28 : index
    %228 = vector.load %arg1[%c0_240, %c2_241, %c28_242] : memref<1x28x56xf32, #tpu.memory_space<vmem>>, vector<1x24x28xf32>
    %229 = vector.shape_cast %228 : vector<1x24x28xf32> to vector<24x28xf32>
    %c2_243 = arith.constant 2 : index
    %c0_244 = arith.constant 0 : index
    %c0_245 = arith.constant 0 : index
    %230 = vector.load %arg2[%c2_243, %c0_244, %c0_245] : memref<5x28x256xf32, #tpu.memory_space<vmem>>, vector<1x28x256xf32>
    %231 = vector.shape_cast %230 : vector<1x28x256xf32> to vector<28x256xf32>
    %cst_246 = arith.constant dense<0.000000e+00> : vector<24x256xf32>
    %232 = tpu.matmul %229, %231, %cst_246 {dimension_numbers = #tpu.dot_dimension_numbers<[1], [0], [0], [1], [0, 0, 1, 1], [], []>} : vector<24x28xf32>, vector<28x256xf32>, vector<24x256xf32> -> vector<24x256xf32>
    %233 = arith.addf %227, %232 : vector<24x256xf32>
    %c0_247 = arith.constant 0 : index
    %c3_248 = arith.constant 3 : index
    %c28_249 = arith.constant 28 : index
    %234 = vector.load %arg1[%c0_247, %c3_248, %c28_249] : memref<1x28x56xf32, #tpu.memory_space<vmem>>, vector<1x24x28xf32>
    %235 = vector.shape_cast %234 : vector<1x24x28xf32> to vector<24x28xf32>
    %c3_250 = arith.constant 3 : index
    %c0_251 = arith.constant 0 : index
    %c0_252 = arith.constant 0 : index
    %236 = vector.load %arg2[%c3_250, %c0_251, %c0_252] : memref<5x28x256xf32, #tpu.memory_space<vmem>>, vector<1x28x256xf32>
    %237 = vector.shape_cast %236 : vector<1x28x256xf32> to vector<28x256xf32>
    %cst_253 = arith.constant dense<0.000000e+00> : vector<24x256xf32>
    %238 = tpu.matmul %235, %237, %cst_253 {dimension_numbers = #tpu.dot_dimension_numbers<[1], [0], [0], [1], [0, 0, 1, 1], [], []>} : vector<24x28xf32>, vector<28x256xf32>, vector<24x256xf32> -> vector<24x256xf32>
    %239 = arith.addf %233, %238 : vector<24x256xf32>
    %c0_254 = arith.constant 0 : index
    %c4_255 = arith.constant 4 : index
    %c28_256 = arith.constant 28 : index
    %240 = vector.load %arg1[%c0_254, %c4_255, %c28_256] : memref<1x28x56xf32, #tpu.memory_space<vmem>>, vector<1x24x28xf32>
    %241 = vector.shape_cast %240 : vector<1x24x28xf32> to vector<24x28xf32>
    %c4_257 = arith.constant 4 : index
    %c0_258 = arith.constant 0 : index
    %c0_259 = arith.constant 0 : index
    %242 = vector.load %arg2[%c4_257, %c0_258, %c0_259] : memref<5x28x256xf32, #tpu.memory_space<vmem>>, vector<1x28x256xf32>
    %243 = vector.shape_cast %242 : vector<1x28x256xf32> to vector<28x256xf32>
    %cst_260 = arith.constant dense<0.000000e+00> : vector<24x256xf32>
    %244 = tpu.matmul %241, %243, %cst_260 {dimension_numbers = #tpu.dot_dimension_numbers<[1], [0], [0], [1], [0, 0, 1, 1], [], []>} : vector<24x28xf32>, vector<28x256xf32>, vector<24x256xf32> -> vector<24x256xf32>
    %245 = arith.addf %239, %244 : vector<24x256xf32>
    %c0_261 = arith.constant 0 : index
    %c0_262 = arith.constant 0 : index
    %246 = vector.load %arg3[%c0_261, %c0_262] : memref<1x256xf32, #tpu.memory_space<vmem>>, vector<1x256xf32>
    %247 = vector.broadcast %246 : vector<1x256xf32> to vector<24x256xf32>
    %248 = arith.addf %245, %247 : vector<24x256xf32>
    %cst_263 = arith.constant 0.000000e+00 : f32
    %249 = vector.broadcast %cst_263 : f32 to vector<24x256xf32>
    %250 = arith.maximumf %248, %249 : vector<24x256xf32>
    %c0_264 = arith.constant 0 : index
    %c0_265 = arith.constant 0 : index
    %251 = vector.load %arg9[%c0_264, %c0_265] : memref<24x256xf32, #tpu.memory_space<vmem>>, vector<24x256xf32>
    tpu.vector_store %arg9[%c0_264, %c0_265], %250 {strides = array<i32>} : memref<24x256xf32, #tpu.memory_space<vmem>>, vector<24x256xf32>,
    %c0_266 = arith.constant 0 : index
    %c0_267 = arith.constant 0 : index
    %252 = vector.load %arg9[%c0_266, %c0_267] : memref<24x256xf32, #tpu.memory_space<vmem>>, vector<1x96xf32>
    %c0_268 = arith.constant 0 : index
    %c128_269 = arith.constant 128 : index
    %253 = vector.load %arg9[%c0_268, %c128_269] : memref<24x256xf32, #tpu.memory_space<vmem>>, vector<1x96xf32>
    %254 = arith.maximumf %252, %253 : vector<1x96xf32>
    %c1_270 = arith.constant 1 : index
    %c0_271 = arith.constant 0 : index
    %255 = vector.load %arg9[%c1_270, %c0_271] : memref<24x256xf32, #tpu.memory_space<vmem>>, vector<1x96xf32>
    %c1_272 = arith.constant 1 : index
    %c128_273 = arith.constant 128 : index
    %256 = vector.load %arg9[%c1_272, %c128_273] : memref<24x256xf32, #tpu.memory_space<vmem>>, vector<1x96xf32>
    %257 = arith.maximumf %255, %256 : vector<1x96xf32>
    %258 = arith.maximumf %254, %257 : vector<1x96xf32>
    %c0_274 = arith.constant 0 : index
    %c0_275 = arith.constant 0 : index
    %259 = vector.load %arg10[%c0_274, %c0_275] : memref<12x96xf32, #tpu.memory_space<vmem>>, vector<1x96xf32>
    tpu.vector_store %arg10[%c0_274, %c0_275], %258 {strides = array<i32>} : memref<12x96xf32, #tpu.memory_space<vmem>>, vector<1x96xf32>,
    %c2_276 = arith.constant 2 : index
    %c0_277 = arith.constant 0 : index
    %260 = vector.load %arg9[%c2_276, %c0_277] : memref<24x256xf32, #tpu.memory_space<vmem>>, vector<1x96xf32>
    %c2_278 = arith.constant 2 : index
    %c128_279 = arith.constant 128 : index
    %261 = vector.load %arg9[%c2_278, %c128_279] : memref<24x256xf32, #tpu.memory_space<vmem>>, vector<1x96xf32>
    %262 = arith.maximumf %260, %261 : vector<1x96xf32>
    %c3_280 = arith.constant 3 : index
    %c0_281 = arith.constant 0 : index
    %263 = vector.load %arg9[%c3_280, %c0_281] : memref<24x256xf32, #tpu.memory_space<vmem>>, vector<1x96xf32>
    %c3_282 = arith.constant 3 : index
    %c128_283 = arith.constant 128 : index
    %264 = vector.load %arg9[%c3_282, %c128_283] : memref<24x256xf32, #tpu.memory_space<vmem>>, vector<1x96xf32>
    %265 = arith.maximumf %263, %264 : vector<1x96xf32>
    %266 = arith.maximumf %262, %265 : vector<1x96xf32>
    %c1_284 = arith.constant 1 : index
    %c0_285 = arith.constant 0 : index
    %267 = vector.load %arg10[%c1_284, %c0_285] : memref<12x96xf32, #tpu.memory_space<vmem>>, vector<1x96xf32>
    tpu.vector_store %arg10[%c1_284, %c0_285], %266 {strides = array<i32>} : memref<12x96xf32, #tpu.memory_space<vmem>>, vector<1x96xf32>,
    %c4_286 = arith.constant 4 : index
    %c0_287 = arith.constant 0 : index
    %268 = vector.load %arg9[%c4_286, %c0_287] : memref<24x256xf32, #tpu.memory_space<vmem>>, vector<1x96xf32>
    %c4_288 = arith.constant 4 : index
    %c128_289 = arith.constant 128 : index
    %269 = vector.load %arg9[%c4_288, %c128_289] : memref<24x256xf32, #tpu.memory_space<vmem>>, vector<1x96xf32>
    %270 = arith.maximumf %268, %269 : vector<1x96xf32>
    %c5_290 = arith.constant 5 : index
    %c0_291 = arith.constant 0 : index
    %271 = vector.load %arg9[%c5_290, %c0_291] : memref<24x256xf32, #tpu.memory_space<vmem>>, vector<1x96xf32>
    %c5_292 = arith.constant 5 : index
    %c128_293 = arith.constant 128 : index
    %272 = vector.load %arg9[%c5_292, %c128_293] : memref<24x256xf32, #tpu.memory_space<vmem>>, vector<1x96xf32>
    %273 = arith.maximumf %271, %272 : vector<1x96xf32>
    %274 = arith.maximumf %270, %273 : vector<1x96xf32>
    %c2_294 = arith.constant 2 : index
    %c0_295 = arith.constant 0 : index
    %275 = vector.load %arg10[%c2_294, %c0_295] : memref<12x96xf32, #tpu.memory_space<vmem>>, vector<1x96xf32>
    tpu.vector_store %arg10[%c2_294, %c0_295], %274 {strides = array<i32>} : memref<12x96xf32, #tpu.memory_space<vmem>>, vector<1x96xf32>,
    %c6_296 = arith.constant 6 : index
    %c0_297 = arith.constant 0 : index
    %276 = vector.load %arg9[%c6_296, %c0_297] : memref<24x256xf32, #tpu.memory_space<vmem>>, vector<1x96xf32>
    %c6_298 = arith.constant 6 : index
    %c128_299 = arith.constant 128 : index
    %277 = vector.load %arg9[%c6_298, %c128_299] : memref<24x256xf32, #tpu.memory_space<vmem>>, vector<1x96xf32>
    %278 = arith.maximumf %276, %277 : vector<1x96xf32>
    %c7_300 = arith.constant 7 : index
    %c0_301 = arith.constant 0 : index
    %279 = vector.load %arg9[%c7_300, %c0_301] : memref<24x256xf32, #tpu.memory_space<vmem>>, vector<1x96xf32>
    %c7_302 = arith.constant 7 : index
    %c128_303 = arith.constant 128 : index
    %280 = vector.load %arg9[%c7_302, %c128_303] : memref<24x256xf32, #tpu.memory_space<vmem>>, vector<1x96xf32>
    %281 = arith.maximumf %279, %280 : vector<1x96xf32>
    %282 = arith.maximumf %278, %281 : vector<1x96xf32>
    %c3_304 = arith.constant 3 : index
    %c0_305 = arith.constant 0 : index
    %283 = vector.load %arg10[%c3_304, %c0_305] : memref<12x96xf32, #tpu.memory_space<vmem>>, vector<1x96xf32>
    tpu.vector_store %arg10[%c3_304, %c0_305], %282 {strides = array<i32>} : memref<12x96xf32, #tpu.memory_space<vmem>>, vector<1x96xf32>,
    %c8_306 = arith.constant 8 : index
    %c0_307 = arith.constant 0 : index
    %284 = vector.load %arg9[%c8_306, %c0_307] : memref<24x256xf32, #tpu.memory_space<vmem>>, vector<1x96xf32>
    %c8_308 = arith.constant 8 : index
    %c128_309 = arith.constant 128 : index
    %285 = vector.load %arg9[%c8_308, %c128_309] : memref<24x256xf32, #tpu.memory_space<vmem>>, vector<1x96xf32>
    %286 = arith.maximumf %284, %285 : vector<1x96xf32>
    %c9_310 = arith.constant 9 : index
    %c0_311 = arith.constant 0 : index
    %287 = vector.load %arg9[%c9_310, %c0_311] : memref<24x256xf32, #tpu.memory_space<vmem>>, vector<1x96xf32>
    %c9_312 = arith.constant 9 : index
    %c128_313 = arith.constant 128 : index
    %288 = vector.load %arg9[%c9_312, %c128_313] : memref<24x256xf32, #tpu.memory_space<vmem>>, vector<1x96xf32>
    %289 = arith.maximumf %287, %288 : vector<1x96xf32>
    %290 = arith.maximumf %286, %289 : vector<1x96xf32>
    %c4_314 = arith.constant 4 : index
    %c0_315 = arith.constant 0 : index
    %291 = vector.load %arg10[%c4_314, %c0_315] : memref<12x96xf32, #tpu.memory_space<vmem>>, vector<1x96xf32>
    tpu.vector_store %arg10[%c4_314, %c0_315], %290 {strides = array<i32>} : memref<12x96xf32, #tpu.memory_space<vmem>>, vector<1x96xf32>,
    %c10_316 = arith.constant 10 : index
    %c0_317 = arith.constant 0 : index
    %292 = vector.load %arg9[%c10_316, %c0_317] : memref<24x256xf32, #tpu.memory_space<vmem>>, vector<1x96xf32>
    %c10_318 = arith.constant 10 : index
    %c128_319 = arith.constant 128 : index
    %293 = vector.load %arg9[%c10_318, %c128_319] : memref<24x256xf32, #tpu.memory_space<vmem>>, vector<1x96xf32>
    %294 = arith.maximumf %292, %293 : vector<1x96xf32>
    %c11_320 = arith.constant 11 : index
    %c0_321 = arith.constant 0 : index
    %295 = vector.load %arg9[%c11_320, %c0_321] : memref<24x256xf32, #tpu.memory_space<vmem>>, vector<1x96xf32>
    %c11_322 = arith.constant 11 : index
    %c128_323 = arith.constant 128 : index
    %296 = vector.load %arg9[%c11_322, %c128_323] : memref<24x256xf32, #tpu.memory_space<vmem>>, vector<1x96xf32>
    %297 = arith.maximumf %295, %296 : vector<1x96xf32>
    %298 = arith.maximumf %294, %297 : vector<1x96xf32>
    %c5_324 = arith.constant 5 : index
    %c0_325 = arith.constant 0 : index
    %299 = vector.load %arg10[%c5_324, %c0_325] : memref<12x96xf32, #tpu.memory_space<vmem>>, vector<1x96xf32>
    tpu.vector_store %arg10[%c5_324, %c0_325], %298 {strides = array<i32>} : memref<12x96xf32, #tpu.memory_space<vmem>>, vector<1x96xf32>,
    %c12_326 = arith.constant 12 : index
    %c0_327 = arith.constant 0 : index
    %300 = vector.load %arg9[%c12_326, %c0_327] : memref<24x256xf32, #tpu.memory_space<vmem>>, vector<1x96xf32>
    %c12_328 = arith.constant 12 : index
    %c128_329 = arith.constant 128 : index
    %301 = vector.load %arg9[%c12_328, %c128_329] : memref<24x256xf32, #tpu.memory_space<vmem>>, vector<1x96xf32>
    %302 = arith.maximumf %300, %301 : vector<1x96xf32>
    %c13_330 = arith.constant 13 : index
    %c0_331 = arith.constant 0 : index
    %303 = vector.load %arg9[%c13_330, %c0_331] : memref<24x256xf32, #tpu.memory_space<vmem>>, vector<1x96xf32>
    %c13_332 = arith.constant 13 : index
    %c128_333 = arith.constant 128 : index
    %304 = vector.load %arg9[%c13_332, %c128_333] : memref<24x256xf32, #tpu.memory_space<vmem>>, vector<1x96xf32>
    %305 = arith.maximumf %303, %304 : vector<1x96xf32>
    %306 = arith.maximumf %302, %305 : vector<1x96xf32>
    %c6_334 = arith.constant 6 : index
    %c0_335 = arith.constant 0 : index
    %307 = vector.load %arg10[%c6_334, %c0_335] : memref<12x96xf32, #tpu.memory_space<vmem>>, vector<1x96xf32>
    tpu.vector_store %arg10[%c6_334, %c0_335], %306 {strides = array<i32>} : memref<12x96xf32, #tpu.memory_space<vmem>>, vector<1x96xf32>,
    %c14_336 = arith.constant 14 : index
    %c0_337 = arith.constant 0 : index
    %308 = vector.load %arg9[%c14_336, %c0_337] : memref<24x256xf32, #tpu.memory_space<vmem>>, vector<1x96xf32>
    %c14_338 = arith.constant 14 : index
    %c128_339 = arith.constant 128 : index
    %309 = vector.load %arg9[%c14_338, %c128_339] : memref<24x256xf32, #tpu.memory_space<vmem>>, vector<1x96xf32>
    %310 = arith.maximumf %308, %309 : vector<1x96xf32>
    %c15_340 = arith.constant 15 : index
    %c0_341 = arith.constant 0 : index
    %311 = vector.load %arg9[%c15_340, %c0_341] : memref<24x256xf32, #tpu.memory_space<vmem>>, vector<1x96xf32>
    %c15_342 = arith.constant 15 : index
    %c128_343 = arith.constant 128 : index
    %312 = vector.load %arg9[%c15_342, %c128_343] : memref<24x256xf32, #tpu.memory_space<vmem>>, vector<1x96xf32>
    %313 = arith.maximumf %311, %312 : vector<1x96xf32>
    %314 = arith.maximumf %310, %313 : vector<1x96xf32>
    %c7_344 = arith.constant 7 : index
    %c0_345 = arith.constant 0 : index
    %315 = vector.load %arg10[%c7_344, %c0_345] : memref<12x96xf32, #tpu.memory_space<vmem>>, vector<1x96xf32>
    tpu.vector_store %arg10[%c7_344, %c0_345], %314 {strides = array<i32>} : memref<12x96xf32, #tpu.memory_space<vmem>>, vector<1x96xf32>,
    %c16_346 = arith.constant 16 : index
    %c0_347 = arith.constant 0 : index
    %316 = vector.load %arg9[%c16_346, %c0_347] : memref<24x256xf32, #tpu.memory_space<vmem>>, vector<1x96xf32>
    %c16_348 = arith.constant 16 : index
    %c128_349 = arith.constant 128 : index
    %317 = vector.load %arg9[%c16_348, %c128_349] : memref<24x256xf32, #tpu.memory_space<vmem>>, vector<1x96xf32>
    %318 = arith.maximumf %316, %317 : vector<1x96xf32>
    %c17_350 = arith.constant 17 : index
    %c0_351 = arith.constant 0 : index
    %319 = vector.load %arg9[%c17_350, %c0_351] : memref<24x256xf32, #tpu.memory_space<vmem>>, vector<1x96xf32>
    %c17_352 = arith.constant 17 : index
    %c128_353 = arith.constant 128 : index
    %320 = vector.load %arg9[%c17_352, %c128_353] : memref<24x256xf32, #tpu.memory_space<vmem>>, vector<1x96xf32>
    %321 = arith.maximumf %319, %320 : vector<1x96xf32>
    %322 = arith.maximumf %318, %321 : vector<1x96xf32>
    %c8_354 = arith.constant 8 : index
    %c0_355 = arith.constant 0 : index
    %323 = vector.load %arg10[%c8_354, %c0_355] : memref<12x96xf32, #tpu.memory_space<vmem>>, vector<1x96xf32>
    tpu.vector_store %arg10[%c8_354, %c0_355], %322 {strides = array<i32>} : memref<12x96xf32, #tpu.memory_space<vmem>>, vector<1x96xf32>,
    %c18_356 = arith.constant 18 : index
    %c0_357 = arith.constant 0 : index
    %324 = vector.load %arg9[%c18_356, %c0_357] : memref<24x256xf32, #tpu.memory_space<vmem>>, vector<1x96xf32>
    %c18_358 = arith.constant 18 : index
    %c128_359 = arith.constant 128 : index
    %325 = vector.load %arg9[%c18_358, %c128_359] : memref<24x256xf32, #tpu.memory_space<vmem>>, vector<1x96xf32>
    %326 = arith.maximumf %324, %325 : vector<1x96xf32>
    %c19_360 = arith.constant 19 : index
    %c0_361 = arith.constant 0 : index
    %327 = vector.load %arg9[%c19_360, %c0_361] : memref<24x256xf32, #tpu.memory_space<vmem>>, vector<1x96xf32>
    %c19_362 = arith.constant 19 : index
    %c128_363 = arith.constant 128 : index
    %328 = vector.load %arg9[%c19_362, %c128_363] : memref<24x256xf32, #tpu.memory_space<vmem>>, vector<1x96xf32>
    %329 = arith.maximumf %327, %328 : vector<1x96xf32>
    %330 = arith.maximumf %326, %329 : vector<1x96xf32>
    %c9_364 = arith.constant 9 : index
    %c0_365 = arith.constant 0 : index
    %331 = vector.load %arg10[%c9_364, %c0_365] : memref<12x96xf32, #tpu.memory_space<vmem>>, vector<1x96xf32>
    tpu.vector_store %arg10[%c9_364, %c0_365], %330 {strides = array<i32>} : memref<12x96xf32, #tpu.memory_space<vmem>>, vector<1x96xf32>,
    %c20_366 = arith.constant 20 : index
    %c0_367 = arith.constant 0 : index
    %332 = vector.load %arg9[%c20_366, %c0_367] : memref<24x256xf32, #tpu.memory_space<vmem>>, vector<1x96xf32>
    %c20_368 = arith.constant 20 : index
    %c128_369 = arith.constant 128 : index
    %333 = vector.load %arg9[%c20_368, %c128_369] : memref<24x256xf32, #tpu.memory_space<vmem>>, vector<1x96xf32>
    %334 = arith.maximumf %332, %333 : vector<1x96xf32>
    %c21_370 = arith.constant 21 : index
    %c0_371 = arith.constant 0 : index
    %335 = vector.load %arg9[%c21_370, %c0_371] : memref<24x256xf32, #tpu.memory_space<vmem>>, vector<1x96xf32>
    %c21_372 = arith.constant 21 : index
    %c128_373 = arith.constant 128 : index
    %336 = vector.load %arg9[%c21_372, %c128_373] : memref<24x256xf32, #tpu.memory_space<vmem>>, vector<1x96xf32>
    %337 = arith.maximumf %335, %336 : vector<1x96xf32>
    %338 = arith.maximumf %334, %337 : vector<1x96xf32>
    %c10_374 = arith.constant 10 : index
    %c0_375 = arith.constant 0 : index
    %339 = vector.load %arg10[%c10_374, %c0_375] : memref<12x96xf32, #tpu.memory_space<vmem>>, vector<1x96xf32>
    tpu.vector_store %arg10[%c10_374, %c0_375], %338 {strides = array<i32>} : memref<12x96xf32, #tpu.memory_space<vmem>>, vector<1x96xf32>,
    %c22_376 = arith.constant 22 : index
    %c0_377 = arith.constant 0 : index
    %340 = vector.load %arg9[%c22_376, %c0_377] : memref<24x256xf32, #tpu.memory_space<vmem>>, vector<1x96xf32>
    %c22_378 = arith.constant 22 : index
    %c128_379 = arith.constant 128 : index
    %341 = vector.load %arg9[%c22_378, %c128_379] : memref<24x256xf32, #tpu.memory_space<vmem>>, vector<1x96xf32>
    %342 = arith.maximumf %340, %341 : vector<1x96xf32>
    %c23_380 = arith.constant 23 : index
    %c0_381 = arith.constant 0 : index
    %343 = vector.load %arg9[%c23_380, %c0_381] : memref<24x256xf32, #tpu.memory_space<vmem>>, vector<1x96xf32>
    %c23_382 = arith.constant 23 : index
    %c128_383 = arith.constant 128 : index
    %344 = vector.load %arg9[%c23_382, %c128_383] : memref<24x256xf32, #tpu.memory_space<vmem>>, vector<1x96xf32>
    %345 = arith.maximumf %343, %344 : vector<1x96xf32>
    %346 = arith.maximumf %342, %345 : vector<1x96xf32>
    %c11_384 = arith.constant 11 : index
    %c0_385 = arith.constant 0 : index
    %347 = vector.load %arg10[%c11_384, %c0_385] : memref<12x96xf32, #tpu.memory_space<vmem>>, vector<1x96xf32>
    tpu.vector_store %arg10[%c11_384, %c0_385], %346 {strides = array<i32>} : memref<12x96xf32, #tpu.memory_space<vmem>>, vector<1x96xf32>,
    %cst_386 = arith.constant 0.000000e+00 : f32
    %348 = vector.broadcast %cst_386 : f32 to vector<8x256xf32>
    %c0_387 = arith.constant 0 : index
    %c0_388 = arith.constant 0 : index
    %349 = vector.load %arg10[%c0_387, %c0_388] : memref<12x96xf32, #tpu.memory_space<vmem>>, vector<8x96xf32>
    %c0_389 = arith.constant 0 : index
    %c0_390 = arith.constant 0 : index
    %c0_391 = arith.constant 0 : index
    %350 = vector.load %arg4[%c0_389, %c0_390, %c0_391] : memref<5x96x256xf32, #tpu.memory_space<vmem>>, vector<1x96x256xf32>
    %351 = vector.shape_cast %350 : vector<1x96x256xf32> to vector<96x256xf32>
    %cst_392 = arith.constant dense<0.000000e+00> : vector<8x256xf32>
    %352 = tpu.matmul %349, %351, %cst_392 {dimension_numbers = #tpu.dot_dimension_numbers<[1], [0], [0], [1], [0, 0, 1, 1], [], []>} : vector<8x96xf32>, vector<96x256xf32>, vector<8x256xf32> -> vector<8x256xf32>
    %353 = arith.addf %348, %352 : vector<8x256xf32>
    %c1_393 = arith.constant 1 : index
    %c0_394 = arith.constant 0 : index
    %354 = vector.load %arg10[%c1_393, %c0_394] : memref<12x96xf32, #tpu.memory_space<vmem>>, vector<8x96xf32>
    %c1_395 = arith.constant 1 : index
    %c0_396 = arith.constant 0 : index
    %c0_397 = arith.constant 0 : index
    %355 = vector.load %arg4[%c1_395, %c0_396, %c0_397] : memref<5x96x256xf32, #tpu.memory_space<vmem>>, vector<1x96x256xf32>
    %356 = vector.shape_cast %355 : vector<1x96x256xf32> to vector<96x256xf32>
    %cst_398 = arith.constant dense<0.000000e+00> : vector<8x256xf32>
    %357 = tpu.matmul %354, %356, %cst_398 {dimension_numbers = #tpu.dot_dimension_numbers<[1], [0], [0], [1], [0, 0, 1, 1], [], []>} : vector<8x96xf32>, vector<96x256xf32>, vector<8x256xf32> -> vector<8x256xf32>
    %358 = arith.addf %353, %357 : vector<8x256xf32>
    %c2_399 = arith.constant 2 : index
    %c0_400 = arith.constant 0 : index
    %359 = vector.load %arg10[%c2_399, %c0_400] : memref<12x96xf32, #tpu.memory_space<vmem>>, vector<8x96xf32>
    %c2_401 = arith.constant 2 : index
    %c0_402 = arith.constant 0 : index
    %c0_403 = arith.constant 0 : index
    %360 = vector.load %arg4[%c2_401, %c0_402, %c0_403] : memref<5x96x256xf32, #tpu.memory_space<vmem>>, vector<1x96x256xf32>
    %361 = vector.shape_cast %360 : vector<1x96x256xf32> to vector<96x256xf32>
    %cst_404 = arith.constant dense<0.000000e+00> : vector<8x256xf32>
    %362 = tpu.matmul %359, %361, %cst_404 {dimension_numbers = #tpu.dot_dimension_numbers<[1], [0], [0], [1], [0, 0, 1, 1], [], []>} : vector<8x96xf32>, vector<96x256xf32>, vector<8x256xf32> -> vector<8x256xf32>
    %363 = arith.addf %358, %362 : vector<8x256xf32>
    %c3_405 = arith.constant 3 : index
    %c0_406 = arith.constant 0 : index
    %364 = vector.load %arg10[%c3_405, %c0_406] : memref<12x96xf32, #tpu.memory_space<vmem>>, vector<8x96xf32>
    %c3_407 = arith.constant 3 : index
    %c0_408 = arith.constant 0 : index
    %c0_409 = arith.constant 0 : index
    %365 = vector.load %arg4[%c3_407, %c0_408, %c0_409] : memref<5x96x256xf32, #tpu.memory_space<vmem>>, vector<1x96x256xf32>
    %366 = vector.shape_cast %365 : vector<1x96x256xf32> to vector<96x256xf32>
    %cst_410 = arith.constant dense<0.000000e+00> : vector<8x256xf32>
    %367 = tpu.matmul %364, %366, %cst_410 {dimension_numbers = #tpu.dot_dimension_numbers<[1], [0], [0], [1], [0, 0, 1, 1], [], []>} : vector<8x96xf32>, vector<96x256xf32>, vector<8x256xf32> -> vector<8x256xf32>
    %368 = arith.addf %363, %367 : vector<8x256xf32>
    %c4_411 = arith.constant 4 : index
    %c0_412 = arith.constant 0 : index
    %369 = vector.load %arg10[%c4_411, %c0_412] : memref<12x96xf32, #tpu.memory_space<vmem>>, vector<8x96xf32>
    %c4_413 = arith.constant 4 : index
    %c0_414 = arith.constant 0 : index
    %c0_415 = arith.constant 0 : index
    %370 = vector.load %arg4[%c4_413, %c0_414, %c0_415] : memref<5x96x256xf32, #tpu.memory_space<vmem>>, vector<1x96x256xf32>
    %371 = vector.shape_cast %370 : vector<1x96x256xf32> to vector<96x256xf32>
    %cst_416 = arith.constant dense<0.000000e+00> : vector<8x256xf32>
    %372 = tpu.matmul %369, %371, %cst_416 {dimension_numbers = #tpu.dot_dimension_numbers<[1], [0], [0], [1], [0, 0, 1, 1], [], []>} : vector<8x96xf32>, vector<96x256xf32>, vector<8x256xf32> -> vector<8x256xf32>
    %373 = arith.addf %368, %372 : vector<8x256xf32>
    %c0_417 = arith.constant 0 : index
    %c0_418 = arith.constant 0 : index
    %374 = vector.load %arg5[%c0_417, %c0_418] : memref<1x256xf32, #tpu.memory_space<vmem>>, vector<1x256xf32>
    %375 = vector.broadcast %374 : vector<1x256xf32> to vector<8x256xf32>
    %376 = arith.addf %373, %375 : vector<8x256xf32>
    %cst_419 = arith.constant 0.000000e+00 : f32
    %377 = vector.broadcast %cst_419 : f32 to vector<8x256xf32>
    %378 = arith.maximumf %376, %377 : vector<8x256xf32>
    %c0_420 = arith.constant 0 : index
    %c0_421 = arith.constant 0 : index
    %379 = vector.load %arg11[%c0_420, %c0_421] : memref<8x256xf32, #tpu.memory_space<vmem>>, vector<8x256xf32>
    tpu.vector_store %arg11[%c0_420, %c0_421], %378 {strides = array<i32>} : memref<8x256xf32, #tpu.memory_space<vmem>>, vector<8x256xf32>,
    %c0_422 = arith.constant 0 : index
    %c0_423 = arith.constant 0 : index
    %380 = vector.load %arg11[%c0_422, %c0_423] : memref<8x256xf32, #tpu.memory_space<vmem>>, vector<1x64xf32>
    %c0_424 = arith.constant 0 : index
    %c128_425 = arith.constant 128 : index
    %381 = vector.load %arg11[%c0_424, %c128_425] : memref<8x256xf32, #tpu.memory_space<vmem>>, vector<1x64xf32>
    %382 = arith.maximumf %380, %381 : vector<1x64xf32>
    %c1_426 = arith.constant 1 : index
    %c0_427 = arith.constant 0 : index
    %383 = vector.load %arg11[%c1_426, %c0_427] : memref<8x256xf32, #tpu.memory_space<vmem>>, vector<1x64xf32>
    %c1_428 = arith.constant 1 : index
    %c128_429 = arith.constant 128 : index
    %384 = vector.load %arg11[%c1_428, %c128_429] : memref<8x256xf32, #tpu.memory_space<vmem>>, vector<1x64xf32>
    %385 = arith.maximumf %383, %384 : vector<1x64xf32>
    %386 = arith.maximumf %382, %385 : vector<1x64xf32>
    %c0_430 = arith.constant 0 : index
    %c0_431 = arith.constant 0 : index
    %387 = vector.load %arg12[%c0_430, %c0_431] : memref<4x64xf32, #tpu.memory_space<vmem>>, vector<1x64xf32>
    tpu.vector_store %arg12[%c0_430, %c0_431], %386 {strides = array<i32>} : memref<4x64xf32, #tpu.memory_space<vmem>>, vector<1x64xf32>,
    %c2_432 = arith.constant 2 : index
    %c0_433 = arith.constant 0 : index
    %388 = vector.load %arg11[%c2_432, %c0_433] : memref<8x256xf32, #tpu.memory_space<vmem>>, vector<1x64xf32>
    %c2_434 = arith.constant 2 : index
    %c128_435 = arith.constant 128 : index
    %389 = vector.load %arg11[%c2_434, %c128_435] : memref<8x256xf32, #tpu.memory_space<vmem>>, vector<1x64xf32>
    %390 = arith.maximumf %388, %389 : vector<1x64xf32>
    %c3_436 = arith.constant 3 : index
    %c0_437 = arith.constant 0 : index
    %391 = vector.load %arg11[%c3_436, %c0_437] : memref<8x256xf32, #tpu.memory_space<vmem>>, vector<1x64xf32>
    %c3_438 = arith.constant 3 : index
    %c128_439 = arith.constant 128 : index
    %392 = vector.load %arg11[%c3_438, %c128_439] : memref<8x256xf32, #tpu.memory_space<vmem>>, vector<1x64xf32>
    %393 = arith.maximumf %391, %392 : vector<1x64xf32>
    %394 = arith.maximumf %390, %393 : vector<1x64xf32>
    %c1_440 = arith.constant 1 : index
    %c0_441 = arith.constant 0 : index
    %395 = vector.load %arg12[%c1_440, %c0_441] : memref<4x64xf32, #tpu.memory_space<vmem>>, vector<1x64xf32>
    tpu.vector_store %arg12[%c1_440, %c0_441], %394 {strides = array<i32>} : memref<4x64xf32, #tpu.memory_space<vmem>>, vector<1x64xf32>,
    %c4_442 = arith.constant 4 : index
    %c0_443 = arith.constant 0 : index
    %396 = vector.load %arg11[%c4_442, %c0_443] : memref<8x256xf32, #tpu.memory_space<vmem>>, vector<1x64xf32>
    %c4_444 = arith.constant 4 : index
    %c128_445 = arith.constant 128 : index
    %397 = vector.load %arg11[%c4_444, %c128_445] : memref<8x256xf32, #tpu.memory_space<vmem>>, vector<1x64xf32>
    %398 = arith.maximumf %396, %397 : vector<1x64xf32>
    %c5_446 = arith.constant 5 : index
    %c0_447 = arith.constant 0 : index
    %399 = vector.load %arg11[%c5_446, %c0_447] : memref<8x256xf32, #tpu.memory_space<vmem>>, vector<1x64xf32>
    %c5_448 = arith.constant 5 : index
    %c128_449 = arith.constant 128 : index
    %400 = vector.load %arg11[%c5_448, %c128_449] : memref<8x256xf32, #tpu.memory_space<vmem>>, vector<1x64xf32>
    %401 = arith.maximumf %399, %400 : vector<1x64xf32>
    %402 = arith.maximumf %398, %401 : vector<1x64xf32>
    %c2_450 = arith.constant 2 : index
    %c0_451 = arith.constant 0 : index
    %403 = vector.load %arg12[%c2_450, %c0_451] : memref<4x64xf32, #tpu.memory_space<vmem>>, vector<1x64xf32>
    tpu.vector_store %arg12[%c2_450, %c0_451], %402 {strides = array<i32>} : memref<4x64xf32, #tpu.memory_space<vmem>>, vector<1x64xf32>,
    %c6_452 = arith.constant 6 : index
    %c0_453 = arith.constant 0 : index
    %404 = vector.load %arg11[%c6_452, %c0_453] : memref<8x256xf32, #tpu.memory_space<vmem>>, vector<1x64xf32>
    %c6_454 = arith.constant 6 : index
    %c128_455 = arith.constant 128 : index
    %405 = vector.load %arg11[%c6_454, %c128_455] : memref<8x256xf32, #tpu.memory_space<vmem>>, vector<1x64xf32>
    %406 = arith.maximumf %404, %405 : vector<1x64xf32>
    %c7_456 = arith.constant 7 : index
    %c0_457 = arith.constant 0 : index
    %407 = vector.load %arg11[%c7_456, %c0_457] : memref<8x256xf32, #tpu.memory_space<vmem>>, vector<1x64xf32>
    %c7_458 = arith.constant 7 : index
    %c128_459 = arith.constant 128 : index
    %408 = vector.load %arg11[%c7_458, %c128_459] : memref<8x256xf32, #tpu.memory_space<vmem>>, vector<1x64xf32>
    %409 = arith.maximumf %407, %408 : vector<1x64xf32>
    %410 = arith.maximumf %406, %409 : vector<1x64xf32>
    %c3_460 = arith.constant 3 : index
    %c0_461 = arith.constant 0 : index
    %411 = vector.load %arg12[%c3_460, %c0_461] : memref<4x64xf32, #tpu.memory_space<vmem>>, vector<1x64xf32>
    tpu.vector_store %arg12[%c3_460, %c0_461], %410 {strides = array<i32>} : memref<4x64xf32, #tpu.memory_space<vmem>>, vector<1x64xf32>,
    %c0_462 = arith.constant 0 : index
    %c0_463 = arith.constant 0 : index
    %412 = vector.load %arg12[%c0_462, %c0_463] : memref<4x64xf32, #tpu.memory_space<vmem>>, vector<1x64xf32>
    %c1_464 = arith.constant 1 : index
    %c0_465 = arith.constant 0 : index
    %413 = vector.load %arg12[%c1_464, %c0_465] : memref<4x64xf32, #tpu.memory_space<vmem>>, vector<1x64xf32>
    %c2_466 = arith.constant 2 : index
    %c0_467 = arith.constant 0 : index
    %414 = vector.load %arg12[%c2_466, %c0_467] : memref<4x64xf32, #tpu.memory_space<vmem>>, vector<1x64xf32>
    %c3_468 = arith.constant 3 : index
    %c0_469 = arith.constant 0 : index
    %415 = vector.load %arg12[%c3_468, %c0_469] : memref<4x64xf32, #tpu.memory_space<vmem>>, vector<1x64xf32>
    %416 = tpu.concatenate %412, %413, %414, %415 in 1 : vector<1x64xf32>, vector<1x64xf32>, vector<1x64xf32>, vector<1x64xf32> -> vector<1x256xf32>
    %c0_470 = arith.constant 0 : index
    %c0_471 = arith.constant 0 : index
    %417 = vector.load %arg6[%c0_470, %c0_471] : memref<256x10xf32, #tpu.memory_space<vmem>>, vector<256x10xf32>
    %cst_472 = arith.constant dense<0.000000e+00> : vector<1x10xf32>
    %418 = tpu.matmul %416, %417, %cst_472 {dimension_numbers = #tpu.dot_dimension_numbers<[1], [0], [0], [1], [0, 0, 1, 1], [], []>} : vector<1x256xf32>, vector<256x10xf32>, vector<1x10xf32> -> vector<1x10xf32>
    %c0_473 = arith.constant 0 : index
    %c0_474 = arith.constant 0 : index
    %419 = vector.load %arg7[%c0_473, %c0_474] : memref<1x10xf32, #tpu.memory_space<vmem>>, vector<1x10xf32>
    %420 = arith.addf %418, %419 : vector<1x10xf32>
    %cst_475 = arith.constant dense<0xFF800000> : vector<1xf32>
    %421 = vector.multi_reduction <maximumf>, %420, %cst_475 [1] : vector<1x10xf32> to vector<1xf32>
    %422 = vector.shape_cast %421 : vector<1xf32> to vector<1x1xf32>
    %423 = tpu.iota {dimensions = array<i32: 1>} : vector<1x10xi32>
    %424 = vector.broadcast %422 : vector<1x1xf32> to vector<1x10xf32>
    %425 = arith.cmpf oeq, %420, %424 : vector<1x10xf32>
    %c10_i32_476 = arith.constant 10 : i32
    %426 = vector.broadcast %c10_i32_476 : i32 to vector<1x10xi32>
    %427 = arith.select %425, %423, %426 : vector<1x10xi1>, vector<1x10xi32>
    %cst_477 = arith.constant dense<2147483647> : vector<1xi32>
    %428 = vector.multi_reduction <minsi>, %427, %cst_477 [1] : vector<1x10xi32> to vector<1xi32>
    %429 = vector.shape_cast %428 : vector<1xi32> to vector<1x1xi32>
    %430 = arith.addi %214, %429 : vector<1x1xi32>
    %c0_478 = arith.constant 0 : index
    %c0_479 = arith.constant 0 : index
    %c0_480 = arith.constant 0 : index
    %431 = vector.load %arg8[%c0_478, %c0_479, %c0_480] : memref<1x1x1xi32, #tpu.memory_space<vmem>>, vector<1x1x1xi32>
    %432 = vector.shape_cast %431 : vector<1x1x1xi32> to vector<1x1xi32>
    %433 = vector.shape_cast %430 : vector<1x1xi32> to vector<1x1x1xi32>
    tpu.vector_store %arg8[%c0_478, %c0_479, %c0_480], %433 {strides = array<i32>} : memref<1x1x1xi32, #tpu.memory_space<vmem>>, vector<1x1x1xi32>,
    return
  }
  func.func @transform_0(%arg0: i32) -> (i32, i32, i32) {
    %c0_i32 = arith.constant 0 : i32
    %c0_i32_0 = arith.constant 0 : i32
    %c0_i32_1 = arith.constant 0 : i32
    return %arg0, %c0_i32, %c0_i32_0 : i32, i32, i32
  }
  func.func @transform_1(%arg0: i32) -> (i32, i32, i32) {
    %c0_i32 = arith.constant 0 : i32
    %c0_i32_0 = arith.constant 0 : i32
    %c0_i32_1 = arith.constant 0 : i32
    %c0_i32_2 = arith.constant 0 : i32
    return %c0_i32, %c0_i32_0, %c0_i32_1 : i32, i32, i32
  }
  func.func @transform_2(%arg0: i32) -> (i32, i32) {
    %c0_i32 = arith.constant 0 : i32
    %c0_i32_0 = arith.constant 0 : i32
    %c0_i32_1 = arith.constant 0 : i32
    return %c0_i32, %c0_i32_0 : i32, i32
  }
  func.func @transform_3(%arg0: i32) -> (i32, i32, i32) {
    %c0_i32 = arith.constant 0 : i32
    %c0_i32_0 = arith.constant 0 : i32
    %c0_i32_1 = arith.constant 0 : i32
    %c0_i32_2 = arith.constant 0 : i32
    return %c0_i32, %c0_i32_0, %c0_i32_1 : i32, i32, i32
  }
  func.func @transform_4(%arg0: i32) -> (i32, i32) {
    %c0_i32 = arith.constant 0 : i32
    %c0_i32_0 = arith.constant 0 : i32
    %c0_i32_1 = arith.constant 0 : i32
    return %c0_i32, %c0_i32_0 : i32, i32
  }
  func.func @transform_5(%arg0: i32) -> (i32, i32) {
    %c0_i32 = arith.constant 0 : i32
    %c0_i32_0 = arith.constant 0 : i32
    %c0_i32_1 = arith.constant 0 : i32
    return %c0_i32, %c0_i32_0 : i32, i32
  }
  func.func @transform_6(%arg0: i32) -> (i32, i32) {
    %c0_i32 = arith.constant 0 : i32
    %c0_i32_0 = arith.constant 0 : i32
    %c0_i32_1 = arith.constant 0 : i32
    return %c0_i32, %c0_i32_0 : i32, i32
  }
  func.func @transform_7(%arg0: i32) -> (i32, i32, i32) {
    %c0_i32 = arith.constant 0 : i32
    %c0_i32_0 = arith.constant 0 : i32
    %c0_i32_1 = arith.constant 0 : i32
    return %arg0, %c0_i32, %c0_i32_0 : i32, i32, i32
  }
}

</mosaic_0001>

<bundles_post_ra>
// kernel: prediction_forward.1
= control target key start
LH: loop header
LB: loop body
LE: loop exit
PB: predicated region body
PF: predicated region fallthrough
CT: control target
= control target key end

     0   :  { %12 = vsyncpa [#allocation7], 0  ;;  %s3954_s24 = smov 0   ;;  %s4715_s0 = inlined_call_operand.vmem [shape: f32[2,28,56], index: 0, kind: input, shape index: {}]   ;;  %s4716_s1 = inlined_call_operand.vmem [shape: f32[5,28,256], index: 1, kind: input, shape index: {}]   ;;  %s4717_s2 = inlined_call_operand.vmem [shape: f32[1,256], index: 2, kind: input, shape index: {}]   ;;  %s4718_s3 = inlined_call_operand.hbm [shape: f32[5,96,256], index: 3, kind: input, shape index: {}]   ;;  %s4719_s4 = inlined_call_operand.vmem [shape: f32[1,256], index: 4, kind: input, shape index: {}]   ;;  %s4720_s5 = inlined_call_operand.vmem [shape: f32[256,10], index: 5, kind: input, shape index: {}]   ;;  %s4721_s6 = inlined_call_operand.vmem [shape: f32[1,10], index: 6, kind: input, shape index: {}]   ;;  %s4722_s7 = inlined_call_operand.vmem [shape: s32[2,1,1], index: 7, kind: output, shape index: {}]  }
   0x1 LB: > { %s3960_s25 = sadd.s32 4294967295, %s3905_s24   ;;  %p3155_p0 = scmp.ge.s32.totalorder %s3905_s24, 1  ;;  %s3905_s24 = sphi %s3954_s24, %s18_s24  }
   0x2   : > { %p201_p1 = scmp.lt.s32.totalorder %s3905_s24, 3  ;;  %s3907_s26 = smov [#allocation6]  }
   0x3   : > { %s219_s27 = sshll.u32 %s3907_s26, 4  ;;  %p4723_p3 = scmp.eq.s32.totalorder %s3960_s25, 0  ;;  %s220_s27 = int_to_ptr.vmem [resolvable:$true] %s219_s27 }
   0x4   : > { %p3964_p2 = pnand %p3155_p0, %p201_p1  ;;  %s3867_s9 = scalar_lea.hbm %s4718_s3, 15360 }
   0x5   : > { %p3868_p6 = scmp.ne.s32.totalorder %s4718_s3, %s3867_s9  ;;  %p3874_p10 = scmp.lt.u32.totalorder %s3867_s9, %s4718_s3 }
   0x6   : > { %s4725_s28 = scalar_select %p3964_p2, 1, 0 }
   0x7   : > { %p3831_p4 = pneg %p3964_p2 }
   0x9   : > { %p3973_p5 = pnand %p4723_p3, %p3831_p4 }
   0xb   : > { %p3869_p7 = pneg %p3973_p5 }
   0xd   : > { %p3870_p8 = pnand %p3869_p7, %p3868_p6 }
   0xf   : > { %p3871_p9 = pneg %p3870_p8 }
  0x11   : > { %p3876_p11 = pnand %p3874_p10, %p3871_p9 }
  0x13   : > { %3879 = shalt.err (!%p3876_p11)
}
  0x14   : > { %s3880_s14 = scalar_lea.vmem %s220_s27, 15360  ;;  %p3888_p1 = scmp.lt.s32.totalorder %s220_s27, %s220_s27 }
  0x15   : > { %p3881_p12 = scmp.ne.s32.totalorder %s220_s27, %s3880_s14  ;;  %p3889_p4 = scmp.lt.s32.totalorder %s3880_s14, %s3880_s14 }
  0x17   : > { %p3883_p13 = pnand %p3881_p12, %p3869_p7  ;;  %p3890_p3 = por %p3889_p4, %p3888_p1 }
  0x19   : > { %p3884_p0 = pneg %p3883_p13 }
  0x1b   : > { %p3891_p2 = pnand %p3890_p3, %p3884_p0 }
  0x1d   : > { %3894 = shalt.err (!%p3891_p2)
}
  0x1e   : > { %s3908_s15 = smov 256   ;;  %s3909_s16 = smov 16  }
  0x1f   : > { %3834 = dma.hbm_to_vmem [thread:$0]  (!%p3973_p5), %s4718_s3, 15360, %s220_s27, [#allocation7], %s3908_s15, %s3908_s15, %s3909_s16  }
  0x20   : > { %p4727_p6 = scmp.ne.s32.totalorder %s4725_s28, 0 }
  0x21   : > { %p4728_p8 = scmp.eq.s32.totalorder (!%p4727_p6), %s3960_s25, 0 }
  0x22   : > { %252 = sbr.rel (%p4727_p6) target bundleno = 2205 (0x89d), region = 48 }
  0x29   : > { %3900 = dma.done.wait (%p4728_p8), [#allocation7], 15360   ;;  %p4729_p7 = pmov %p4728_p8 }
  0x2a   : > { %v3910_v0 = vmov 0.0   ;;  %p282_p2 = scmp.lt.s32.totalorder %s3960_s25, 1  ;;  %vm323_vm0 = vcmask 1043456   ;;  %v3163_v1 = vld [vmem:[%s4716_s1 + $0x48] sm:$0xff]  ;;  %v3165_v2 = vld [vmem:[%s4716_s1 + $0x58] sm:$0xff]  ;;  %v3162_v3 = vld [vmem:[%s4716_s1 + $0x40] sm:$0xff] }
  0x2b   : > { %3902 = vsyncadd (%p4729_p7), [#allocation7], 4294951936  ;;  %394 = vmatprep.mubr.f32.mxu0 %v3910_v0  ;;  %1179 = vmatprep.mubr.f32.mxu1 %v3910_v0  ;;  %v3359_v4 = vpack.c.bf16 %v3165_v2, %v3163_v1  ;;  %v3164_v5 = vld [vmem:[%s4716_s1 + $0x50] sm:$0xff]  ;;  %v3167_v6 = vld [vmem:[%s4716_s1 + $0x68] sm:$0xff]  ;;  %vm3911_vm1 = vmmov 1   ;;  %vm313_vm3 = vcmask 228352  }
  0x2c   : > { %s4733_s25 = smov (!%p282_p2, %s3960_s25), 1  ;;  %v3169_v7 = vld [vmem:[%s4716_s1 + $0x78] sm:$0xf]  ;;  %v3361_v8 = vpack.c.bf16 %v3164_v5, %v3162_v3  ;;  %vm4023_vm2 = vmpackc.low %vm323_vm0, %vm3911_vm1  ;;  %v3166_v11 = vld [vmem:[%s4716_s1 + $0x60] sm:$0xff]  ;;  %vm896_vm4 = vcmask 778240   ;;  %vm1037_vm5 = vcmask 785408  }
  0x2d   : > { %v3363_v9 = vpack.c.bf16 %v3169_v7, %v3167_v6  ;;  %v3168_v12 = vld [vmem:[%s4716_s1 + $0x70] sm:$0xf]  ;;  %s3288_s14 = sshll.u32 %s4733_s25, 5  ;;  %3360 = vmatprep.subr.bf16.mxu0 %v3359_v4  ;;  %v294_v13 = vld [vmem:[%s4716_s1 + $0x8] sm:$0xff]  ;;  %v296_v14 = vld [vmem:[%s4716_s1 + $0x18] sm:$0xff]  ;;  %s3912_s26 = smov 100  }
  0x2e   : > { %3362 = vmatpush1.bf16.msra.mxu0 %v3361_v8  ;;  %v3366_v15 = vpack.c.bf16 %v3168_v12, %v3166_v11  ;;  %s4045_s21 = scalar_lea.vmem %s4715_s0, %s3288_s14  ;;  %v3369_v16 = vpack.c.bf16 %v296_v14, %v294_v13  ;;  %v293_v17 = vld [vmem:[%s4716_s1] sm:$0xff]  ;;  %v295_v18 = vld [vmem:[%s4716_s1 + $0x10] sm:$0xff]  ;;  %v298_v19 = vld [vmem:[%s4716_s1 + $0x28] sm:$0xff]  ;;  %vm1517_vm6 = vcmask 516096   ;;  %s3913_s17 = smov 64   ;;  %vm1555_vm7 = vcmask 523264  }
  0x2f   : > { %3365 = vmatprep.subr.msk.bf16.mxu0 %vm4023_vm2, %v3363_v9  ;;  %v300_v20 = vld [vmem:[%s4716_s1 + $0x38] sm:$0xf]  ;;  %v301_v21 = vld [vmem:[%s4045_s21 + $0x1] sm:$0xff]  ;;  %v3371_v22 = vpack.c.bf16 %v295_v18, %v293_v17  ;;  %v299_v25 = vld [vmem:[%s4716_s1 + $0x30] sm:$0xf]  ;;  %vm1661_vm8 = vcmask 73728  }
  0x30   : > { %v3373_v23 = vpack.c.bf16 %v300_v20, %v298_v19  ;;  %v297_v24 = vld [vmem:[%s4716_s1 + $0x20] sm:$0xff]  ;;  %v3181_v26 = vld [vmem:[%s4716_s1 + $0x88] sm:$0xff]  ;;  %v3183_v27 = vld [vmem:[%s4716_s1 + $0x98] sm:$0xff]  ;;  %vm3092_vm13 = vcmask 0  }
  0x31   : > { %v302_v28 = vld [vmem:[%s4045_s21 + $0x9] sm:$0xff]  ;;  %v3376_v29 = vpack.c.bf16 %v299_v25, %v297_v24  ;;  %v3379_v30 = vpack.c.bf16 %v3183_v27, %v3181_v26  ;;  %v303_v31 = vld [vmem:[%s4045_s21 + $0x11] sm:$0xff]  ;;  %v3180_v32 = vld [vmem:[%s4716_s1 + $0x80] sm:$0xff] }
  0x32   : > { %3368 = vmatpush1.bf16.msk.msra.mxu0 %vm4023_vm2, %v3366_v15  ;;  %v3182_v33 = vld [vmem:[%s4716_s1 + $0x90] sm:$0xff]  ;;  %v3185_v34 = vld [vmem:[%s4716_s1 + $0xa8] sm:$0xff]  ;;  %v3187_v35 = vld [vmem:[%s4716_s1 + $0xb8] sm:$0xf] }
  0x33   : > { %3370 = vmatprep.subr.bf16.mxu0 %v3369_v16  ;;  %v290_v36 = vld [vmem:[%s4045_s21] sm:$0xff]  ;;  %v3381_v37 = vpack.c.bf16 %v3182_v33, %v3180_v32  ;;  %v3383_v38 = vpack.c.bf16 %v3187_v35, %v3185_v34  ;;  %v3186_v40 = vld [vmem:[%s4716_s1 + $0xb0] sm:$0xf]  ;;  %v3194_v41 = vld [vmem:[%s4716_s1 + $0xc8] sm:$0xff] }
  0x34   : > { %v3184_v39 = vld [vmem:[%s4716_s1 + $0xa0] sm:$0xff]  ;;  %v3196_v42 = vld [vmem:[%s4716_s1 + $0xd8] sm:$0xff]  ;;  %v291_v43 = vld [vmem:[%s4045_s21 + $0x8] sm:$0xff] }
  0x35   : > { %3172 = vmatmul.mubr.msk.f32.vlgmr.msra.gmra.mrb[0].mxu0 %vm313_vm3, %v301_v21  ;;  %v3386_v44 = vpack.c.bf16 %v3186_v40, %v3184_v39  ;;  %v3389_v45 = vpack.c.bf16 %v3196_v42, %v3194_v41  ;;  %v292_v46 = vld [vmem:[%s4045_s21 + $0x10] sm:$0xff]  ;;  %v3193_v47 = vld [vmem:[%s4716_s1 + $0xc0] sm:$0xff]  ;;  %v3198_v49 = vld [vmem:[%s4716_s1 + $0xe8] sm:$0xff] }
  0x36   : > { %3372 = vmatpush1.bf16.msra.mxu0 %v3371_v22  ;;  %400 = vmatprep.mubr.f32.mxu0 %v3910_v0  ;;  %v3195_v48 = vld [vmem:[%s4716_s1 + $0xd0] sm:$0xff]  ;;  %v3200_v50 = vld [vmem:[%s4716_s1 + $0xf8] sm:$0xf]  ;;  %v4136_v51 = vld [vmem:[%s4045_s21 + $0x2] sm:$0xff] }
  0x37   : > { %3375 = vmatprep.subr.msk.bf16.mxu0 %vm4023_vm2, %v3373_v23  ;;  %v3391_v52 = vpack.c.bf16 %v3195_v48, %v3193_v47  ;;  %v3393_v53 = vpack.c.bf16 %v3200_v50, %v3198_v49  ;;  %v3197_v54 = vld [vmem:[%s4716_s1 + $0xe0] sm:$0xff]  ;;  %v3199_v55 = vld [vmem:[%s4716_s1 + $0xf0] sm:$0xf]  ;;  %v3207_v56 = vld [vmem:[%s4716_s1 + $0x108] sm:$0xff] }
  0x38   : > { %v3209_v57 = vld [vmem:[%s4716_s1 + $0x118] sm:$0xff]  ;;  %v512_v58 = vld [vmem:[%s4045_s21 + $0xa] sm:$0xff]  ;;  %v3396_v59 = vpack.c.bf16 %v3199_v55, %v3197_v54  ;;  %v3206_v62 = vld [vmem:[%s4716_s1 + $0x100] sm:$0xff] }
  0x39   : > { %3173 = vmatmul.mubr.msk.f32.gmra.mrb[2].mxu0 %vm313_vm3, %v302_v28  ;;  %v3399_v60 = vpack.c.bf16 %v3209_v57, %v3207_v56  ;;  %v4161_v61 = vld [vmem:[%s4045_s21 + $0x12] sm:$0xff]  ;;  %v3211_v1 = vld [vmem:[%s4716_s1 + $0x128] sm:$0xff]  ;;  %v3210_v6 = vld [vmem:[%s4716_s1 + $0x120] sm:$0xff] }
  0x3a   : > { %406 = vmatprep.mubr.f32.mxu0 %v3910_v0  ;;  %3378 = vmatpush1.bf16.msk.msra.mxu0 %vm4023_vm2, %v3376_v29  ;;  %v3208_v63 = vld [vmem:[%s4716_s1 + $0x110] sm:$0xff]  ;;  %v3213_v2 = vld [vmem:[%s4716_s1 + $0x138] sm:$0xf]  ;;  %v627_v3 = vld [vmem:[%s4045_s21 + $0x3] sm:$0xff] }
  0x3b   : > { %3380 = vmatprep.subr.bf16.mxu0 %v3379_v30  ;;  %v3401_v4 = vpack.c.bf16 %v3208_v63, %v3206_v62  ;;  %v3403_v5 = vpack.c.bf16 %v3213_v2, %v3211_v1  ;;  %v3212_v7 = vld [vmem:[%s4716_s1 + $0x130] sm:$0xf]  ;;  %v4201_v12 = vld [vmem:[%s4045_s21 + $0x4] sm:$0xff]  ;;  %v4210_v14 = vld [vmem:[%s4045_s21 + $0x14] sm:$0xff] }
  0x3c   : > { %v4188_v8 = vld [vmem:[%s4045_s21 + $0xb] sm:$0xff]  ;;  %v3406_v9 = vpack.c.bf16 %v3212_v7, %v3210_v6  ;;  %v629_v11 = vld [vmem:[%s4045_s21 + $0x13] sm:$0xff]  ;;  %v988_v15 = vld [vmem:[#allocation6 + $0x8] sm:$0xff] }
  0x3d   : > { %3174 = vmatmul.mubr.msk.f32.gmra.mrb[4].mxu0 %vm313_vm3, %v303_v31  ;;  %v744_v13 = vld [vmem:[%s4045_s21 + $0xc] sm:$0xff]  ;;  %v987_v18 = vld [vmem:[#allocation6] sm:$0xff]  ;;  %v989_v19 = vld [vmem:[#allocation6 + $0x10] sm:$0xff] }
  0x3e   : > { %492 = vmatprep.mubr.f32.mxu0 %v3910_v0  ;;  %v990_v16 = vld [vmem:[#allocation6 + $0x18] sm:$0xff]  ;;  %v3435_v20 = vpack.c.bf16 %v989_v19, %v987_v18  ;;  %v992_v21 = vld [vmem:[#allocation6 + $0x28] sm:$0xff]  ;;  %v991_v26 = vld [vmem:[#allocation6 + $0x20] sm:$0xff] }
  0x3f   : > { %v3433_v17 = vpack.c.bf16 %v990_v16, %v988_v15  ;;  %v994_v22 = vld [vmem:[#allocation6 + $0x38] sm:$0xff]  ;;  %v1014_v24 = vld [vmem:[#allocation6 + $0xc8] sm:$0xff]  ;;  %v993_v28 = vld [vmem:[#allocation6 + $0x30] sm:$0xff] }
  0x40   : > { %v3437_v23 = vpack.c.bf16 %v994_v22, %v992_v21  ;;  %v1016_v25 = vld [vmem:[#allocation6 + $0xd8] sm:$0xff]  ;;  %v1013_v29 = vld [vmem:[#allocation6 + $0xc0] sm:$0xff]  ;;  %v1015_v30 = vld [vmem:[#allocation6 + $0xd0] sm:$0xff]  ;;  %v3439_v31 = vpack.c.bf16 %v993_v28, %v991_v26 }
  0x41   : > { %3177 = vmatmul.mubr.msk.f32.vlgmr.msra.gmra.mrb[0].mxu0 %vm313_vm3, %v290_v36  ;;  %3434 = vmatprep.subr.bf16.mxu1 %v3433_v17  ;;  %v3409_v27 = vpack.c.bf16 %v1016_v25, %v1014_v24  ;;  %v3411_v32 = vpack.c.bf16 %v1015_v30, %v1013_v29  ;;  %v996_v33 = vld [vmem:[#allocation6 + $0x48] sm:$0xff]  ;;  %v998_v34 = vld [vmem:[#allocation6 + $0x58] sm:$0xff]  ;;  %v997_v40 = vld [vmem:[#allocation6 + $0x50] sm:$0xff] }
  0x42   : > { %3382 = vmatpush1.bf16.msra.mxu0 %v3381_v37  ;;  %498 = vmatprep.mubr.f32.mxu0 %v3910_v0  ;;  %v3441_v35 = vpack.c.bf16 %v998_v34, %v996_v33  ;;  %v1018_v36 = vld [vmem:[#allocation6 + $0xe8] sm:$0xff]  ;;  %v1020_v37 = vld [vmem:[#allocation6 + $0xf8] sm:$0xff]  ;;  %v1017_v41 = vld [vmem:[#allocation6 + $0xe0] sm:$0xff]  ;;  %v861_v33 = vlaneseq }
  0x43   : > { %3385 = vmatprep.subr.msk.bf16.mxu0 %vm4023_vm2, %v3383_v38  ;;  %3436 = vmatpush1.bf16.msra.mxu1 %v3435_v20  ;;  %v995_v38 = vld [vmem:[#allocation6 + $0x40] sm:$0xff]  ;;  %v3413_v39 = vpack.c.bf16 %v1020_v37, %v1018_v36  ;;  %v1019_v42 = vld [vmem:[#allocation6 + $0xf0] sm:$0xff]  ;;  %v1022_v48 = vld [vmem:[#allocation6 + $0x108] sm:$0xff] }
  0x44   : > { %3438 = vmatprep.subr.bf16.mxu1 %v3437_v23  ;;  %v1024_v49 = vld [vmem:[#allocation6 + $0x118] sm:$0xff]  ;;  %v999_v50 = vld [vmem:[#allocation6 + $0x60] sm:$0xff]  ;;  %v1023_v55 = vld [vmem:[#allocation6 + $0x110] sm:$0xff]  ;;  %v862_v34 = vshrl.u32 %v861_v33, 7 }
  0x45   : > { %3178 = vmatmul.mubr.msk.f32.gmra.mrb[2].mxu0 %vm313_vm3, %v291_v43  ;;  %v3443_v43 = vpack.c.bf16 %v997_v40, %v995_v38  ;;  %v1021_v54 = vld [vmem:[#allocation6 + $0x100] sm:$0xff]  ;;  %v1026_v62 = vld [vmem:[#allocation6 + $0x128] sm:$0xff]  ;;  %v1028_v63 = vld [vmem:[#allocation6 + $0x138] sm:$0xff] }
  0x46   : > { %504 = vmatprep.mubr.f32.mxu0 %v3910_v0  ;;  %3388 = vmatpush1.bf16.msk.msra.mxu0 %vm4023_vm2, %v3386_v44  ;;  %v3415_v44 = vpack.c.bf16 %v1019_v42, %v1017_v41  ;;  %v3419_v57 = vpack.c.bf16 %v1023_v55, %v1021_v54  ;;  %v1003_v1 = vld [vmem:[#allocation6 + $0x80] sm:$0xff]  ;;  %v3421_v2 = vpack.c.bf16 %v1028_v63, %v1026_v62  ;;  %v1030_v15 = vld [vmem:[#allocation6 + $0x148] sm:$0xff]  ;;  %v1032_v16 = vld [vmem:[#allocation6 + $0x158] sm:$0xff]  ;;  %v4221_v37 = vsub.s32 1, %v862_v34 }
  0x47   : > { %3390 = vmatprep.subr.bf16.mxu0 %v3389_v45  ;;  %3440 = vmatpush1.bf16.msra.mxu1 %v3439_v31  ;;  %v1000_v45 = vld [vmem:[#allocation6 + $0x68] sm:$0xff]  ;;  %v1007_v17 = vld [vmem:[#allocation6 + $0xa0] sm:$0xff]  ;;  %v3425_v18 = vpack.c.bf16 %v1032_v16, %v1030_v15  ;;  %v1009_v19 = vld [vmem:[#allocation6 + $0xb0] sm:$0xff] }
  0x48   : > { %3442 = vmatprep.subr.bf16.mxu1 %v3441_v35  ;;  %v1029_v20 = vld [vmem:[#allocation6 + $0x140] sm:$0xff]  ;;  %v1031_v21 = vld [vmem:[#allocation6 + $0x150] sm:$0xff]  ;;  %v3455_v22 = vpack.c.bf16 %v1009_v19, %v1007_v17  ;;  %v1189_v24 = vld [vmem:[#allocation6 + $0x188] sm:$0xff]  ;;  %v4216_v35 = vsub.s32 0, %v862_v34 }
  0x49   : > { %3179 = vmatmul.mubr.msk.f32.gmra.mrb[4].mxu0 %vm313_vm3, %v292_v46  ;;  %v1002_v46 = vld [vmem:[#allocation6 + $0x78] sm:$0xff]  ;;  %v3427_v23 = vpack.c.bf16 %v1031_v21, %v1029_v20  ;;  %v1034_v26 = vld [vmem:[#allocation6 + $0x168] sm:$0xff]  ;;  %v1033_v30 = vld [vmem:[#allocation6 + $0x160] sm:$0xff] }
  0x4a   : > { %602 = vmatprep.mubr.f32.mxu0 %v3910_v0  ;;  %v3445_v47 = vpack.c.bf16 %v1002_v46, %v1000_v45  ;;  %v1191_v25 = vld [vmem:[#allocation6 + $0x198] sm:$0xff]  ;;  %v1035_v31 = vld [vmem:[#allocation6 + $0x170] sm:$0xff]  ;;  %v859_v36 = vld [vmem:[%s4717_s2] sm:$0x3] }
  0x4b   : > { %3444 = vmatpush1.bf16.msra.mxu1 %v3443_v43  ;;  %v1036_v28 = vld [vmem:[#allocation6 + $0x178] sm:$0xff]  ;;  %v864_v38 = vrot.slane %v859_v36, %v4216_v35 }
  0x4c   : > { %3446 = vmatprep.subr.bf16.mxu1 %v3445_v47  ;;  %v3429_v29 = vpack.c.bf16 %v1036_v28, %v1034_v26  ;;  %v2432_v10 = vld [vmem:[#allocation6 + $0xd8] sm:$0xff] }
  0x4d   : > { %3190 = vmatmul.mubr.msk.f32.vlgmr.msra.gmra.mrb[0].mxu0 %vm313_vm3, %v4136_v51 }
  0x4e   : > { %3392 = vmatpush1.bf16.msra.mxu0 %v3391_v52  ;;  %608 = vmatprep.mubr.f32.mxu0 %v3910_v0  ;;  %v3417_v52 = vpack.c.bf16 %v1024_v49, %v1022_v48 }
  0x4f   : > { %3395 = vmatprep.subr.msk.bf16.mxu0 %vm4023_vm2, %v3393_v53  ;;  %v1001_v53 = vld [vmem:[#allocation6 + $0x70] sm:$0xff] }
  0x50   : > { %v3447_v56 = vpack.c.bf16 %v1001_v53, %v999_v50 }
  0x51   : > { %3191 = vmatmul.mubr.msk.f32.gmra.mrb[2].mxu0 %vm313_vm3, %v512_v58  ;;  %v1004_v58 = vld [vmem:[#allocation6 + $0x88] sm:$0xff] }
  0x52   : > { %614 = vmatprep.mubr.f32.mxu0 %v3910_v0  ;;  %3398 = vmatpush1.bf16.msk.msra.mxu0 %vm4023_vm2, %v3396_v59  ;;  %v1006_v59 = vld [vmem:[#allocation6 + $0x98] sm:$0xff] }
  0x53   : > { %3400 = vmatprep.subr.bf16.mxu0 %v3399_v60  ;;  %3448 = vmatpush1.bf16.msra.mxu1 %v3447_v56  ;;  %v3449_v60 = vpack.c.bf16 %v1006_v59, %v1004_v58 }
  0x55   : > { %3192 = vmatmul.mubr.msk.f32.gmra.mrb[4].mxu0 %vm313_vm3, %v4161_v61  ;;  %3450 = vmatprep.subr.bf16.mxu1 %v3449_v60 }
  0x56   : > { %718 = vmatprep.mubr.f32.mxu0 %v3910_v0 }
  0x59   : > { %3203 = vmatmul.mubr.msk.f32.vlgmr.msra.gmra.mrb[0].mxu0 %vm313_vm3, %v627_v3  ;;  %v1005_v3 = vld [vmem:[#allocation6 + $0x90] sm:$0xff] }
  0x5a   : > { %3402 = vmatpush1.bf16.msra.mxu0 %v3401_v4  ;;  %724 = vmatprep.mubr.f32.mxu0 %v3910_v0  ;;  %v1025_v4 = vld [vmem:[#allocation6 + $0x120] sm:$0xff]  ;;  %v3451_v6 = vpack.c.bf16 %v1005_v3, %v1003_v1 }
  0x5b   : > { %3405 = vmatprep.subr.msk.bf16.mxu0 %vm4023_vm2, %v3403_v5  ;;  %v1027_v5 = vld [vmem:[#allocation6 + $0x130] sm:$0xff] }
  0x5c   : > { %v3423_v7 = vpack.c.bf16 %v1027_v5, %v1025_v4  ;;  %3452 = vmatpush1.bf16.msra.mxu1 %v3451_v6 }
  0x5d   : > { %3204 = vmatmul.mubr.msk.f32.gmra.mrb[2].mxu0 %vm313_vm3, %v4188_v8 }
  0x5e   : > { %730 = vmatprep.mubr.f32.mxu0 %v3910_v0  ;;  %3408 = vmatpush1.bf16.msk.msra.mxu0 %vm4023_vm2, %v3406_v9  ;;  %v1008_v9 = vld [vmem:[#allocation6 + $0xa8] sm:$0xff] }
  0x5f   : > { %3410 = vmatprep.subr.bf16.mxu0 %v3409_v27  ;;  %v3457_v27 = vpack.c.bf16 %v1191_v25, %v1189_v24 }
  0x61   : > { %3205 = vmatmul.mubr.msk.f32.gmra.mrb[4].mxu0 %vm313_vm3, %v629_v11  ;;  %v1010_v11 = vld [vmem:[#allocation6 + $0xb8] sm:$0xff] }
  0x62   : > { %834 = vmatprep.mubr.f32.mxu0 %v3910_v0 }
  0x65   : > { %3216 = vmatmul.mubr.msk.f32.vlgmr.msra.gmra.mrb[0].mxu0 %vm313_vm3, %v4201_v12 }
  0x66   : > { %840 = vmatprep.mubr.f32.mxu0 %v3910_v0  ;;  %3412 = vmatpush1.bf16.msra.mxu0 %v3411_v32  ;;  %v3431_v32 = vpack.c.bf16 %v1035_v31, %v1033_v30 }
  0x67   : > { %3414 = vmatprep.subr.bf16.mxu0 %v3413_v39  ;;  %v4225_v39 = vrot.slane %v859_v36, %v4221_v37 }
  0x69   : > { %3217 = vmatmul.mubr.msk.f32.gmra.mrb[2].mxu0 %vm313_vm3, %v744_v13  ;;  %v3453_v13 = vpack.c.bf16 %v1010_v11, %v1008_v9 }
  0x6a   : > { %846 = vmatprep.mubr.f32.mxu0 %v3910_v0  ;;  %3416 = vmatpush1.bf16.msra.mxu0 %v3415_v44 }
  0x6b   : > { %3418 = vmatprep.subr.bf16.mxu0 %v3417_v52  ;;  %3454 = vmatprep.subr.bf16.mxu1 %v3453_v13 }
  0x6c   : > { %3456 = vmatpush1.bf16.msra.mxu1 %v3455_v22 }
  0x6d   : > { %3218 = vmatmul.mubr.msk.f32.gmra.mrb[4].mxu0 %vm313_vm3, %v4210_v14  ;;  %3458 = vmatprep.subr.bf16.mxu1 %v3457_v27 }
  0x6e   : > { %1105 = vmatprep.mubr.f32.mxu0 %v3910_v0  ;;  %3420 = vmatpush1.bf16.msra.mxu0 %v3419_v57 }
  0x6f   : > { %3422 = vmatprep.subr.bf16.mxu0 %v3421_v2 }
  0x72   : > { %3424 = vmatpush1.bf16.msra.mxu0 %v3423_v7 }
  0x73   : > { %3426 = vmatprep.subr.bf16.mxu0 %v3425_v18 }
  0x76   : > { %3428 = vmatpush1.bf16.msra.mxu0 %v3427_v23 }
  0x77   : > { %3430 = vmatprep.subr.bf16.mxu0 %v3429_v29 }
  0x7a   : > { %3432 = vmatpush1.bf16.msra.mxu0 %v3431_v32 }
 0x138   : > { %v836_v40 = vpop.f32.mrb[0].mxu0 }
 0x139   : > { %v871_v41 = vadd.f32 %v864_v38, %v836_v40  ;;  %v838_v42 = vpop.f32.mrb[1].mxu0 }
 0x13a   : > { %v872_v43 = vadd.f32 %v4225_v39, %v838_v42 }
 0x13b   : > { %v877_v44 = vmax.f32 %v871_v41, 0.0 }
 0x13c   : > { %v878_v45 = vmax.f32 %v872_v43, 0.0  ;;  %v842_v46 = vpop.f32.mrb[2].mxu0 }
 0x13d   : > { %883 = vst [vmem:[#allocation2] sm:$0xff] %v877_v44  ;;  %v873_v47 = vadd.f32 %v864_v38, %v842_v46  ;;  %v844_v48 = vpop.f32.mrb[3].mxu0 }
 0x13e   : > { %884 = vst [vmem:[#allocation2 + $0x8] sm:$0xff] %v878_v45  ;;  %v874_v49 = vadd.f32 %v4225_v39, %v844_v48 }
 0x13f   : > { %v879_v50 = vmax.f32 %v873_v47, 0.0 }
 0x140   : > { %v880_v52 = vmax.f32 %v874_v49, 0.0  ;;  %v848_v53 = vpop.f32.mrb[4].mxu0 }
 0x141   : > { %885 = vst [vmem:[#allocation2 + $0x10] sm:$0xff] %v879_v50  ;;  %v875_v54 = vadd.f32 %v864_v38, %v848_v53  ;;  %v850_v55 = vpop.f32.mrb[5].mxu0 }
 0x142   : > { %886 = vst [vmem:[#allocation2 + $0x18] sm:$0xff] %v880_v52  ;;  %v876_v48 = vadd.f32 %v4225_v39, %v850_v55  ;;  %v1188_v39 = vld [vmem:[#allocation6 + $0x180] sm:$0xff]  ;;  %v1190_v55 = vld [vmem:[#allocation6 + $0x190] sm:$0xff] }
 0x143   : > { %v881_v56 = vmax.f32 %v875_v54, 0.0 }
 0x144   : > { %v889_v57 = vld [vmem:[#allocation2] ss:$0 sm:$0xff]  ;;  %v892_v58 = vld [vmem:[#allocation2 + $0x1] ss:$0 sm:$0xff]  ;;  %v898_v59 = vld [vmem:[#allocation2 + $0x2] ss:$0 sm:$0xff] }
 0x145   : > { %v901_v60 = vld [vmem:[#allocation2 + $0x3] ss:$0 sm:$0xff]  ;;  %v906_v62 = vld [vmem:[#allocation2 + $0x4] ss:$0 sm:$0xff]  ;;  %v909_v63 = vld [vmem:[#allocation2 + $0x5] ss:$0 sm:$0xff] }
 0x146   : > { %887 = vst [vmem:[#allocation2 + $0x20] sm:$0xff] %v881_v56  ;;  %v914_v1 = vld [vmem:[#allocation2 + $0x6] ss:$0 sm:$0xff]  ;;  %v917_v2 = vld [vmem:[#allocation2 + $0x7] ss:$0 sm:$0xff] }
 0x147   : > { %v890_v3 = vld [vmem:[#allocation2 + $0x8] ss:$0 sm:$0xff]  ;;  %v893_v5 = vld [vmem:[#allocation2 + $0x9] ss:$0 sm:$0xff]  ;;  %v899_v6 = vld [vmem:[#allocation2 + $0xa] ss:$0 sm:$0xff] }
 0x148   : > { %v891_v4 = vmax.f32 %v889_v57, %v890_v3  ;;  %v902_v7 = vld [vmem:[#allocation2 + $0xb] ss:$0 sm:$0xff]  ;;  %v894_v9 = vmax.f32 %v892_v58, %v893_v5  ;;  %v900_v11 = vmax.f32 %v898_v59, %v899_v6  ;;  %v907_v15 = vld [vmem:[#allocation2 + $0xc] ss:$0 sm:$0xff]  ;;  %v910_v16 = vld [vmem:[#allocation2 + $0xd] ss:$0 sm:$0xff] }
 0x149   : > { %v903_v13 = vmax.f32 %v901_v60, %v902_v7  ;;  %v915_v17 = vld [vmem:[#allocation2 + $0xe] ss:$0 sm:$0xff]  ;;  %v908_v18 = vmax.f32 %v906_v62, %v907_v15  ;;  %v911_v19 = vmax.f32 %v909_v63, %v910_v16  ;;  %v918_v21 = vld [vmem:[#allocation2 + $0xf] ss:$0 sm:$0xff]  ;;  %v922_v22 = vld [vmem:[#allocation2 + $0x10] ss:$0 sm:$0xff] }
 0x14a   : > { %v916_v20 = vmax.f32 %v914_v1, %v915_v17  ;;  %v925_v23 = vld [vmem:[#allocation2 + $0x11] ss:$0 sm:$0xff]  ;;  %v895_v24 = vmax.f32 %v891_v4, %v894_v9  ;;  %v919_v26 = vmax.f32 %v917_v2, %v918_v21  ;;  %v930_v27 = vld [vmem:[#allocation2 + $0x12] ss:$0 sm:$0xff]  ;;  %v933_v28 = vld [vmem:[#allocation2 + $0x13] ss:$0 sm:$0xff] }
 0x14b   : > { %v904_v25 = vmax.f32 %v900_v11, %v903_v13  ;;  %v938_v29 = vld [vmem:[#allocation2 + $0x14] ss:$0 sm:$0xff]  ;;  %v912_v30 = vmax.f32 %v908_v18, %v911_v19  ;;  %v941_v31 = vld [vmem:[#allocation2 + $0x15] ss:$0 sm:$0xff]  ;;  %v946_v32 = vld [vmem:[#allocation2 + $0x16] ss:$0 sm:$0xff] }
 0x14c   : > { %v949_v34 = vld [vmem:[#allocation2 + $0x17] ss:$0 sm:$0xff]  ;;  %897 = vst.msk [vmem:[#allocation3] sm:$0x1] %vm896_vm4, %v895_v24  ;;  %v920_v36 = vmax.f32 %v916_v20, %v919_v26  ;;  %v923_v38 = vld [vmem:[#allocation2 + $0x18] ss:$0 sm:$0xff]  ;;  %v3459_v20 = vpack.c.bf16 %v1190_v55, %v1188_v39 }
 0x14d   : > { %905 = vst.msk [vmem:[#allocation3 + $0x1] sm:$0x1] %vm896_vm4, %v904_v25  ;;  %v926_v40 = vld [vmem:[#allocation2 + $0x19] ss:$0 sm:$0xff]  ;;  %v931_v41 = vld [vmem:[#allocation2 + $0x1a] ss:$0 sm:$0xff]  ;;  %v924_v42 = vmax.f32 %v922_v22, %v923_v38 }
 0x14e   : > { %913 = vst.msk [vmem:[#allocation3 + $0x2] sm:$0x1] %vm896_vm4, %v912_v30  ;;  %v927_v43 = vmax.f32 %v925_v23, %v926_v40  ;;  %v932_v44 = vmax.f32 %v930_v27, %v931_v41  ;;  %v934_v45 = vld [vmem:[#allocation2 + $0x1b] ss:$0 sm:$0xff]  ;;  %v939_v46 = vld [vmem:[#allocation2 + $0x1c] ss:$0 sm:$0xff] }
 0x14f   : > { %v942_v47 = vld [vmem:[#allocation2 + $0x1d] ss:$0 sm:$0xff]  ;;  %921 = vst.msk [vmem:[#allocation3 + $0x3] sm:$0x1] %vm896_vm4, %v920_v36  ;;  %v935_v49 = vmax.f32 %v933_v28, %v934_v45  ;;  %v940_v50 = vmax.f32 %v938_v29, %v939_v46  ;;  %v947_v53 = vld [vmem:[#allocation2 + $0x1e] ss:$0 sm:$0xff] }
 0x150   : > { %v943_v52 = vmax.f32 %v941_v31, %v942_v47  ;;  %v950_v54 = vld [vmem:[#allocation2 + $0x1f] ss:$0 sm:$0xff]  ;;  %v928_v56 = vmax.f32 %v924_v42, %v927_v43  ;;  %v948_v57 = vmax.f32 %v946_v32, %v947_v53  ;;  %v882_v63 = vmax.f32 %v876_v48, 0.0  ;;  %v954_v2 = vld [vmem:[#allocation2 + $0x20] ss:$0 sm:$0xff]  ;;  %v1195_v4 = vld [vmem:[#allocation6 + $0x1b8] sm:$0xff] }
 0x151   : > { %v951_v58 = vmax.f32 %v949_v34, %v950_v54  ;;  %v936_v59 = vmax.f32 %v932_v44, %v935_v49  ;;  %v1193_v1 = vld [vmem:[#allocation6 + $0x1a8] sm:$0xff]  ;;  %v970_v7 = vld [vmem:[#allocation2 + $0x24] ss:$0 sm:$0xff]  ;;  %v973_v9 = vld [vmem:[#allocation2 + $0x25] ss:$0 sm:$0xff] }
 0x152   : > { %v944_v60 = vmax.f32 %v940_v50, %v943_v52  ;;  %929 = vst.msk [vmem:[#allocation3 + $0x4] sm:$0x1] %vm896_vm4, %v928_v56  ;;  %888 = vst [vmem:[#allocation2 + $0x28] sm:$0xff] %v882_v63  ;;  %v957_v3 = vld [vmem:[#allocation2 + $0x21] ss:$0 sm:$0xff]  ;;  %v1192_v15 = vld [vmem:[#allocation6 + $0x1a0] sm:$0xff]  ;;  %v3461_v29 = vpack.c.bf16 %v1195_v4, %v1193_v1 }
 0x153   : > { %v952_v62 = vmax.f32 %v948_v57, %v951_v58  ;;  %937 = vst.msk [vmem:[#allocation3 + $0x5] sm:$0x1] %vm896_vm4, %v936_v59  ;;  %v962_v5 = vld [vmem:[#allocation2 + $0x22] ss:$0 sm:$0xff]  ;;  %v965_v6 = vld [vmem:[#allocation2 + $0x23] ss:$0 sm:$0xff] }
 0x154   : > { %945 = vst.msk [vmem:[#allocation3 + $0x6] sm:$0x1] %vm896_vm4, %v944_v60  ;;  %v978_v11 = vld [vmem:[#allocation2 + $0x26] ss:$0 sm:$0xff]  ;;  %v981_v13 = vld [vmem:[#allocation2 + $0x27] ss:$0 sm:$0xff] }
 0x155   : > { %953 = vst.msk [vmem:[#allocation3 + $0x7] sm:$0x1] %vm896_vm4, %v952_v62  ;;  %v1194_v16 = vld [vmem:[#allocation6 + $0x1b0] sm:$0xff]  ;;  %v1197_v21 = vld [vmem:[#allocation6 + $0x1c8] sm:$0xff]  ;;  %v1199_v22 = vld [vmem:[#allocation6 + $0x1d8] sm:$0xff] }
 0x156   : > { %v3463_v45 = vpack.c.bf16 %v1194_v16, %v1192_v15  ;;  %v3465_v47 = vpack.c.bf16 %v1199_v22, %v1197_v21  ;;  %v1196_v48 = vld [vmem:[#allocation6 + $0x1c0] sm:$0xff]  ;;  %v1198_v49 = vld [vmem:[#allocation6 + $0x1d0] sm:$0xff]  ;;  %v1201_v50 = vld [vmem:[#allocation6 + $0x1e8] sm:$0xff] }
 0x157   : > { %v1203_v52 = vld [vmem:[#allocation6 + $0x1f8] sm:$0xff]  ;;  %v3467_v53 = vpack.c.bf16 %v1198_v49, %v1196_v48  ;;  %v1200_v56 = vld [vmem:[#allocation6 + $0x1e0] sm:$0xff]  ;;  %v1202_v57 = vld [vmem:[#allocation6 + $0x1f0] sm:$0xff] }
 0x158   : > { %v3469_v54 = vpack.c.bf16 %v1203_v52, %v1201_v50  ;;  %v1205_v58 = vld [vmem:[#allocation6 + $0x208] sm:$0xff]  ;;  %v1207_v59 = vld [vmem:[#allocation6 + $0x218] sm:$0xff]  ;;  %v3471_v62 = vpack.c.bf16 %v1202_v57, %v1200_v56  ;;  %v1204_v39 = vld [vmem:[#allocation6 + $0x200] sm:$0xff] }
 0x159   : > { %v955_v17 = vld [vmem:[#allocation2 + $0x28] ss:$0 sm:$0xff]  ;;  %v958_v18 = vld [vmem:[#allocation2 + $0x29] ss:$0 sm:$0xff]  ;;  %v963_v19 = vld [vmem:[#allocation2 + $0x2a] ss:$0 sm:$0xff]  ;;  %v3473_v63 = vpack.c.bf16 %v1207_v59, %v1205_v58 }
 0x15a   : > { %v956_v23 = vmax.f32 %v954_v2, %v955_v17  ;;  %v959_v24 = vmax.f32 %v957_v3, %v958_v18  ;;  %v964_v25 = vmax.f32 %v962_v5, %v963_v19  ;;  %v966_v26 = vld [vmem:[#allocation2 + $0x2b] ss:$0 sm:$0xff]  ;;  %v971_v27 = vld [vmem:[#allocation2 + $0x2c] ss:$0 sm:$0xff]  ;;  %v974_v28 = vld [vmem:[#allocation2 + $0x2d] ss:$0 sm:$0xff] }
 0x15b   : > { %v967_v30 = vmax.f32 %v965_v6, %v966_v26  ;;  %v972_v31 = vmax.f32 %v970_v7, %v971_v27  ;;  %v975_v32 = vmax.f32 %v973_v9, %v974_v28  ;;  %v979_v34 = vld [vmem:[#allocation2 + $0x2e] ss:$0 sm:$0xff]  ;;  %v982_v36 = vld [vmem:[#allocation2 + $0x2f] ss:$0 sm:$0xff]  ;;  %v1206_v55 = vld [vmem:[#allocation6 + $0x210] sm:$0xff] }
 0x15c   : > { %v986_v38 = vld [vmem:[#allocation3] sm:$0xff]  ;;  %v960_v40 = vmax.f32 %v956_v23, %v959_v24  ;;  %v980_v41 = vmax.f32 %v978_v11, %v979_v34  ;;  %v983_v42 = vmax.f32 %v981_v13, %v982_v36  ;;  %v1209_v1 = vld [vmem:[#allocation6 + $0x228] sm:$0xff]  ;;  %v3475_v3 = vpack.c.bf16 %v1206_v55, %v1204_v39  ;;  %v1210_v6 = vld [vmem:[#allocation6 + $0x230] sm:$0xff] }
 0x15d   : > { %3220 = vmatmul.mubr.msk.f32.vlgmr.msra.gmra.mrb[0].mxu1 %vm1037_vm5, %v986_v38  ;;  %v968_v43 = vmax.f32 %v964_v25, %v967_v30  ;;  %v976_v44 = vmax.f32 %v972_v31, %v975_v32  ;;  %v1211_v2 = vld [vmem:[#allocation6 + $0x238] sm:$0xff]  ;;  %v1208_v5 = vld [vmem:[#allocation6 + $0x220] sm:$0xff]  ;;  %v1291_v7 = vld [vmem:[#allocation6 + $0x248] sm:$0xff] }
 0x15e   : > { %3460 = vmatpush1.bf16.msra.mxu1 %v3459_v20  ;;  %1279 = vmatprep.mubr.f32.mxu1 %v3910_v0  ;;  %961 = vst.msk [vmem:[#allocation3 + $0x8] sm:$0x1] %vm896_vm4, %v960_v40  ;;  %v984_v46 = vmax.f32 %v980_v41, %v983_v42  ;;  %v3477_v4 = vpack.c.bf16 %v1211_v2, %v1209_v1  ;;  %v1293_v9 = vld [vmem:[#allocation6 + $0x258] sm:$0xff]  ;;  %v1290_v15 = vld [vmem:[#allocation6 + $0x240] sm:$0xff]  ;;  %v1292_v16 = vld [vmem:[#allocation6 + $0x250] sm:$0xff] }
 0x15f   : > { %3462 = vmatprep.subr.bf16.mxu1 %v3461_v29  ;;  %969 = vst.msk [vmem:[#allocation3 + $0x9] sm:$0x1] %vm896_vm4, %v968_v43  ;;  %977 = vst.msk [vmem:[#allocation3 + $0xa] sm:$0x1] %vm896_vm4, %v976_v44  ;;  %v3479_v11 = vpack.c.bf16 %v1210_v6, %v1208_v5  ;;  %v3481_v13 = vpack.c.bf16 %v1293_v9, %v1291_v7  ;;  %v1295_v17 = vld [vmem:[#allocation6 + $0x268] sm:$0xff]  ;;  %v1297_v18 = vld [vmem:[#allocation6 + $0x278] sm:$0xff]  ;;  %v3483_v19 = vpack.c.bf16 %v1292_v16, %v1290_v15 }
 0x160   : > { %985 = vst.msk [vmem:[#allocation3 + $0xb] sm:$0x1] %vm896_vm4, %v984_v46  ;;  %v3485_v20 = vpack.c.bf16 %v1297_v18, %v1295_v17  ;;  %v1294_v21 = vld [vmem:[#allocation6 + $0x260] sm:$0xff]  ;;  %v1296_v22 = vld [vmem:[#allocation6 + $0x270] sm:$0xff]  ;;  %v1299_v24 = vld [vmem:[#allocation6 + $0x288] sm:$0xff] }
 0x161   : > { %v1301_v25 = vld [vmem:[#allocation6 + $0x298] sm:$0xff]  ;;  %v3487_v26 = vpack.c.bf16 %v1296_v22, %v1294_v21  ;;  %v1298_v28 = vld [vmem:[#allocation6 + $0x280] sm:$0xff]  ;;  %v1300_v29 = vld [vmem:[#allocation6 + $0x290] sm:$0xff] }
 0x162   : > { %3464 = vmatpush1.bf16.msra.mxu1 %v3463_v45  ;;  %v3489_v27 = vpack.c.bf16 %v1301_v25, %v1299_v24  ;;  %v1303_v30 = vld [vmem:[#allocation6 + $0x2a8] sm:$0xff]  ;;  %v1305_v31 = vld [vmem:[#allocation6 + $0x2b8] sm:$0xff]  ;;  %v3491_v32 = vpack.c.bf16 %v1300_v29, %v1298_v28  ;;  %v1302_v36 = vld [vmem:[#allocation6 + $0x2a0] sm:$0xff] }
 0x163   : > { %3466 = vmatprep.subr.bf16.mxu1 %v3465_v47  ;;  %v3493_v34 = vpack.c.bf16 %v1305_v31, %v1303_v30  ;;  %v1304_v38 = vld [vmem:[#allocation6 + $0x2b0] sm:$0xff]  ;;  %v1307_v40 = vld [vmem:[#allocation6 + $0x2c8] sm:$0xff]  ;;  %v1309_v41 = vld [vmem:[#allocation6 + $0x2d8] sm:$0xff] }
 0x164   : > { %v3495_v42 = vpack.c.bf16 %v1304_v38, %v1302_v36  ;;  %v3497_v43 = vpack.c.bf16 %v1309_v41, %v1307_v40  ;;  %v1306_v44 = vld [vmem:[#allocation6 + $0x2c0] sm:$0xff]  ;;  %v1308_v45 = vld [vmem:[#allocation6 + $0x2d0] sm:$0xff]  ;;  %v1311_v46 = vld [vmem:[#allocation6 + $0x2e8] sm:$0xff] }
 0x165   : > { %v1011_v60 = vld [vmem:[#allocation3 + $0x1] sm:$0xff]  ;;  %v3499_v48 = vpack.c.bf16 %v1308_v45, %v1306_v44  ;;  %v1312_v52 = vld [vmem:[#allocation6 + $0x2f0] sm:$0xff]  ;;  %v1413_v25 = vld [vmem:[#allocation6 + $0x3a8] sm:$0xff] }
 0x166   : > { %3468 = vmatpush1.bf16.msra.mxu1 %v3467_v53  ;;  %3219 = vmatmul.mubr.msk.f32.vlgmr.msra.gmra.mrb[6].mxu0 %vm1037_vm5, %v1011_v60  ;;  %v1186_v23 = vld [vmem:[#allocation3 + $0x2] sm:$0xff]  ;;  %v1393_v53 = vld [vmem:[#allocation6 + $0x308] sm:$0xff]  ;;  %v1394_v59 = vld [vmem:[#allocation6 + $0x310] sm:$0xff] }
 0x167   : > { %3470 = vmatprep.subr.bf16.mxu1 %v3469_v54  ;;  %v1313_v47 = vld [vmem:[#allocation6 + $0x2f8] sm:$0xff]  ;;  %v1310_v50 = vld [vmem:[#allocation6 + $0x2e0] sm:$0xff]  ;;  %v1397_v60 = vld [vmem:[#allocation6 + $0x328] sm:$0xff] }
 0x168   : > { %v3501_v49 = vpack.c.bf16 %v1313_v47, %v1311_v46  ;;  %v1395_v54 = vld [vmem:[#allocation6 + $0x318] sm:$0xff]  ;;  %v3503_v56 = vpack.c.bf16 %v1312_v52, %v1310_v50  ;;  %v1392_v58 = vld [vmem:[#allocation6 + $0x300] sm:$0xff]  ;;  %v1398_v1 = vld [vmem:[#allocation6 + $0x330] sm:$0xff] }
 0x169   : > { %v3505_v57 = vpack.c.bf16 %v1395_v54, %v1393_v53  ;;  %v1396_v55 = vld [vmem:[#allocation6 + $0x320] sm:$0xff]  ;;  %v1402_v9 = vld [vmem:[#allocation6 + $0x350] sm:$0xff] }
 0x16a   : > { %3472 = vmatpush1.bf16.msra.mxu1 %v3471_v62  ;;  %v1399_v62 = vld [vmem:[#allocation6 + $0x338] sm:$0xff]  ;;  %v3511_v5 = vpack.c.bf16 %v1398_v1, %v1396_v55  ;;  %v1400_v7 = vld [vmem:[#allocation6 + $0x340] sm:$0xff]  ;;  %v1406_v18 = vld [vmem:[#allocation6 + $0x370] sm:$0xff] }
 0x16b   : > { %3474 = vmatprep.subr.bf16.mxu1 %v3473_v63  ;;  %v3507_v63 = vpack.c.bf16 %v1394_v59, %v1392_v58  ;;  %v3509_v39 = vpack.c.bf16 %v1399_v62, %v1397_v60  ;;  %v1288_v2 = vld [vmem:[#allocation3 + $0x3] sm:$0xff]  ;;  %v3515_v15 = vpack.c.bf16 %v1402_v9, %v1400_v7  ;;  %v1410_v24 = vld [vmem:[#allocation6 + $0x390] sm:$0xff] }
 0x16c   : > { %v1404_v17 = vld [vmem:[#allocation6 + $0x360] sm:$0xff]  ;;  %v1414_v30 = vld [vmem:[#allocation6 + $0x3b0] sm:$0xff] }
 0x16d   : > { %v3519_v21 = vpack.c.bf16 %v1406_v18, %v1404_v17  ;;  %v1412_v29 = vld [vmem:[#allocation6 + $0x3a0] sm:$0xff]  ;;  %v1685_v38 = vld [vmem:[%s4045_s21 + $0x8] sm:$0xff]  ;;  %v1574_v40 = vld [vmem:[%s4720_s5 + $0x80] sm:$0xff] }
 0x16e   : > { %3476 = vmatpush1.bf16.msra.mxu1 %v3475_v3  ;;  %v1401_v3 = vld [vmem:[#allocation6 + $0x348] sm:$0xff]  ;;  %v3527_v31 = vpack.c.bf16 %v1414_v30, %v1412_v29  ;;  %v1697_v36 = vld [vmem:[%s4045_s21 + $0x11] sm:$0xff]  ;;  %v1575_v41 = vld [vmem:[%s4720_s5 + $0x88] sm:$0xff] }
 0x16f   : > { %3478 = vmatprep.subr.bf16.mxu1 %v3477_v4  ;;  %v1403_v4 = vld [vmem:[#allocation6 + $0x358] sm:$0xff]  ;;  %v1578_v47 = vld [vmem:[%s4720_s5 + $0xa0] sm:$0xff]  ;;  %v1581_v58 = vld [vmem:[%s4720_s5 + $0xb8] sm:$0xff] }
 0x170   : > { %v3513_v6 = vpack.c.bf16 %v1403_v4, %v1401_v3  ;;  %v1560_v46 = vld [vmem:[%s4720_s5 + $0x10] sm:$0xff]  ;;  %v1562_v54 = vld [vmem:[%s4720_s5 + $0x20] sm:$0xff]  ;;  %v1565_v62 = vld [vmem:[%s4720_s5 + $0x38] sm:$0xff] }
 0x171   : > { %v1564_v60 = vld [vmem:[%s4720_s5 + $0x30] sm:$0xff]  ;;  %v1567_v3 = vld [vmem:[%s4720_s5 + $0x48] sm:$0xff]  ;;  %v1570_v18 = vld [vmem:[%s4720_s5 + $0x60] sm:$0xff] }
 0x172   : > { %3480 = vmatpush1.bf16.msra.mxu1 %v3479_v11  ;;  %v1405_v11 = vld [vmem:[#allocation6 + $0x368] sm:$0xff]  ;;  %v3543_v55 = vpack.c.bf16 %v1565_v62, %v1564_v60  ;;  %v1584_v4 = vld [vmem:[%s4720_s5 + $0xd0] sm:$0xff] }
 0x173   : > { %3482 = vmatprep.subr.bf16.mxu1 %v3481_v13  ;;  %v1407_v13 = vld [vmem:[#allocation6 + $0x378] sm:$0xff] }
 0x174   : > { %v3517_v16 = vpack.c.bf16 %v1407_v13, %v1405_v11  ;;  %v1568_v9 = vld [vmem:[%s4720_s5 + $0x50] sm:$0xff]  ;;  %v1569_v11 = vld [vmem:[%s4720_s5 + $0x58] sm:$0xff]  ;;  %v1586_v13 = vld [vmem:[%s4720_s5 + $0xe0] sm:$0xff] }
 0x175   : > { %3221 = vmatmul.mubr.msk.f32.vlgmr.msra.gmra.mrb[0].mxu1 %vm1037_vm5, %v1186_v23  ;;  %v1408_v23 = vld [vmem:[#allocation6 + $0x380] sm:$0xff] }
 0x176   : > { %3484 = vmatpush1.bf16.msra.mxu1 %v3483_v19  ;;  %1381 = vmatprep.mubr.f32.mxu1 %v3910_v0  ;;  %v1409_v19 = vld [vmem:[#allocation6 + $0x388] sm:$0xff] }
 0x177   : > { %3486 = vmatprep.subr.bf16.mxu1 %v3485_v20  ;;  %v1411_v20 = vld [vmem:[#allocation6 + $0x398] sm:$0xff] }
 0x178   : > { %v3521_v22 = vpack.c.bf16 %v1411_v20, %v1409_v19  ;;  %v1571_v19 = vld [vmem:[%s4720_s5 + $0x68] sm:$0xff]  ;;  %v1588_v20 = vld [vmem:[%s4720_s5 + $0xf0] sm:$0xff] }
 0x17a   : > { %3488 = vmatpush1.bf16.msra.mxu1 %v3487_v26  ;;  %v1415_v26 = vld [vmem:[#allocation6 + $0x3b8] sm:$0xff] }
 0x17b   : > { %3490 = vmatprep.subr.bf16.mxu1 %v3489_v27  ;;  %v3523_v27 = vpack.c.bf16 %v1410_v24, %v1408_v23  ;;  %v3525_v28 = vpack.c.bf16 %v1415_v26, %v1413_v25  ;;  %v1492_v24 = vld [vmem:[%s4719_s4] sm:$0x3] }
 0x17c   : > { %v1497_v25 = vrot.slane %v1492_v24, %v4216_v35 }
 0x17e   : > { %3492 = vmatpush1.bf16.msra.mxu1 %v3491_v32  ;;  %v1390_v32 = vld [vmem:[#allocation3 + $0x4] sm:$0xff] }
 0x17f   : > { %3494 = vmatprep.subr.bf16.mxu1 %v3493_v34  ;;  %v1696_v34 = vld [vmem:[%s4045_s21 + $0x9] sm:$0xff] }
 0x180   : > { %1711 = vrot.lane.b32.xlu1 %v1696_v34, %s3912_s26 }
 0x182   : > { %3496 = vmatpush1.bf16.msra.mxu1 %v3495_v42  ;;  %v1558_v42 = vld [vmem:[%s4720_s5] sm:$0xff] }
 0x183   : > { %3498 = vmatprep.subr.bf16.mxu1 %v3497_v43  ;;  %v1577_v43 = vld [vmem:[%s4720_s5 + $0x98] sm:$0xff] }
 0x184   : > { %1713 = vrot.lane.b32.xlu1 %v1697_v36, %s3912_s26 }
 0x186   : > { %3500 = vmatpush1.bf16.msra.mxu1 %v3499_v48  ;;  %v1579_v48 = vld [vmem:[%s4720_s5 + $0xa8] sm:$0xff] }
 0x187   : > { %3502 = vmatprep.subr.bf16.mxu1 %v3501_v49  ;;  %v3537_v53 = vpack.c.bf16 %v1579_v48, %v1578_v47 }
 0x188   : > { %1815 = vrot.lane.b32.xlu1 %v1685_v38, %s3912_s26 }
 0x18a   : > { %3504 = vmatpush1.bf16.msra.mxu1 %v3503_v56  ;;  %v1563_v56 = vld [vmem:[%s4720_s5 + $0x28] sm:$0xff] }
 0x18b   : > { %3506 = vmatprep.subr.bf16.mxu1 %v3505_v57  ;;  %v1580_v57 = vld [vmem:[%s4720_s5 + $0xb0] sm:$0xff] }
 0x18c   : > { %1928 = vrot.lane.b32.xlu1 %v4136_v51, %s3912_s26  ;;  %v3529_v51 = vpack.c.bf16 %v1575_v41, %v1574_v40  ;;  %v3541_v59 = vpack.c.bf16 %v1581_v58, %v1580_v57 }
 0x18d   : > { %3222 = vmatmul.mubr.msk.f32.vlgmr.msra.gmra.mrb[0].mxu1 %vm1037_vm5, %v1288_v2  ;;  %v1566_v2 = vld [vmem:[%s4720_s5 + $0x40] sm:$0xff] }
 0x18e   : > { %3508 = vmatpush1.bf16.msra.mxu1 %v3507_v63  ;;  %1483 = vmatprep.mubr.f32.mxu1 %v3910_v0  ;;  %v1582_v63 = vld [vmem:[%s4720_s5 + $0xc0] sm:$0xff] }
 0x18f   : > { %3510 = vmatprep.subr.bf16.mxu1 %v3509_v39  ;;  %3530 = vmatprep.subr.bf16.mxu0 %v3529_v51  ;;  %v1583_v39 = vld [vmem:[%s4720_s5 + $0xc8] sm:$0xff] }
 0x190   : > { %1932 = vrot.lane.b32.xlu1 %v4161_v61, %s3912_s26  ;;  %v1559_v61 = vld [vmem:[%s4720_s5 + $0x8] sm:$0xff]  ;;  %v3545_v1 = vpack.c.bf16 %v1583_v39, %v1582_v63  ;;  %v1572_v39 = vld [vmem:[%s4720_s5 + $0x70] sm:$0xff] }
 0x191   : > { %v3531_v44 = vpack.c.bf16 %v1559_v61, %v1558_v42 }
 0x192   : > { %3512 = vmatpush1.bf16.msra.mxu1 %v3511_v5  ;;  %v1585_v5 = vld [vmem:[%s4720_s5 + $0xd8] sm:$0xff] }
 0x193   : > { %3514 = vmatprep.subr.bf16.mxu1 %v3513_v6  ;;  %3532 = vmatpush3.bf16.msra.mxu0 %v3531_v44  ;;  %v3547_v6 = vpack.c.bf16 %v1567_v3, %v1566_v2  ;;  %v3549_v7 = vpack.c.bf16 %v1585_v5, %v1584_v4  ;;  %v3225_v3 = vld [vmem:[%s4716_s1 + $0x48] sm:$0xff]  ;;  %v3227_v4 = vld [vmem:[%s4716_s1 + $0x58] sm:$0xff] }
 0x194   : > { %2051 = vrot.lane.b32.xlu1 %v4188_v8, %s3912_s26  ;;  %v1576_v8 = vld [vmem:[%s4720_s5 + $0x90] sm:$0xff]  ;;  %v3561_v5 = vpack.c.bf16 %v3227_v4, %v3225_v3 }
 0x195   : > { %v3533_v45 = vpack.c.bf16 %v1577_v43, %v1576_v8 }
 0x196   : > { %3516 = vmatpush1.bf16.msra.mxu1 %v3515_v15  ;;  %v1587_v15 = vld [vmem:[%s4720_s5 + $0xe8] sm:$0xff] }
 0x197   : > { %3518 = vmatprep.subr.bf16.mxu1 %v3517_v16  ;;  %3534 = vmatprep.subr.bf16.mxu0 %v3533_v45  ;;  %v3551_v16 = vpack.c.bf16 %v1569_v11, %v1568_v9  ;;  %v3553_v17 = vpack.c.bf16 %v1587_v15, %v1586_v13  ;;  %v1695_v11 = vld [vmem:[%s4045_s21 + $0x1] sm:$0xff]  ;;  %v3862_v15 = vld [vmem:[%s4045_s21 + $0x10] sm:$0xff] }
 0x198   : > { %2170 = vrot.lane.b32.xlu1 %v4201_v12, %s3912_s26  ;;  %v1561_v12 = vld [vmem:[%s4720_s5 + $0x18] sm:$0xff]  ;;  %v1684_v13 = vld [vmem:[%s4045_s21] sm:$0xff] }
 0x199   : > { %v3535_v50 = vpack.c.bf16 %v1561_v12, %v1560_v46 }
 0x19a   : > { %3520 = vmatpush1.bf16.msra.mxu1 %v3519_v21  ;;  %v1589_v21 = vld [vmem:[%s4720_s5 + $0xf8] sm:$0xff] }
 0x19b   : > { %3522 = vmatprep.subr.bf16.mxu1 %v3521_v22  ;;  %3536 = vmatpush3.bf16.msra.mxu0 %v3535_v50  ;;  %v3555_v22 = vpack.c.bf16 %v1571_v19, %v1570_v18  ;;  %v3557_v23 = vpack.c.bf16 %v1589_v21, %v1588_v20  ;;  %v3865_v18 = vld [vmem:[%s4045_s21 + $0x13] sm:$0xff]  ;;  %v3224_v20 = vld [vmem:[%s4716_s1 + $0x40] sm:$0xff] }
 0x19c   : > { %2174 = vrot.lane.b32.xlu1 %v4210_v14, %s3912_s26  ;;  %v3539_v14 = vpack.c.bf16 %v1563_v56, %v1562_v54  ;;  %3538 = vmatprep.subr.bf16.mxu0 %v3537_v53  ;;  %v3866_v19 = vld [vmem:[%s4045_s21 + $0xc] sm:$0xff] }
 0x19d   : > { %v3226_v21 = vld [vmem:[%s4716_s1 + $0x50] sm:$0xff] }
 0x19e   : > { %3524 = vmatpush1.bf16.msra.mxu1 %v3523_v27  ;;  %v1501_v27 = vrot.slane %v1492_v24, %v4221_v37  ;;  %v3231_v24 = vld [vmem:[%s4716_s1 + $0x78] sm:$0xf] }
 0x19f   : > { %3526 = vmatprep.subr.bf16.mxu1 %v3525_v28  ;;  %3540 = vmatpush3.bf16.msra.mxu0 %v3539_v14 }
 0x1a0   : > { %3542 = vmatprep.subr.bf16.mxu0 %v3541_v59 }
 0x1a2   : > { %3528 = vmatpush1.bf16.msra.mxu1 %v3527_v31 }
 0x1a3   : > { %3544 = vmatpush3.bf16.msra.mxu0 %v3543_v55  ;;  %v1573_v55 = vld [vmem:[%s4720_s5 + $0x78] sm:$0xff] }
 0x1a4   : > { %3546 = vmatprep.subr.bf16.mxu0 %v3545_v1  ;;  %v3559_v2 = vpack.c.bf16 %v1573_v55, %v1572_v39  ;;  %v3248_v39 = vld [vmem:[%s4716_s1 + $0xb0] sm:$0xf]  ;;  %v3256_v55 = vld [vmem:[%s4716_s1 + $0xc8] sm:$0xff] }
 0x1a5   : > { %3223 = vmatmul.mubr.msk.f32.vlgmr.msra.gmra.mrb[0].mxu1 %vm1037_vm5, %v1390_v32 }
 0x1a6   : > { %2520 = vmatprep.mubr.f32.mxu1 %v3910_v0 }
 0x1a7   : > { %3548 = vmatpush3.bf16.msra.mxu0 %v3547_v6 }
 0x1a8   : > { %3550 = vmatprep.subr.bf16.mxu0 %v3549_v7 }
 0x1ab   : > { %3552 = vmatpush3.bf16.msra.mxu0 %v3551_v16  ;;  %v3863_v16 = vld [vmem:[%s4045_s21 + $0xa] sm:$0xff] }
 0x1ac   : > { %3554 = vmatprep.subr.bf16.mxu0 %v3553_v17  ;;  %v3864_v17 = vld [vmem:[%s4045_s21 + $0x3] sm:$0xff] }
 0x1af   : > { %3556 = vmatpush3.bf16.msra.mxu0 %v3555_v22 }
 0x1b0   : > { %3558 = vmatprep.subr.bf16.mxu0 %v3557_v23  ;;  %v3229_v23 = vld [vmem:[%s4716_s1 + $0x68] sm:$0xff] }
 0x1b3   : > { %3560 = vmatpush3.bf16.msra.mxu0 %v3559_v2 }
 0x1b4   : > { %3562 = vmatprep.subr.bf16.mxu0 %v3561_v5 }
 0x239   : > { %v1107_v49 = vpop.f32.mrb[6].mxu0 }
 0x23a   : > { %v1109_v52 = vpop.f32.mrb[7].mxu0 }
 0x278   : > { %v1485_v26 = vpop.f32.mrb[0].mxu1 }
 0x279   : > { %v3763_v28 = vadd.f32 %v1485_v26, %v1107_v49  ;;  %v1487_v29 = vpop.f32.mrb[1].mxu1 }
 0x27a   : > { %v3764_v30 = vadd.f32 %v1487_v29, %v1109_v52  ;;  %v3563_v29 = vpack.c.bf16 %v3226_v21, %v3224_v20  ;;  %v3271_v20 = vld [vmem:[%s4716_s1 + $0x118] sm:$0xff] }
 0x27b   : > { %v1504_v31 = vadd.f32 %v3763_v28, %v1497_v25 }
 0x27c   : > { %v1505_v32 = vadd.f32 %v3764_v30, %v1501_v27 }
 0x27d   : > { %v1506_v34 = vmax.f32 %v1504_v31, 0.0 }
 0x27e   : > { %v1507_v36 = vmax.f32 %v1505_v32, 0.0  ;;  %v3565_v32 = vpack.c.bf16 %v3231_v24, %v3229_v23 }
 0x27f   : > { %1508 = vst [vmem:[#allocation4] sm:$0xff] %v1506_v34  ;;  %v3228_v34 = vld [vmem:[%s4716_s1 + $0x60] sm:$0xff] }
 0x280   : > { %1509 = vst [vmem:[#allocation4 + $0x8] sm:$0xff] %v1507_v36  ;;  %v3230_v36 = vld [vmem:[%s4716_s1 + $0x70] sm:$0xf] }
 0x286   : > { %v1510_v38 = vld [vmem:[#allocation4] ss:$0 sm:$0xff]  ;;  %v1513_v40 = vld [vmem:[#allocation4 + $0x1] ss:$0 sm:$0xff]  ;;  %v1519_v41 = vld [vmem:[#allocation4 + $0x2] ss:$0 sm:$0xff] }
 0x287   : > { %v1522_v42 = vld [vmem:[#allocation4 + $0x3] ss:$0 sm:$0xff]  ;;  %v1527_v51 = vld [vmem:[#allocation4 + $0x4] ss:$0 sm:$0xff]  ;;  %v1530_v61 = vld [vmem:[#allocation4 + $0x5] ss:$0 sm:$0xff] }
 0x288   : > { %v1535_v8 = vld [vmem:[#allocation4 + $0x6] ss:$0 sm:$0xff]  ;;  %v1538_v43 = vld [vmem:[#allocation4 + $0x7] ss:$0 sm:$0xff]  ;;  %v1511_v44 = vld [vmem:[#allocation4 + $0x8] ss:$0 sm:$0xff] }
 0x289   : > { %v1512_v45 = vmax.f32 %v1510_v38, %v1511_v44  ;;  %v1514_v46 = vld [vmem:[#allocation4 + $0x9] ss:$0 sm:$0xff]  ;;  %v1520_v12 = vld [vmem:[#allocation4 + $0xa] ss:$0 sm:$0xff]  ;;  %v1523_v47 = vld [vmem:[#allocation4 + $0xb] ss:$0 sm:$0xff] }
 0x28a   : > { %v1515_v48 = vmax.f32 %v1513_v40, %v1514_v46  ;;  %v1521_v49 = vmax.f32 %v1519_v41, %v1520_v12  ;;  %v1524_v50 = vmax.f32 %v1522_v42, %v1523_v47  ;;  %v1528_v52 = vld [vmem:[#allocation4 + $0xc] ss:$0 sm:$0xff]  ;;  %v1531_v53 = vld [vmem:[#allocation4 + $0xd] ss:$0 sm:$0xff]  ;;  %v1536_v54 = vld [vmem:[#allocation4 + $0xe] ss:$0 sm:$0xff]  ;;  %v3568_v41 = vpack.c.bf16 %v3230_v36, %v3228_v34 }
 0x28b   : > { %v1529_v56 = vmax.f32 %v1527_v51, %v1528_v52  ;;  %v1532_v57 = vmax.f32 %v1530_v61, %v1531_v53  ;;  %v1537_v58 = vmax.f32 %v1535_v8, %v1536_v54  ;;  %v1539_v14 = vld [vmem:[#allocation4 + $0xf] ss:$0 sm:$0xff]  ;;  %v1690_v40 = vld [vmem:[%s4716_s1 + $0x18] sm:$0xff]  ;;  %v1687_v51 = vld [vmem:[%s4716_s1] sm:$0xff] }
 0x28c   : > { %v1516_v59 = vmax.f32 %v1512_v45, %v1515_v48  ;;  %v1540_v60 = vmax.f32 %v1538_v43, %v1539_v14  ;;  %v1525_v62 = vmax.f32 %v1521_v49, %v1524_v50  ;;  %v1688_v38 = vld [vmem:[%s4716_s1 + $0x8] sm:$0xff]  ;;  %v1689_v61 = vld [vmem:[%s4716_s1 + $0x10] sm:$0xff]  ;;  %v1694_v43 = vld [vmem:[%s4716_s1 + $0x38] sm:$0xf]  ;;  %v1712_v48 = vpop.permute.xlu1 %1711 }
 0x28d   : > { %v1533_v63 = vmax.f32 %v1529_v56, %v1532_v57  ;;  %v3571_v42 = vpack.c.bf16 %v1690_v40, %v1688_v38  ;;  %v1692_v8 = vld [vmem:[%s4716_s1 + $0x28] sm:$0xff]  ;;  %v3573_v45 = vpack.c.bf16 %v1689_v61, %v1687_v51  ;;  %v1691_v12 = vld [vmem:[%s4716_s1 + $0x20] sm:$0xff]  ;;  %v1693_v47 = vld [vmem:[%s4716_s1 + $0x30] sm:$0xf] }
 0x28e   : > { %1526 = vst.msk [vmem:[#allocation5 + $0x1] sm:$0x1] %vm1517_vm6, %v1525_v62  ;;  %v1541_v1 = vmax.f32 %v1537_v58, %v1540_v60  ;;  %1518 = vst.msk [vmem:[#allocation5] sm:$0x1] %vm1517_vm6, %v1516_v59  ;;  %v3575_v46 = vpack.c.bf16 %v1694_v43, %v1692_v8  ;;  %v3243_v49 = vld [vmem:[%s4716_s1 + $0x88] sm:$0xff]  ;;  %v3245_v50 = vld [vmem:[%s4716_s1 + $0x98] sm:$0xff]  ;;  %v3578_v52 = vpack.c.bf16 %v1693_v47, %v1691_v12 }
 0x28f   : > { %1534 = vst.msk [vmem:[#allocation5 + $0x2] sm:$0x1] %vm1517_vm6, %v1533_v63  ;;  %v3581_v53 = vpack.c.bf16 %v3245_v50, %v3243_v49  ;;  %v3242_v56 = vld [vmem:[%s4716_s1 + $0x80] sm:$0xff]  ;;  %v3244_v57 = vld [vmem:[%s4716_s1 + $0x90] sm:$0xff]  ;;  %v3247_v58 = vld [vmem:[%s4716_s1 + $0xa8] sm:$0xff] }
 0x290   : > { %1542 = vst.msk [vmem:[#allocation5 + $0x3] sm:$0x1] %vm1517_vm6, %v1541_v1  ;;  %v1714_v54 = vpop.permute.xlu1 %1713  ;;  %v3249_v14 = vld [vmem:[%s4716_s1 + $0xb8] sm:$0xf]  ;;  %v3583_v60 = vpack.c.bf16 %v3244_v57, %v3242_v56  ;;  %v3246_v63 = vld [vmem:[%s4716_s1 + $0xa0] sm:$0xff]  ;;  %v2436_v12 = vld [vmem:[#allocation6 + $0xf8] sm:$0xff] }
 0x291   : > { %v3585_v62 = vpack.c.bf16 %v3249_v14, %v3247_v58  ;;  %v3258_v1 = vld [vmem:[%s4716_s1 + $0xd8] sm:$0xff]  ;;  %v3588_v3 = vpack.c.bf16 %v3248_v39, %v3246_v63  ;;  %v3274_v34 = vld [vmem:[%s4716_s1 + $0x130] sm:$0xf]  ;;  %v2435_v49 = vld [vmem:[#allocation6 + $0xf0] sm:$0xff] }
 0x292   : > { %v3591_v4 = vpack.c.bf16 %v3258_v1, %v3256_v55  ;;  %v2430_v61 = vld [vmem:[#allocation6 + $0xc8] sm:$0xff]  ;;  %v2429_v43 = vld [vmem:[#allocation6 + $0xc0] sm:$0xff]  ;;  %v2439_v57 = vld [vmem:[#allocation6 + $0x110] sm:$0xff] }
 0x293   : > { %v3611_v8 = vpack.c.bf16 %v2432_v10, %v2430_v61  ;;  %v2442_v58 = vld [vmem:[#allocation6 + $0x128] sm:$0xff]  ;;  %v2444_v14 = vld [vmem:[#allocation6 + $0x138] sm:$0xff]  ;;  %v2443_v63 = vld [vmem:[#allocation6 + $0x130] sm:$0xff] }
 0x294   : > { %v1816_v2 = vpop.permute.xlu1 %1815  ;;  %v2446_v39 = vld [vmem:[#allocation6 + $0x148] sm:$0xff]  ;;  %v2448_v55 = vld [vmem:[#allocation6 + $0x158] sm:$0xff] }
 0x295   : > { %v1544_v6 = vld [vmem:[#allocation5 + $0x1] sm:$0x1]  ;;  %v1543_v28 = vld [vmem:[#allocation5] sm:$0x1]  ;;  %3612 = vmatprep.subr.bf16.mxu1 %v3611_v8 }
 0x296   : > { %v1545_v27 = vld [vmem:[#allocation5 + $0x2] sm:$0x1] }
 0x297   : > { %v1546_v7 = vld [vmem:[#allocation5 + $0x3] sm:$0x1] }
 0x298   : > { %v3852_v9 = vpack.i.bf16 %v1544_v6, %v1546_v7  ;;  %v3255_v6 = vld [vmem:[%s4716_s1 + $0xc0] sm:$0xff]  ;;  %v3257_v7 = vld [vmem:[%s4716_s1 + $0xd0] sm:$0xff] }
 0x29a   : > { %3853 = vrot.lane.b32.xlu0 %v3852_v9, %s3913_s17  ;;  %v3260_v9 = vld [vmem:[%s4716_s1 + $0xe8] sm:$0xff] }
 0x29e   : > { %1709 = vrot.lane.b32.xlu0 %v1695_v11, %s3912_s26  ;;  %v3262_v11 = vld [vmem:[%s4716_s1 + $0xf8] sm:$0xf] }
 0x2a2   : > { %1813 = vrot.lane.b32.xlu0 %v1684_v13, %s3912_s26  ;;  %v1929_v13 = vpop.permute.xlu1 %1928 }
 0x2a6   : > { %1817 = vrot.lane.b32.xlu0 %v3862_v15, %s3912_s26  ;;  %v3593_v15 = vpack.c.bf16 %v3257_v7, %v3255_v6  ;;  %v1933_v24 = vpop.permute.xlu1 %1932  ;;  %v2452_v6 = vld [vmem:[#allocation6 + $0x178] sm:$0xff] }
 0x2aa   : > { %1930 = vrot.lane.b32.xlu0 %v3863_v16, %s3912_s26  ;;  %v3595_v16 = vpack.c.bf16 %v3262_v11, %v3260_v9  ;;  %v2052_v36 = vpop.permute.xlu1 %2051  ;;  %v2449_v11 = vld [vmem:[#allocation6 + $0x160] sm:$0xff] }
 0x2ae   : > { %2049 = vrot.lane.b32.xlu0 %v3864_v17, %s3912_s26  ;;  %v3259_v17 = vld [vmem:[%s4716_s1 + $0xe0] sm:$0xff] }
 0x2b2   : > { %2053 = vrot.lane.b32.xlu0 %v3865_v18, %s3912_s26  ;;  %v3261_v18 = vld [vmem:[%s4716_s1 + $0xf0] sm:$0xf] }
 0x2b6   : > { %2172 = vrot.lane.b32.xlu0 %v3866_v19, %s3912_s26  ;;  %v3269_v19 = vld [vmem:[%s4716_s1 + $0x108] sm:$0xff]  ;;  %s289_s26 = scalar_lea.vmem %s4722_s7, %s4733_s25 }
 0x2b7   : > { %v3601_v23 = vpack.c.bf16 %v3271_v20, %v3269_v19 }
 0x30c   : > { %v3854_v22 = vpop.permute.xlu0 %3853 }
 0x30d   : > { %v3856_v25 = vunpack.i.h.bf16 %v3854_v22  ;;  %v3855_v26 = vunpack.i.l.bf16 %v3854_v22  ;;  %v3598_v22 = vpack.c.bf16 %v3261_v18, %v3259_v17 }
 0x30f   : > { %v1557_v30 = vsel %vm1555_vm7, %v1545_v27, %v3855_v26  ;;  %v1556_v31 = vsel %vm1555_vm7, %v1543_v28, %v3856_v25  ;;  %v3268_v25 = vld [vmem:[%s4716_s1 + $0x100] sm:$0xff]  ;;  %v3270_v26 = vld [vmem:[%s4716_s1 + $0x110] sm:$0xff]  ;;  %v3273_v27 = vld [vmem:[%s4716_s1 + $0x128] sm:$0xff] }
 0x310   : > { %1655 = vmatprep.mubr.f32.mxu0 %v1557_v30  ;;  %v1710_v44 = vpop.permute.xlu0 %1709  ;;  %v3275_v28 = vld [vmem:[%s4716_s1 + $0x138] sm:$0xf]  ;;  %v3603_v30 = vpack.c.bf16 %v3270_v26, %v3268_v25  ;;  %v2277_v25 = vld [vmem:[%s4717_s2] sm:$0x3] }
 0x311   : > { %1656 = vmatmul.mubr.f32.vlgmr.msra.gmra.mrb[8].mxu0 %v1556_v31  ;;  %v3605_v31 = vpack.c.bf16 %v3275_v28, %v3273_v27  ;;  %v2282_v26 = vrot.slane %v2277_v25, %v4216_v35  ;;  %v2286_v27 = vrot.slane %v2277_v25, %v4221_v37 }
 0x312   : > { %3564 = vmatpush1.bf16.msra.mxu0 %v3563_v29  ;;  %1791 = vmatprep.mubr.f32.mxu0 %v3910_v0 }
 0x313   : > { %3567 = vmatprep.subr.msk.bf16.mxu0 %vm4023_vm2, %v3565_v32  ;;  %v3272_v32 = vld [vmem:[%s4716_s1 + $0x120] sm:$0xff] }
 0x314   : > { %v1814_v59 = vpop.permute.xlu0 %1813  ;;  %v3608_v38 = vpack.c.bf16 %v3274_v34, %v3272_v32 }
 0x316   : > { %3570 = vmatpush1.bf16.msk.msra.mxu0 %vm4023_vm2, %v3568_v41  ;;  %v2171_v41 = vpop.permute.xlu1 %2170 }
 0x317   : > { %3572 = vmatprep.subr.bf16.mxu0 %v3571_v42 }
 0x318   : > { %v1818_v5 = vpop.permute.xlu0 %1817 }
 0x319   : > { %3234 = vmatmul.mubr.msk.f32.vlgmr.msra.gmra.mrb[10].mxu0 %vm313_vm3, %v1710_v44  ;;  %v2431_v44 = vld [vmem:[#allocation6 + $0xd0] sm:$0xff] }
 0x31a   : > { %3574 = vmatpush1.bf16.msra.mxu0 %v3573_v45  ;;  %1797 = vmatprep.mubr.f32.mxu0 %v3910_v0  ;;  %v2175_v51 = vpop.permute.xlu1 %2174  ;;  %v3613_v45 = vpack.c.bf16 %v2431_v44, %v2429_v43 }
 0x31b   : > { %3577 = vmatprep.subr.msk.bf16.mxu0 %vm4023_vm2, %v3575_v46  ;;  %v2434_v46 = vld [vmem:[#allocation6 + $0xe8] sm:$0xff] }
 0x31c   : > { %v1931_v21 = vpop.permute.xlu0 %1930  ;;  %3614 = vmatpush1.bf16.msra.mxu1 %v3613_v45  ;;  %v3615_v47 = vpack.c.bf16 %v2436_v12, %v2434_v46 }
 0x31d   : > { %3235 = vmatmul.mubr.msk.f32.gmra.mrb[12].mxu0 %vm313_vm3, %v1712_v48  ;;  %v2433_v48 = vld [vmem:[#allocation6 + $0xe0] sm:$0xff] }
 0x31e   : > { %1803 = vmatprep.mubr.f32.mxu0 %v3910_v0  ;;  %3580 = vmatpush1.bf16.msk.msra.mxu0 %vm4023_vm2, %v3578_v52  ;;  %v3617_v50 = vpack.c.bf16 %v2435_v49, %v2433_v48  ;;  %v2438_v52 = vld [vmem:[#allocation6 + $0x108] sm:$0xff] }
 0x31f   : > { %3582 = vmatprep.subr.bf16.mxu0 %v3581_v53  ;;  %v2440_v53 = vld [vmem:[#allocation6 + $0x118] sm:$0xff]  ;;  %3616 = vmatprep.subr.bf16.mxu1 %v3615_v47 }
 0x320   : > { %v2050_v29 = vpop.permute.xlu0 %2049  ;;  %v3619_v56 = vpack.c.bf16 %v2440_v53, %v2438_v52  ;;  %3618 = vmatpush1.bf16.msra.mxu1 %v3617_v50 }
 0x321   : > { %3236 = vmatmul.mubr.msk.f32.gmra.mrb[14].mxu0 %vm313_vm3, %v1714_v54  ;;  %v2437_v54 = vld [vmem:[#allocation6 + $0x100] sm:$0xff] }
 0x322   : > { %1895 = vmatprep.mubr.f32.mxu0 %v3910_v0  ;;  %3620 = vmatprep.subr.bf16.mxu1 %v3619_v56 }
 0x324   : > { %v2054_v40 = vpop.permute.xlu0 %2053 }
 0x325   : > { %3239 = vmatmul.mubr.msk.f32.vlgmr.msra.gmra.mrb[10].mxu0 %vm313_vm3, %v1814_v59  ;;  %v3621_v59 = vpack.c.bf16 %v2439_v57, %v2437_v54 }
 0x326   : > { %3584 = vmatpush1.bf16.msra.mxu0 %v3583_v60  ;;  %1901 = vmatprep.mubr.f32.mxu0 %v3910_v0  ;;  %v3623_v60 = vpack.c.bf16 %v2444_v14, %v2442_v58 }
 0x327   : > { %3587 = vmatprep.subr.msk.bf16.mxu0 %vm4023_vm2, %v3585_v62  ;;  %v2441_v62 = vld [vmem:[#allocation6 + $0x120] sm:$0xff]  ;;  %3622 = vmatpush1.bf16.msra.mxu1 %v3621_v59 }
 0x328   : > { %v2173_v42 = vpop.permute.xlu0 %2172  ;;  %v3625_v1 = vpack.c.bf16 %v2443_v63, %v2441_v62  ;;  %3624 = vmatprep.subr.bf16.mxu1 %v3623_v60 }
 0x329   : > { %3240 = vmatmul.mubr.msk.f32.gmra.mrb[12].mxu0 %vm313_vm3, %v1816_v2  ;;  %v3627_v2 = vpack.c.bf16 %v2448_v55, %v2446_v39 }
 0x32a   : > { %1907 = vmatprep.mubr.f32.mxu0 %v3910_v0  ;;  %3590 = vmatpush1.bf16.msk.msra.mxu0 %vm4023_vm2, %v3588_v3  ;;  %v2445_v3 = vld [vmem:[#allocation6 + $0x140] sm:$0xff] }
 0x32b   : > { %3592 = vmatprep.subr.bf16.mxu0 %v3591_v4  ;;  %v2447_v4 = vld [vmem:[#allocation6 + $0x150] sm:$0xff]  ;;  %3626 = vmatpush1.bf16.msra.mxu1 %v3625_v1 }
 0x32c   : > { %v3629_v7 = vpack.c.bf16 %v2447_v4, %v2445_v3  ;;  %3628 = vmatprep.subr.bf16.mxu1 %v3627_v2 }
 0x32d   : > { %3241 = vmatmul.mubr.msk.f32.gmra.mrb[14].mxu0 %vm313_vm3, %v1818_v5  ;;  %v2450_v5 = vld [vmem:[#allocation6 + $0x168] sm:$0xff] }
 0x32e   : > { %2010 = vmatprep.mubr.f32.mxu0 %v3910_v0  ;;  %v3631_v9 = vpack.c.bf16 %v2452_v6, %v2450_v5 }
 0x32f   : > { %3630 = vmatpush1.bf16.msra.mxu1 %v3629_v7 }
 0x330   : > { %3632 = vmatprep.subr.bf16.mxu1 %v3631_v9 }
 0x331   : > { %3252 = vmatmul.mubr.msk.f32.vlgmr.msra.gmra.mrb[10].mxu0 %vm313_vm3, %v1929_v13  ;;  %v2451_v13 = vld [vmem:[#allocation6 + $0x170] sm:$0xff] }
 0x332   : > { %3594 = vmatpush1.bf16.msra.mxu0 %v3593_v15  ;;  %2016 = vmatprep.mubr.f32.mxu0 %v3910_v0  ;;  %v2405_v15 = vld [vmem:[#allocation6 + $0x8] sm:$0xff]  ;;  %v3633_v17 = vpack.c.bf16 %v2451_v13, %v2449_v11 }
 0x333   : > { %3597 = vmatprep.subr.msk.bf16.mxu0 %vm4023_vm2, %v3595_v16  ;;  %v2407_v16 = vld [vmem:[#allocation6 + $0x18] sm:$0xff] }
 0x334   : > { %v3635_v18 = vpack.c.bf16 %v2407_v16, %v2405_v15  ;;  %3634 = vmatpush1.bf16.msra.mxu1 %v3633_v17 }
 0x335   : > { %3253 = vmatmul.mubr.msk.f32.gmra.mrb[12].mxu0 %vm313_vm3, %v1931_v21  ;;  %v1590_v21 = vld [vmem:[%s4721_s6] sm:$0x1] }
 0x336   : > { %2022 = vmatprep.mubr.f32.mxu0 %v3910_v0  ;;  %3600 = vmatpush1.bf16.msk.msra.mxu0 %vm4023_vm2, %v3598_v22 }
 0x337   : > { %3602 = vmatprep.subr.bf16.mxu0 %v3601_v23  ;;  %3636 = vmatprep.subr.bf16.mxu1 %v3635_v18 }
 0x339   : > { %3254 = vmatmul.mubr.msk.f32.gmra.mrb[14].mxu0 %vm313_vm3, %v1933_v24 }
 0x33a   : > { %2131 = vmatprep.mubr.f32.mxu0 %v3910_v0 }
 0x33d   : > { %3265 = vmatmul.mubr.msk.f32.vlgmr.msra.gmra.mrb[10].mxu0 %vm313_vm3, %v2050_v29 }
 0x33e   : > { %3604 = vmatpush1.bf16.msra.mxu0 %v3603_v30  ;;  %2137 = vmatprep.mubr.f32.mxu0 %v3910_v0 }
 0x33f   : > { %3607 = vmatprep.subr.msk.bf16.mxu0 %vm4023_vm2, %v3605_v31 }
 0x341   : > { %3266 = vmatmul.mubr.msk.f32.gmra.mrb[12].mxu0 %vm313_vm3, %v2052_v36 }
 0x342   : > { %2143 = vmatprep.mubr.f32.mxu0 %v3910_v0  ;;  %3610 = vmatpush1.bf16.msk.msra.mxu0 %vm4023_vm2, %v3608_v38 }
 0x345   : > { %3267 = vmatmul.mubr.msk.f32.gmra.mrb[14].mxu0 %vm313_vm3, %v2054_v40 }
 0x346   : > { %2252 = vmatprep.mubr.f32.mxu0 %v3910_v0 }
 0x349   : > { %3278 = vmatmul.mubr.msk.f32.vlgmr.msra.gmra.mrb[10].mxu0 %vm313_vm3, %v2171_v41 }
 0x34a   : > { %2258 = vmatprep.mubr.f32.mxu0 %v3910_v0 }
 0x34d   : > { %3279 = vmatmul.mubr.msk.f32.gmra.mrb[12].mxu0 %vm313_vm3, %v2173_v42 }
 0x34e   : > { %2264 = vmatprep.mubr.f32.mxu0 %v3910_v0 }
 0x351   : > { %3280 = vmatmul.mubr.msk.f32.gmra.mrb[14].mxu0 %vm313_vm3, %v2175_v51 }
 0x3e4   : > { %v3321_v19 = vpop.f32.mrb[8].mxu0 }
 0x3e5   : > { %v3322_v20 = vpop.f32.mrb[9].mxu0 }
 0x3e6   : > { %v3323_v22 = vadd.f32 %v3322_v20, %v3321_v19 }
 0x3e8   : > { %v4562_v23 = vadd.f32 %v3323_v22, %v1590_v21 }
 0x3ea   : > { %v1662_v24 = vsel %vm1661_vm8, %v4562_v23, -inf }
 0x3eb   : > { %1663 = vmax.xlane.f32.xlu1 %v1662_v24 }
 0x41c   : > { %v2254_v28 = vpop.f32.mrb[10].mxu0 }
 0x41d   : > { %v2289_v29 = vadd.f32 %v2282_v26, %v2254_v28  ;;  %v2256_v30 = vpop.f32.mrb[11].mxu0 }
 0x41e   : > { %v2290_v31 = vadd.f32 %v2286_v27, %v2256_v30 }
 0x41f   : > { %v2295_v32 = vmax.f32 %v2289_v29, 0.0 }
 0x420   : > { %v2296_v34 = vmax.f32 %v2290_v31, 0.0  ;;  %v2260_v36 = vpop.f32.mrb[12].mxu0 }
 0x421   : > { %2301 = vst [vmem:[#allocation2] sm:$0xff] %v2295_v32  ;;  %v2291_v38 = vadd.f32 %v2282_v26, %v2260_v36  ;;  %v2262_v40 = vpop.f32.mrb[13].mxu0 }
 0x422   : > { %2302 = vst [vmem:[#allocation2 + $0x8] sm:$0xff] %v2296_v34  ;;  %v2292_v41 = vadd.f32 %v2286_v27, %v2262_v40 }
 0x423   : > { %v2297_v42 = vmax.f32 %v2291_v38, 0.0 }
 0x424   : > { %v2298_v51 = vmax.f32 %v2292_v41, 0.0  ;;  %v2266_v61 = vpop.f32.mrb[14].mxu0 }
 0x425   : > { %2303 = vst [vmem:[#allocation2 + $0x10] sm:$0xff] %v2297_v42  ;;  %v2293_v10 = vadd.f32 %v2282_v26, %v2266_v61  ;;  %v2268_v8 = vpop.f32.mrb[15].mxu0 }
 0x426   : > { %2304 = vst [vmem:[#allocation2 + $0x18] sm:$0xff] %v2298_v51  ;;  %v2294_v43 = vadd.f32 %v2286_v27, %v2268_v8 }
 0x427   : > { %v2299_v44 = vmax.f32 %v2293_v10, 0.0 }
 0x428   : > { %v2300_v45 = vmax.f32 %v2294_v43, 0.0  ;;  %v2315_v46 = vld [vmem:[#allocation2 + $0x2] ss:$0 sm:$0xff]  ;;  %v2318_v12 = vld [vmem:[#allocation2 + $0x3] ss:$0 sm:$0xff] }
 0x429   : > { %2305 = vst [vmem:[#allocation2 + $0x20] sm:$0xff] %v2299_v44  ;;  %v2316_v47 = vld [vmem:[#allocation2 + $0xa] ss:$0 sm:$0xff]  ;;  %v2319_v48 = vld [vmem:[#allocation2 + $0xb] ss:$0 sm:$0xff] }
 0x42a   : > { %v2323_v49 = vld [vmem:[#allocation2 + $0x4] ss:$0 sm:$0xff]  ;;  %2306 = vst [vmem:[#allocation2 + $0x28] sm:$0xff] %v2300_v45  ;;  %v2317_v50 = vmax.f32 %v2315_v46, %v2316_v47  ;;  %v2320_v52 = vmax.f32 %v2318_v12, %v2319_v48  ;;  %v2324_v53 = vld [vmem:[#allocation2 + $0xc] ss:$0 sm:$0xff] }
 0x42b   : > { %v2326_v54 = vld [vmem:[#allocation2 + $0x5] ss:$0 sm:$0xff]  ;;  %v2327_v56 = vld [vmem:[#allocation2 + $0xd] ss:$0 sm:$0xff]  ;;  %v2325_v57 = vmax.f32 %v2323_v49, %v2324_v53  ;;  %v2331_v14 = vld [vmem:[#allocation2 + $0x6] ss:$0 sm:$0xff] }
 0x42c   : > { %v2328_v58 = vmax.f32 %v2326_v54, %v2327_v56  ;;  %v2332_v59 = vld [vmem:[#allocation2 + $0xe] ss:$0 sm:$0xff]  ;;  %v2334_v60 = vld [vmem:[#allocation2 + $0x7] ss:$0 sm:$0xff]  ;;  %v2321_v62 = vmax.f32 %v2317_v50, %v2320_v52  ;;  %v2335_v39 = vld [vmem:[#allocation2 + $0xf] ss:$0 sm:$0xff] }
 0x42d   : > { %v2333_v63 = vmax.f32 %v2331_v14, %v2332_v59  ;;  %v2339_v55 = vld [vmem:[#allocation2 + $0x10] ss:$0 sm:$0xff]  ;;  %v2342_v1 = vld [vmem:[#allocation2 + $0x11] ss:$0 sm:$0xff]  ;;  %v2336_v3 = vmax.f32 %v2334_v60, %v2335_v39  ;;  %v2340_v4 = vld [vmem:[#allocation2 + $0x18] ss:$0 sm:$0xff] }
 0x42e   : > { %v2329_v2 = vmax.f32 %v2325_v57, %v2328_v58  ;;  %v2343_v5 = vld [vmem:[#allocation2 + $0x19] ss:$0 sm:$0xff]  ;;  %v2347_v6 = vld [vmem:[#allocation2 + $0x12] ss:$0 sm:$0xff]  ;;  %2322 = vst.msk [vmem:[#allocation3 + $0x1] sm:$0x1] %vm896_vm4, %v2321_v62  ;;  %v2341_v7 = vmax.f32 %v2339_v55, %v2340_v4 }
 0x42f   : > { %v2344_v9 = vmax.f32 %v2342_v1, %v2343_v5  ;;  %v2348_v11 = vld [vmem:[#allocation2 + $0x1a] ss:$0 sm:$0xff]  ;;  %v2350_v13 = vld [vmem:[#allocation2 + $0x13] ss:$0 sm:$0xff]  ;;  %v2351_v15 = vld [vmem:[#allocation2 + $0x1b] ss:$0 sm:$0xff]  ;;  %v2337_v16 = vmax.f32 %v2333_v63, %v2336_v3 }
 0x430   : > { %2330 = vst.msk [vmem:[#allocation3 + $0x2] sm:$0x1] %vm896_vm4, %v2329_v2  ;;  %v2349_v17 = vmax.f32 %v2347_v6, %v2348_v11  ;;  %v2352_v18 = vmax.f32 %v2350_v13, %v2351_v15  ;;  %v2355_v19 = vld [vmem:[#allocation2 + $0x14] ss:$0 sm:$0xff]  ;;  %v2356_v20 = vld [vmem:[#allocation2 + $0x1c] ss:$0 sm:$0xff] }
 0x431   : > { %v2358_v21 = vld [vmem:[#allocation2 + $0x15] ss:$0 sm:$0xff]  ;;  %v2345_v22 = vmax.f32 %v2341_v7, %v2344_v9  ;;  %v2357_v24 = vmax.f32 %v2355_v19, %v2356_v20  ;;  %v2359_v25 = vld [vmem:[#allocation2 + $0x1d] ss:$0 sm:$0xff]  ;;  %v2363_v26 = vld [vmem:[#allocation2 + $0x16] ss:$0 sm:$0xff] }
 0x432   : > { %v2364_v27 = vld [vmem:[#allocation2 + $0x1e] ss:$0 sm:$0xff]  ;;  %2338 = vst.msk [vmem:[#allocation3 + $0x3] sm:$0x1] %vm896_vm4, %v2337_v16  ;;  %v2353_v28 = vmax.f32 %v2349_v17, %v2352_v18  ;;  %v2360_v29 = vmax.f32 %v2358_v21, %v2359_v25  ;;  %v2366_v31 = vld [vmem:[#allocation2 + $0x17] ss:$0 sm:$0xff] }
 0x433   : > { %v2365_v30 = vmax.f32 %v2363_v26, %v2364_v27  ;;  %v2367_v32 = vld [vmem:[#allocation2 + $0x1f] ss:$0 sm:$0xff]  ;;  %v2371_v34 = vld [vmem:[#allocation2 + $0x20] ss:$0 sm:$0xff]  ;;  %2346 = vst.msk [vmem:[#allocation3 + $0x4] sm:$0x1] %vm896_vm4, %v2345_v22 }
 0x434   : > { %v2368_v36 = vmax.f32 %v2366_v31, %v2367_v32  ;;  %v2372_v38 = vld [vmem:[#allocation2 + $0x28] ss:$0 sm:$0xff]  ;;  %v2374_v40 = vld [vmem:[#allocation2 + $0x21] ss:$0 sm:$0xff]  ;;  %v2375_v41 = vld [vmem:[#allocation2 + $0x29] ss:$0 sm:$0xff]  ;;  %v2361_v42 = vmax.f32 %v2357_v24, %v2360_v29 }
 0x435   : > { %2354 = vst.msk [vmem:[#allocation3 + $0x5] sm:$0x1] %vm896_vm4, %v2353_v28  ;;  %v2373_v51 = vmax.f32 %v2371_v34, %v2372_v38  ;;  %v2376_v61 = vmax.f32 %v2374_v40, %v2375_v41  ;;  %v2307_v10 = vld [vmem:[#allocation2] ss:$0 sm:$0xff]  ;;  %v2308_v8 = vld [vmem:[#allocation2 + $0x8] ss:$0 sm:$0xff] }
 0x436   : > { %v2310_v43 = vld [vmem:[#allocation2 + $0x1] ss:$0 sm:$0xff]  ;;  %v2369_v44 = vmax.f32 %v2365_v30, %v2368_v36  ;;  %v2309_v45 = vmax.f32 %v2307_v10, %v2308_v8  ;;  %v2311_v46 = vld [vmem:[#allocation2 + $0x9] ss:$0 sm:$0xff]  ;;  %v2379_v12 = vld [vmem:[#allocation2 + $0x22] ss:$0 sm:$0xff] }
 0x437   : > { %v2380_v47 = vld [vmem:[#allocation2 + $0x2a] ss:$0 sm:$0xff]  ;;  %2362 = vst.msk [vmem:[#allocation3 + $0x6] sm:$0x1] %vm896_vm4, %v2361_v42  ;;  %v2377_v48 = vmax.f32 %v2373_v51, %v2376_v61  ;;  %v2312_v49 = vmax.f32 %v2310_v43, %v2311_v46  ;;  %v2382_v52 = vld [vmem:[#allocation2 + $0x23] ss:$0 sm:$0xff] }
 0x438   : > { %v2381_v50 = vmax.f32 %v2379_v12, %v2380_v47  ;;  %v2383_v53 = vld [vmem:[#allocation2 + $0x2b] ss:$0 sm:$0xff]  ;;  %v2387_v54 = vld [vmem:[#allocation2 + $0x24] ss:$0 sm:$0xff]  ;;  %2370 = vst.msk [vmem:[#allocation3 + $0x7] sm:$0x1] %vm896_vm4, %v2369_v44 }
 0x439   : > { %v2384_v56 = vmax.f32 %v2382_v52, %v2383_v53  ;;  %v2388_v57 = vld [vmem:[#allocation2 + $0x2c] ss:$0 sm:$0xff]  ;;  %v2390_v58 = vld [vmem:[#allocation2 + $0x25] ss:$0 sm:$0xff]  ;;  %v2391_v14 = vld [vmem:[#allocation2 + $0x2d] ss:$0 sm:$0xff]  ;;  %v2313_v59 = vmax.f32 %v2309_v45, %v2312_v49 }
 0x43a   : > { %2378 = vst.msk [vmem:[#allocation3 + $0x8] sm:$0x1] %vm896_vm4, %v2377_v48  ;;  %v2389_v60 = vmax.f32 %v2387_v54, %v2388_v57  ;;  %v2392_v62 = vmax.f32 %v2390_v58, %v2391_v14  ;;  %v2395_v63 = vld [vmem:[#allocation2 + $0x26] ss:$0 sm:$0xff]  ;;  %v2396_v39 = vld [vmem:[#allocation2 + $0x2e] ss:$0 sm:$0xff] }
 0x43b   : > { %v2398_v55 = vld [vmem:[#allocation2 + $0x27] ss:$0 sm:$0xff]  ;;  %v2385_v1 = vmax.f32 %v2381_v50, %v2384_v56  ;;  %v2397_v2 = vmax.f32 %v2395_v63, %v2396_v39  ;;  %v2399_v3 = vld [vmem:[#allocation2 + $0x2f] ss:$0 sm:$0xff]  ;;  %v2404_v4 = vld [vmem:[#allocation6] sm:$0xff] }
 0x43c   : > { %v2406_v5 = vld [vmem:[#allocation6 + $0x10] sm:$0xff]  ;;  %2314 = vst.msk [vmem:[#allocation3] sm:$0x1] %vm896_vm4, %v2313_v59  ;;  %v2393_v6 = vmax.f32 %v2389_v60, %v2392_v62  ;;  %v2400_v7 = vmax.f32 %v2398_v55, %v2399_v3  ;;  %v2409_v9 = vld [vmem:[#allocation6 + $0x28] sm:$0xff]  ;;  %v2411_v11 = vld [vmem:[#allocation6 + $0x38] sm:$0xff] }
 0x43d   : > { %2386 = vst.msk [vmem:[#allocation3 + $0x9] sm:$0x1] %vm896_vm4, %v2385_v1  ;;  %v3637_v15 = vpack.c.bf16 %v2406_v5, %v2404_v4  ;;  %v3639_v16 = vpack.c.bf16 %v2411_v11, %v2409_v9  ;;  %v2408_v17 = vld [vmem:[#allocation6 + $0x20] sm:$0xff]  ;;  %v2410_v18 = vld [vmem:[#allocation6 + $0x30] sm:$0xff]  ;;  %v2413_v20 = vld [vmem:[#allocation6 + $0x48] sm:$0xff] }
 0x43e   : > { %2394 = vst.msk [vmem:[#allocation3 + $0xa] sm:$0x1] %vm896_vm4, %v2393_v6  ;;  %v2401_v13 = vmax.f32 %v2397_v2, %v2400_v7  ;;  %v2415_v21 = vld [vmem:[#allocation6 + $0x58] sm:$0xff]  ;;  %v3641_v22 = vpack.c.bf16 %v2410_v18, %v2408_v17  ;;  %v2412_v25 = vld [vmem:[#allocation6 + $0x40] sm:$0xff]  ;;  %v2414_v26 = vld [vmem:[#allocation6 + $0x50] sm:$0xff] }
 0x43f   : > { %v3643_v24 = vpack.c.bf16 %v2415_v21, %v2413_v20  ;;  %v2417_v27 = vld [vmem:[#allocation6 + $0x68] sm:$0xff]  ;;  %v2419_v28 = vld [vmem:[#allocation6 + $0x78] sm:$0xff]  ;;  %v3645_v29 = vpack.c.bf16 %v2414_v26, %v2412_v25  ;;  %v2416_v31 = vld [vmem:[#allocation6 + $0x60] sm:$0xff] }
 0x440   : > { %2402 = vst.msk [vmem:[#allocation3 + $0xb] sm:$0x1] %vm896_vm4, %v2401_v13  ;;  %v3647_v30 = vpack.c.bf16 %v2419_v28, %v2417_v27  ;;  %v2418_v32 = vld [vmem:[#allocation6 + $0x70] sm:$0xff]  ;;  %v2421_v34 = vld [vmem:[#allocation6 + $0x88] sm:$0xff]  ;;  %v2423_v36 = vld [vmem:[#allocation6 + $0x98] sm:$0xff] }
 0x441   : > { %v2428_v19 = vld [vmem:[#allocation3 + $0x1] sm:$0xff]  ;;  %v3649_v38 = vpack.c.bf16 %v2418_v32, %v2416_v31  ;;  %v3651_v40 = vpack.c.bf16 %v2423_v36, %v2421_v34  ;;  %v2422_v42 = vld [vmem:[#allocation6 + $0x90] sm:$0xff]  ;;  %v2425_v51 = vld [vmem:[#allocation6 + $0xa8] sm:$0xff] }
 0x442   : > { %3281 = vmatmul.mubr.msk.f32.vlgmr.msra.gmra.mrb[2].mxu1 %vm1037_vm5, %v2428_v19  ;;  %v2420_v41 = vld [vmem:[#allocation6 + $0x80] sm:$0xff]  ;;  %v2427_v61 = vld [vmem:[#allocation6 + $0xb8] sm:$0xff]  ;;  %v2426_v44 = vld [vmem:[#allocation6 + $0xb0] sm:$0xff] }
 0x443   : > { %3638 = vmatpush1.bf16.msra.mxu1 %v3637_v15  ;;  %2594 = vmatprep.mubr.f32.mxu1 %v3910_v0  ;;  %v3653_v10 = vpack.c.bf16 %v2422_v42, %v2420_v41  ;;  %v3655_v8 = vpack.c.bf16 %v2427_v61, %v2425_v51  ;;  %v2424_v43 = vld [vmem:[#allocation6 + $0xa0] sm:$0xff]  ;;  %v2603_v45 = vld [vmem:[#allocation6 + $0x188] sm:$0xff]  ;;  %v2605_v46 = vld [vmem:[#allocation6 + $0x198] sm:$0xff] }
 0x444   : > { %3640 = vmatprep.subr.bf16.mxu1 %v3639_v16  ;;  %v3657_v12 = vpack.c.bf16 %v2426_v44, %v2424_v43  ;;  %v3659_v47 = vpack.c.bf16 %v2605_v46, %v2603_v45  ;;  %v2602_v48 = vld [vmem:[#allocation6 + $0x180] sm:$0xff]  ;;  %v2604_v49 = vld [vmem:[#allocation6 + $0x190] sm:$0xff]  ;;  %v2607_v50 = vld [vmem:[#allocation6 + $0x1a8] sm:$0xff] }
 0x445   : > { %v2609_v52 = vld [vmem:[#allocation6 + $0x1b8] sm:$0xff]  ;;  %v3661_v53 = vpack.c.bf16 %v2604_v49, %v2602_v48  ;;  %v2606_v56 = vld [vmem:[#allocation6 + $0x1a0] sm:$0xff]  ;;  %v2608_v57 = vld [vmem:[#allocation6 + $0x1b0] sm:$0xff] }
 0x446   : > { %v3663_v54 = vpack.c.bf16 %v2609_v52, %v2607_v50  ;;  %v2403_v58 = vld [vmem:[#allocation3] sm:$0xff]  ;;  %v2611_v14 = vld [vmem:[#allocation6 + $0x1c8] sm:$0xff]  ;;  %v3665_v60 = vpack.c.bf16 %v2608_v57, %v2606_v56  ;;  %v2612_v39 = vld [vmem:[#allocation6 + $0x1d0] sm:$0xff] }
 0x447   : > { %3642 = vmatpush1.bf16.msra.mxu1 %v3641_v22  ;;  %v2613_v59 = vld [vmem:[#allocation6 + $0x1d8] sm:$0xff]  ;;  %v2610_v63 = vld [vmem:[#allocation6 + $0x1c0] sm:$0xff]  ;;  %v2615_v55 = vld [vmem:[#allocation6 + $0x1e8] sm:$0xff] }
 0x448   : > { %3644 = vmatprep.subr.bf16.mxu1 %v3643_v24  ;;  %v3667_v62 = vpack.c.bf16 %v2613_v59, %v2611_v14  ;;  %v2617_v1 = vld [vmem:[#allocation6 + $0x1f8] sm:$0xff]  ;;  %v3669_v2 = vpack.c.bf16 %v2612_v39, %v2610_v63  ;;  %v2614_v4 = vld [vmem:[#allocation6 + $0x1e0] sm:$0xff]  ;;  %v2616_v5 = vld [vmem:[#allocation6 + $0x1f0] sm:$0xff] }
 0x449   : > { %v3671_v3 = vpack.c.bf16 %v2617_v1, %v2615_v55  ;;  %v2619_v6 = vld [vmem:[#allocation6 + $0x208] sm:$0xff]  ;;  %v2621_v7 = vld [vmem:[#allocation6 + $0x218] sm:$0xff]  ;;  %v3673_v9 = vpack.c.bf16 %v2616_v5, %v2614_v4  ;;  %v2618_v13 = vld [vmem:[#allocation6 + $0x200] sm:$0xff] }
 0x44a   : > { %v3675_v11 = vpack.c.bf16 %v2621_v7, %v2619_v6  ;;  %v2620_v15 = vld [vmem:[#allocation6 + $0x210] sm:$0xff]  ;;  %v2623_v16 = vld [vmem:[#allocation6 + $0x228] sm:$0xff]  ;;  %v2625_v17 = vld [vmem:[#allocation6 + $0x238] sm:$0xff] }
 0x44b   : > { %3646 = vmatpush1.bf16.msra.mxu1 %v3645_v29  ;;  %v3677_v18 = vpack.c.bf16 %v2620_v15, %v2618_v13  ;;  %v3679_v19 = vpack.c.bf16 %v2625_v17, %v2623_v16  ;;  %v2622_v20 = vld [vmem:[#allocation6 + $0x220] sm:$0xff]  ;;  %v2624_v21 = vld [vmem:[#allocation6 + $0x230] sm:$0xff]  ;;  %v2704_v22 = vld [vmem:[#allocation6 + $0x248] sm:$0xff] }
 0x44c   : > { %3648 = vmatprep.subr.bf16.mxu1 %v3647_v30  ;;  %v2706_v24 = vld [vmem:[#allocation6 + $0x258] sm:$0xff]  ;;  %v3681_v25 = vpack.c.bf16 %v2624_v21, %v2622_v20  ;;  %v2703_v27 = vld [vmem:[#allocation6 + $0x240] sm:$0xff]  ;;  %v2705_v28 = vld [vmem:[#allocation6 + $0x250] sm:$0xff] }
 0x44d   : > { %v3683_v26 = vpack.c.bf16 %v2706_v24, %v2704_v22  ;;  %v2708_v29 = vld [vmem:[#allocation6 + $0x268] sm:$0xff]  ;;  %v2710_v30 = vld [vmem:[#allocation6 + $0x278] sm:$0xff]  ;;  %v3685_v31 = vpack.c.bf16 %v2705_v28, %v2703_v27  ;;  %v2707_v34 = vld [vmem:[#allocation6 + $0x260] sm:$0xff] }
 0x44e   : > { %v3687_v32 = vpack.c.bf16 %v2710_v30, %v2708_v29  ;;  %v2709_v36 = vld [vmem:[#allocation6 + $0x270] sm:$0xff]  ;;  %v2714_v41 = vld [vmem:[#allocation6 + $0x298] sm:$0xff]  ;;  %v2711_v61 = vld [vmem:[#allocation6 + $0x280] sm:$0xff] }
 0x44f   : > { %3650 = vmatpush1.bf16.msra.mxu1 %v3649_v38  ;;  %v2601_v38 = vld [vmem:[#allocation3 + $0x2] sm:$0xff]  ;;  %v3689_v42 = vpack.c.bf16 %v2709_v36, %v2707_v34  ;;  %v2725_v59 = vld [vmem:[#allocation6 + $0x2f0] sm:$0xff] }
 0x450   : > { %3652 = vmatprep.subr.bf16.mxu1 %v3651_v40  ;;  %v2712_v40 = vld [vmem:[#allocation6 + $0x288] sm:$0xff]  ;;  %v2718_v43 = vld [vmem:[#allocation6 + $0x2b8] sm:$0xff]  ;;  %v2715_v46 = vld [vmem:[#allocation6 + $0x2a0] sm:$0xff] }
 0x451   : > { %v3691_v51 = vpack.c.bf16 %v2714_v41, %v2712_v40  ;;  %v2722_v48 = vld [vmem:[#allocation6 + $0x2d8] sm:$0xff]  ;;  %v2719_v52 = vld [vmem:[#allocation6 + $0x2c0] sm:$0xff]  ;;  %v2806_v1 = vld [vmem:[#allocation6 + $0x310] sm:$0xff] }
 0x452   : > { %v2726_v56 = vld [vmem:[#allocation6 + $0x2f8] sm:$0xff]  ;;  %v2723_v14 = vld [vmem:[#allocation6 + $0x2e0] sm:$0xff]  ;;  %v2810_v7 = vld [vmem:[#allocation6 + $0x330] sm:$0xff] }
 0x453   : > { %3654 = vmatpush1.bf16.msra.mxu1 %v3653_v10  ;;  %v2713_v10 = vld [vmem:[#allocation6 + $0x290] sm:$0xff]  ;;  %v3705_v63 = vpack.c.bf16 %v2725_v59, %v2723_v14  ;;  %v2804_v55 = vld [vmem:[#allocation6 + $0x300] sm:$0xff]  ;;  %v2815_v13 = vld [vmem:[#allocation6 + $0x358] sm:$0xff] }
 0x454   : > { %3656 = vmatprep.subr.bf16.mxu1 %v3655_v8  ;;  %v2716_v8 = vld [vmem:[#allocation6 + $0x2a8] sm:$0xff]  ;;  %v3693_v44 = vpack.c.bf16 %v2713_v10, %v2711_v61  ;;  %v3709_v4 = vpack.c.bf16 %v2806_v1, %v2804_v55  ;;  %v2808_v6 = vld [vmem:[#allocation6 + $0x320] sm:$0xff]  ;;  %v2819_v20 = vld [vmem:[#allocation6 + $0x378] sm:$0xff] }
 0x455   : > { %v3695_v45 = vpack.c.bf16 %v2718_v43, %v2716_v8  ;;  %v3713_v15 = vpack.c.bf16 %v2810_v7, %v2808_v6  ;;  %v2812_v17 = vld [vmem:[#allocation6 + $0x340] sm:$0xff]  ;;  %v2823_v27 = vld [vmem:[#allocation6 + $0x398] sm:$0xff]  ;;  %v2826_v40 = vld [vmem:[#allocation6 + $0x3b0] sm:$0xff] }
 0x456   : > { %v2816_v24 = vld [vmem:[#allocation6 + $0x360] sm:$0xff]  ;;  %v2985_v61 = vld [vmem:[%s4720_s5 + $0x88] sm:$0xff]  ;;  %v2968_v10 = vld [vmem:[%s4720_s5] sm:$0xff] }
 0x457   : > { %3658 = vmatpush1.bf16.msra.mxu1 %v3657_v12  ;;  %v2717_v12 = vld [vmem:[#allocation6 + $0x2b0] sm:$0xff]  ;;  %v2820_v30 = vld [vmem:[#allocation6 + $0x380] sm:$0xff] }
 0x458   : > { %3660 = vmatprep.subr.bf16.mxu1 %v3659_v47  ;;  %v2720_v47 = vld [vmem:[#allocation6 + $0x2c8] sm:$0xff]  ;;  %v3697_v49 = vpack.c.bf16 %v2717_v12, %v2715_v46  ;;  %v2969_v43 = vld [vmem:[%s4720_s5 + $0x8] sm:$0xff] }
 0x459   : > { %v3699_v50 = vpack.c.bf16 %v2722_v48, %v2720_v47  ;;  %v3733_v46 = vpack.c.bf16 %v2969_v43, %v2968_v10  ;;  %v2970_v47 = vld [vmem:[%s4720_s5 + $0x10] sm:$0xff]  ;;  %v2971_v48 = vld [vmem:[%s4720_s5 + $0x18] sm:$0xff] }
 0x45a   : > { %3282 = vmatmul.mubr.msk.f32.vlgmr.msra.gmra.mrb[2].mxu1 %vm1037_vm5, %v2403_v58 }
 0x45b   : > { %3662 = vmatpush1.bf16.msra.mxu1 %v3661_v53  ;;  %2693 = vmatprep.mubr.f32.mxu1 %v3910_v0  ;;  %v2721_v53 = vld [vmem:[#allocation6 + $0x2d0] sm:$0xff] }
 0x45c   : > { %3664 = vmatprep.subr.bf16.mxu1 %v3663_v54  ;;  %v2724_v54 = vld [vmem:[#allocation6 + $0x2e8] sm:$0xff]  ;;  %v3701_v57 = vpack.c.bf16 %v2721_v53, %v2719_v52  ;;  %v3737_v52 = vpack.c.bf16 %v2971_v48, %v2970_v47 }
 0x45d   : > { %v3703_v58 = vpack.c.bf16 %v2726_v56, %v2724_v54  ;;  %v2972_v54 = vld [vmem:[%s4720_s5 + $0x20] sm:$0xff]  ;;  %v2973_v56 = vld [vmem:[%s4720_s5 + $0x28] sm:$0xff] }
 0x45e   : > { %v3741_v14 = vpack.c.bf16 %v2973_v56, %v2972_v54 }
 0x45f   : > { %3666 = vmatpush1.bf16.msra.mxu1 %v3665_v60  ;;  %v2805_v60 = vld [vmem:[#allocation6 + $0x308] sm:$0xff] }
 0x460   : > { %3668 = vmatprep.subr.bf16.mxu1 %v3667_v62  ;;  %v2807_v62 = vld [vmem:[#allocation6 + $0x318] sm:$0xff] }
 0x461   : > { %v3707_v39 = vpack.c.bf16 %v2807_v62, %v2805_v60  ;;  %v2974_v60 = vld [vmem:[%s4720_s5 + $0x30] sm:$0xff]  ;;  %v2975_v62 = vld [vmem:[%s4720_s5 + $0x38] sm:$0xff] }
 0x462   : > { %v3745_v55 = vpack.c.bf16 %v2975_v62, %v2974_v60 }
 0x463   : > { %3670 = vmatpush1.bf16.msra.mxu1 %v3669_v2  ;;  %v2809_v2 = vld [vmem:[#allocation6 + $0x328] sm:$0xff] }
 0x464   : > { %3672 = vmatprep.subr.bf16.mxu1 %v3671_v3  ;;  %v2811_v3 = vld [vmem:[#allocation6 + $0x338] sm:$0xff] }
 0x465   : > { %v3711_v5 = vpack.c.bf16 %v2811_v3, %v2809_v2  ;;  %v2976_v2 = vld [vmem:[%s4720_s5 + $0x40] sm:$0xff]  ;;  %v2977_v3 = vld [vmem:[%s4720_s5 + $0x48] sm:$0xff] }
 0x466   : > { %v3749_v6 = vpack.c.bf16 %v2977_v3, %v2976_v2 }
 0x467   : > { %3674 = vmatpush1.bf16.msra.mxu1 %v3673_v9  ;;  %v2702_v9 = vld [vmem:[#allocation3 + $0x3] sm:$0xff] }
 0x468   : > { %3676 = vmatprep.subr.bf16.mxu1 %v3675_v11  ;;  %v2813_v11 = vld [vmem:[#allocation6 + $0x348] sm:$0xff] }
 0x469   : > { %v3715_v16 = vpack.c.bf16 %v2815_v13, %v2813_v11  ;;  %v2979_v11 = vld [vmem:[%s4720_s5 + $0x58] sm:$0xff]  ;;  %v2996_v13 = vld [vmem:[%s4720_s5 + $0xe0] sm:$0xff] }
 0x46b   : > { %3678 = vmatpush1.bf16.msra.mxu1 %v3677_v18  ;;  %v2814_v18 = vld [vmem:[#allocation6 + $0x350] sm:$0xff] }
 0x46c   : > { %3680 = vmatprep.subr.bf16.mxu1 %v3679_v19  ;;  %v2817_v19 = vld [vmem:[#allocation6 + $0x368] sm:$0xff]  ;;  %v3717_v21 = vpack.c.bf16 %v2814_v18, %v2812_v17 }
 0x46d   : > { %v3719_v22 = vpack.c.bf16 %v2819_v20, %v2817_v19  ;;  %v2980_v18 = vld [vmem:[%s4720_s5 + $0x60] sm:$0xff]  ;;  %v2981_v19 = vld [vmem:[%s4720_s5 + $0x68] sm:$0xff] }
 0x46e   : > { %v3757_v20 = vpack.c.bf16 %v2981_v19, %v2980_v18 }
 0x46f   : > { %3682 = vmatpush1.bf16.msra.mxu1 %v3681_v25  ;;  %v2818_v25 = vld [vmem:[#allocation6 + $0x370] sm:$0xff] }
 0x470   : > { %3684 = vmatprep.subr.bf16.mxu1 %v3683_v26  ;;  %v2821_v26 = vld [vmem:[#allocation6 + $0x388] sm:$0xff]  ;;  %v3721_v28 = vpack.c.bf16 %v2818_v25, %v2816_v24 }
 0x471   : > { %v3723_v29 = vpack.c.bf16 %v2823_v27, %v2821_v26 }
 0x472   : > { %3283 = vmatmul.mubr.msk.f32.vlgmr.msra.gmra.mrb[2].mxu1 %vm1037_vm5, %v2601_v38  ;;  %v2824_v38 = vld [vmem:[#allocation6 + $0x3a0] sm:$0xff] }
 0x473   : > { %3686 = vmatpush1.bf16.msra.mxu1 %v3685_v31  ;;  %2794 = vmatprep.mubr.f32.mxu1 %v3910_v0  ;;  %v2825_v31 = vld [vmem:[#allocation6 + $0x3a8] sm:$0xff]  ;;  %v3729_v41 = vpack.c.bf16 %v2826_v40, %v2824_v38 }
 0x474   : > { %3688 = vmatprep.subr.bf16.mxu1 %v3687_v32  ;;  %v2827_v32 = vld [vmem:[#allocation6 + $0x3b8] sm:$0xff] }
 0x475   : > { %v3727_v36 = vpack.c.bf16 %v2827_v32, %v2825_v31 }
 0x477   : > { %3690 = vmatpush1.bf16.msra.mxu1 %v3689_v42  ;;  %v2803_v42 = vld [vmem:[#allocation3 + $0x4] sm:$0xff] }
 0x478   : > { %3692 = vmatprep.subr.bf16.mxu1 %v3691_v51  ;;  %v2984_v51 = vld [vmem:[%s4720_s5 + $0x80] sm:$0xff] }
 0x479   : > { %v3731_v8 = vpack.c.bf16 %v2985_v61, %v2984_v51 }
 0x47b   : > { %3694 = vmatpush1.bf16.msra.mxu1 %v3693_v44  ;;  %v2986_v44 = vld [vmem:[%s4720_s5 + $0x90] sm:$0xff]  ;;  %3732 = vmatprep.subr.bf16.mxu0 %v3731_v8 }
 0x47c   : > { %3696 = vmatprep.subr.bf16.mxu1 %v3695_v45  ;;  %v2987_v45 = vld [vmem:[%s4720_s5 + $0x98] sm:$0xff]  ;;  %3734 = vmatpush3.bf16.msra.mxu0 %v3733_v46 }
 0x47d   : > { %v3735_v12 = vpack.c.bf16 %v2987_v45, %v2986_v44  ;;  %v2998_v45 = vld [vmem:[%s4720_s5 + $0xf0] sm:$0xff]  ;;  %v2999_v46 = vld [vmem:[%s4720_s5 + $0xf8] sm:$0xff] }
 0x47f   : > { %3698 = vmatpush1.bf16.msra.mxu1 %v3697_v49  ;;  %v2988_v49 = vld [vmem:[%s4720_s5 + $0xa0] sm:$0xff]  ;;  %3736 = vmatprep.subr.bf16.mxu0 %v3735_v12  ;;  %v2982_v12 = vld [vmem:[%s4720_s5 + $0x70] sm:$0xff] }
 0x480   : > { %3700 = vmatprep.subr.bf16.mxu1 %v3699_v50  ;;  %v2989_v50 = vld [vmem:[%s4720_s5 + $0xa8] sm:$0xff]  ;;  %3738 = vmatpush3.bf16.msra.mxu0 %v3737_v52  ;;  %v2983_v52 = vld [vmem:[%s4720_s5 + $0x78] sm:$0xff] }
 0x481   : > { %v3739_v53 = vpack.c.bf16 %v2989_v50, %v2988_v49  ;;  %v3759_v50 = vpack.c.bf16 %v2999_v46, %v2998_v45  ;;  %v3761_v56 = vpack.c.bf16 %v2983_v52, %v2982_v12 }
 0x483   : > { %3702 = vmatpush1.bf16.msra.mxu1 %v3701_v57  ;;  %v2990_v57 = vld [vmem:[%s4720_s5 + $0xb0] sm:$0xff]  ;;  %3740 = vmatprep.subr.bf16.mxu0 %v3739_v53 }
 0x484   : > { %3704 = vmatprep.subr.bf16.mxu1 %v3703_v58  ;;  %v2991_v58 = vld [vmem:[%s4720_s5 + $0xb8] sm:$0xff]  ;;  %3742 = vmatpush3.bf16.msra.mxu0 %v3741_v14 }
 0x485   : > { %v3743_v59 = vpack.c.bf16 %v2991_v58, %v2990_v57 }
 0x487   : > { %3706 = vmatpush1.bf16.msra.mxu1 %v3705_v63  ;;  %v2992_v63 = vld [vmem:[%s4720_s5 + $0xc0] sm:$0xff]  ;;  %3744 = vmatprep.subr.bf16.mxu0 %v3743_v59 }
 0x488   : > { %3708 = vmatprep.subr.bf16.mxu1 %v3707_v39  ;;  %v2993_v39 = vld [vmem:[%s4720_s5 + $0xc8] sm:$0xff]  ;;  %3746 = vmatpush3.bf16.msra.mxu0 %v3745_v55 }
 0x489   : > { %v3747_v1 = vpack.c.bf16 %v2993_v39, %v2992_v63 }
 0x48a   : > { %3284 = vmatmul.mubr.msk.f32.vlgmr.msra.gmra.mrb[2].mxu1 %vm1037_vm5, %v2702_v9  ;;  %v2978_v9 = vld [vmem:[%s4720_s5 + $0x50] sm:$0xff] }
 0x48b   : > { %3710 = vmatpush1.bf16.msra.mxu1 %v3709_v4  ;;  %2895 = vmatprep.mubr.f32.mxu1 %v3910_v0  ;;  %v2822_v0 = vld [vmem:[#allocation6 + $0x390] sm:$0xff]  ;;  %v2994_v4 = vld [vmem:[%s4720_s5 + $0xd0] sm:$0xff] }
 0x48c   : > { %3712 = vmatprep.subr.bf16.mxu1 %v3711_v5  ;;  %v3725_v34 = vpack.c.bf16 %v2822_v0, %v2820_v30  ;;  %v2995_v5 = vld [vmem:[%s4720_s5 + $0xd8] sm:$0xff]  ;;  %3748 = vmatprep.subr.bf16.mxu0 %v3747_v1 }
 0x48d   : > { %v3751_v7 = vpack.c.bf16 %v2995_v5, %v2994_v4  ;;  %3750 = vmatpush3.bf16.msra.mxu0 %v3749_v6 }
 0x48f   : > { %3714 = vmatpush1.bf16.msra.mxu1 %v3713_v15  ;;  %v2997_v15 = vld [vmem:[%s4720_s5 + $0xe8] sm:$0xff]  ;;  %3752 = vmatprep.subr.bf16.mxu0 %v3751_v7 }
 0x490   : > { %3716 = vmatprep.subr.bf16.mxu1 %v3715_v16  ;;  %v3753_v16 = vpack.c.bf16 %v2979_v11, %v2978_v9  ;;  %v3755_v17 = vpack.c.bf16 %v2997_v15, %v2996_v13  ;;  %v1664_v9 = vpop.xlane.xlu1 %1663  ;;  %v1666_v11 = vand.u32 127, %v861_v33 }
 0x491   : > { %vm1667_vm9 = vcmp.eq.f32.partialorder %v4562_v23, %v1664_v9 }
 0x492   : > { %3754 = vmatpush3.bf16.msra.mxu0 %v3753_v16  ;;  %v1668_v13 = vsel %vm1667_vm9, %v1666_v11, 10 }
 0x493   : > { %3718 = vmatpush1.bf16.msra.mxu1 %v3717_v21  ;;  %3756 = vmatprep.subr.bf16.mxu0 %v3755_v17  ;;  %v2904_v21 = vld [vmem:[%s4719_s4] sm:$0x3]  ;;  %v1669_v18 = vsel %vm1661_vm8, %v1668_v13, 2147483647 }
 0x494   : > { %3720 = vmatprep.subr.bf16.mxu1 %v3719_v22  ;;  %v2909_v22 = vrot.slane %v2904_v21, %v4216_v35  ;;  %v2913_v24 = vrot.slane %v2904_v21, %v4221_v37  ;;  %v3000_v17 = vld [vmem:[%s4721_s6] sm:$0x1]  ;;  %v1671_v21 = vshra.s32 %v1669_v18, 16 }
 0x496   : > { %3758 = vmatpush3.bf16.msra.mxu0 %v3757_v20 }
 0x497   : > { %3722 = vmatpush1.bf16.msra.mxu1 %v3721_v28  ;;  %3760 = vmatprep.subr.bf16.mxu0 %v3759_v50 }
 0x498   : > { %3724 = vmatprep.subr.bf16.mxu1 %v3723_v29 }
 0x49a   : > { %3762 = vmatpush3.bf16.msra.mxu0 %v3761_v56 }
 0x49b   : > { %3726 = vmatpush1.bf16.msra.mxu1 %v3725_v34 }
 0x49c   : > { %3728 = vmatprep.subr.bf16.mxu1 %v3727_v36 }
 0x49f   : > { %3730 = vmatpush1.bf16.msra.mxu1 %v3729_v41 }
 0x4a2   : > { %3285 = vmatmul.mubr.msk.f32.vlgmr.msra.gmra.mrb[2].mxu1 %vm1037_vm5, %v2803_v42 }
 0x575   : > { %v2897_v25 = vpop.f32.mrb[2].mxu1 }
 0x576   : > { %v2916_v26 = vadd.f32 %v2909_v22, %v2897_v25  ;;  %v2899_v27 = vpop.f32.mrb[3].mxu1  ;;  %v1670_v25 = vand.u32 65535, %v1669_v18 }
 0x577   : > { %v2917_v28 = vadd.f32 %v2913_v24, %v2899_v27  ;;  %v1673_v24 = vcvt.s32.f32 %v1671_v21 }
 0x578   : > { %v2918_v29 = vmax.f32 %v2916_v26, 0.0 }
 0x579   : > { %v2919_v30 = vmax.f32 %v2917_v28, 0.0  ;;  %v1672_v28 = vcvt.s32.f32 %v1670_v25 }
 0x57a   : > { %2920 = vst [vmem:[#allocation4] sm:$0xff] %v2918_v29 }
 0x57b   : > { %2921 = vst [vmem:[#allocation4 + $0x8] sm:$0xff] %v2919_v30 }
 0x581   : > { %v2930_v0 = vld [vmem:[#allocation4 + $0x2] ss:$0 sm:$0xff]  ;;  %v2933_v31 = vld [vmem:[#allocation4 + $0x3] ss:$0 sm:$0xff]  ;;  %v2946_v32 = vld [vmem:[#allocation4 + $0x6] ss:$0 sm:$0xff] }
 0x582   : > { %v2931_v34 = vld [vmem:[#allocation4 + $0xa] ss:$0 sm:$0xff]  ;;  %v2934_v36 = vld [vmem:[#allocation4 + $0xb] ss:$0 sm:$0xff]  ;;  %v2947_v38 = vld [vmem:[#allocation4 + $0xe] ss:$0 sm:$0xff] }
 0x583   : > { %v2932_v40 = vmax.f32 %v2930_v0, %v2931_v34  ;;  %v2935_v41 = vmax.f32 %v2933_v31, %v2934_v36  ;;  %v2948_v42 = vmax.f32 %v2946_v32, %v2947_v38  ;;  %v2949_v35 = vld [vmem:[#allocation4 + $0x7] ss:$0 sm:$0xff]  ;;  %v2950_v51 = vld [vmem:[#allocation4 + $0xf] ss:$0 sm:$0xff]  ;;  %v2938_v37 = vld [vmem:[#allocation4 + $0x4] ss:$0 sm:$0xff] }
 0x584   : > { %v2951_v61 = vmax.f32 %v2949_v35, %v2950_v51  ;;  %v2939_v10 = vld [vmem:[#allocation4 + $0xc] ss:$0 sm:$0xff]  ;;  %v2941_v8 = vld [vmem:[#allocation4 + $0x5] ss:$0 sm:$0xff]  ;;  %v2942_v43 = vld [vmem:[#allocation4 + $0xd] ss:$0 sm:$0xff] }
 0x585   : > { %v2936_v44 = vmax.f32 %v2932_v40, %v2935_v41  ;;  %v2940_v47 = vmax.f32 %v2938_v37, %v2939_v10  ;;  %v2943_v48 = vmax.f32 %v2941_v8, %v2942_v43  ;;  %v2922_v53 = vld [vmem:[#allocation4] ss:$0 sm:$0xff]  ;;  %v2923_v54 = vld [vmem:[#allocation4 + $0x8] ss:$0 sm:$0xff]  ;;  %v2925_v14 = vld [vmem:[#allocation4 + $0x1] ss:$0 sm:$0xff] }
 0x586   : > { %v2952_v49 = vmax.f32 %v2948_v42, %v2951_v61  ;;  %v2924_v58 = vmax.f32 %v2922_v53, %v2923_v54  ;;  %v2926_v59 = vld [vmem:[#allocation4 + $0x9] ss:$0 sm:$0xff] }
 0x587   : > { %2937 = vst.msk [vmem:[#allocation5 + $0x1] sm:$0x1] %vm1517_vm6, %v2936_v44  ;;  %v2944_v57 = vmax.f32 %v2940_v47, %v2943_v48  ;;  %v2927_v60 = vmax.f32 %v2925_v14, %v2926_v59 }
 0x588   : > { %2953 = vst.msk [vmem:[#allocation5 + $0x3] sm:$0x1] %vm1517_vm6, %v2952_v49 }
 0x589   : > { %2945 = vst.msk [vmem:[#allocation5 + $0x2] sm:$0x1] %vm1517_vm6, %v2944_v57  ;;  %v2928_v62 = vmax.f32 %v2924_v58, %v2927_v60 }
 0x58b   : > { %2929 = vst.msk [vmem:[#allocation5] sm:$0x1] %vm1517_vm6, %v2928_v62 }
 0x58e   : > { %v2955_v63 = vld [vmem:[#allocation5 + $0x1] sm:$0x1] }
 0x58f   : > { %v2957_v39 = vld [vmem:[#allocation5 + $0x3] sm:$0x1] }
 0x590   : > { %v3857_v55 = vpack.i.bf16 %v2955_v63, %v2957_v39  ;;  %v2956_v4 = vld [vmem:[#allocation5 + $0x2] sm:$0x1] }
 0x592   : > { %3858 = vrot.lane.b32.xlu0 %v3857_v55, %s3913_s17  ;;  %v2954_v5 = vld [vmem:[#allocation5] sm:$0x1] }
 0x604   : > { %v3859_v1 = vpop.permute.xlu0 %3858 }
 0x605   : > { %v3861_v2 = vunpack.i.h.bf16 %v3859_v1  ;;  %v3860_v3 = vunpack.i.l.bf16 %v3859_v1 }
 0x607   : > { %v2967_v6 = vsel %vm1555_vm7, %v2956_v4, %v3860_v3  ;;  %v2966_v7 = vsel %vm1555_vm7, %v2954_v5, %v3861_v2 }
 0x608   : > { %3065 = vmatprep.mubr.f32.mxu0 %v2967_v6 }
 0x609   : > { %3066 = vmatmul.mubr.f32.vlgmr.msra.gmra.mrb[16].mxu0 %v2966_v7 }
 0x6dc   : > { %v3356_v15 = vpop.f32.mrb[16].mxu0 }
 0x6dd   : > { %v3357_v16 = vpop.f32.mrb[17].mxu0 }
 0x6de   : > { %v3358_v19 = vadd.f32 %v3357_v16, %v3356_v15 }
 0x6e0   : > { %v3068_v20 = vadd.f32 %v3358_v19, %v3000_v17 }
 0x6e2   : > { %v3071_v22 = vsel %vm1661_vm8, %v3068_v20, -inf }
 0x6e3   : > { %3072 = vmax.xlane.f32.xlu0 %v3071_v22 }
 0x6e7   : > { %1674 = vmin.xlane.f32.xlu0 %v1673_v24 }
 0x770   : > { %v3073_v33 = vpop.xlane.xlu0 %3072 }
 0x771   : > { %vm3074_vm10 = vcmp.eq.f32.partialorder %v3068_v20, %v3073_v33 }
 0x772   : > { %v3075_v23 = vsel %vm3074_vm10, %v1666_v11, 10 }
 0x773   : > { %v3076_v26 = vsel %vm1661_vm8, %v3075_v23, 2147483647 }
 0x774   : > { %v1675_v27 = vpop.xlane.xlu0 %1674  ;;  %v3078_v29 = vshra.s32 %v3076_v26, 16  ;;  %v3077_v31 = vand.u32 65535, %v3076_v26 }
 0x775   : > { %vm1676_vm11 = vcmp.eq.f32.partialorder %v1673_v24, %v1675_v27  ;;  %v1681_v40 = vcvt.f32.s32 %v1675_v27 }
 0x776   : > { %v1677_v30 = vsel %vm1676_vm11, %v1672_v28, inf  ;;  %v3080_v0 = vcvt.s32.f32 %v3078_v29  ;;  %v3079_v34 = vcvt.s32.f32 %v3077_v31 }
 0x777   : > { %1678 = vmin.xlane.f32.xlu0 %v1677_v30  ;;  %v1682_v51 = vshll.u32 %v1681_v40, 16 }
 0x778   : > { %3081 = vmin.xlane.f32.xlu1 %v3080_v0 }
 0x804   : > { %v1679_v38 = vpop.xlane.xlu0 %1678 }
 0x805   : > { %v3082_v32 = vpop.xlane.xlu1 %3081  ;;  %v1680_v42 = vcvt.f32.s32 %v1679_v38 }
 0x806   : > { %vm3083_vm12 = vcmp.eq.f32.partialorder %v3080_v0, %v3082_v32  ;;  %v3088_v41 = vcvt.f32.s32 %v3082_v32 }
 0x807   : > { %v3084_v36 = vsel %vm3083_vm12, %v3079_v34, inf  ;;  %v1683_v10 = vadd.s32 %v1682_v51, %v1680_v42 }
 0x808   : > { %3085 = vmin.xlane.f32.xlu1 %v3084_v36  ;;  %v3089_v37 = vshll.u32 %v3088_v41, 16 }
 0x895   : > { %v3086_v35 = vpop.xlane.xlu1 %3085 }
 0x896   : > { %v3087_v61 = vcvt.f32.s32 %v3086_v35 }
 0x898   : > { %v3090_v8 = vadd.s32 %v3089_v37, %v3087_v61 }
 0x89a   : > { %v3091_v43 = vadd.s32 %v3090_v8, %v1683_v10 }
 0x89c   : > { %3093 = vst.msk [vmem:[%s289_s26] sm:$0x1] %vm3092_vm13, %v3091_v43 }
 0x89d PF: > { %s18_s24 = sadd.s32 1, %s3905_s24  }
 0x89e   : > { %p15_p3 = scmp.ge.s32.totalorder %s18_s24, 4  }
 0x8a0   :  { %17 = sbr.rel (!%p15_p3) target bundleno = 1 (0x1), region = 91 }
 0x8a7   :  { %3111 = vsyncpa [#allocation7], 1 }
 0x8a8   :  { %3113 = vsyncpa [#allocation7 + $0x1], 1 }

</bundles_post_ra>
